<compile_context>
chip_gen: v7x
topology: tpu7x:2x2x1
jax: 0.10.0
libtpu: 0.0.40
codegen_flags: <defaults>
</compile_context>

<pallas_src>
import functools

import jax
import jax.numpy as jnp
from jax.experimental import pallas as pl
from jax.experimental.pallas import tpu as pltpu


# --------------------------------- kernels -----------------------------------

def _deconv_kernel_noskip(xm_ref, wm_ref, shift_ref, o_ref, *, act):
    # xm_ref:    (TM, C_main)   bf16
    # wm_ref:    (C_main, 4*Cout) bf16 (BN scale pre-folded)
    # shift_ref: (1, 4*Cout)    f32
    # o_ref:     (TM, 4*Cout)
    y = jnp.dot(xm_ref[...], wm_ref[...], preferred_element_type=jnp.float32)
    y = y + shift_ref[...]
    y = jnp.tanh(y) if act == "tanh" else jax.nn.sigmoid(y)
    o_ref[...] = y.astype(o_ref.dtype)


def _deconv_kernel_skip(xm_ref, xs_ref, wm_ref, ws_ref, shift_ref, o_ref, *, act):
    # Fused "concat along Cin": dot(x_main, W[:C_main]) + dot(x_skip, W[C_main:])
    y = jnp.dot(xm_ref[...], wm_ref[...], preferred_element_type=jnp.float32)
    y = y + jnp.dot(xs_ref[...], ws_ref[...], preferred_element_type=jnp.float32)
    y = y + shift_ref[...]
    y = jnp.tanh(y) if act == "tanh" else jax.nn.sigmoid(y)
    o_ref[...] = y.astype(o_ref.dtype)


# --------------------------------- wrapper ------------------------------------

def _choose_row_tile(m, cap=1024):
    """Largest row tile <= cap dividing m (multiple of 8), else m itself."""
    if m <= cap:
        return m
    t = cap - (cap % 8)
    while t >= 8:
        if m % t == 0:
            return t
        t -= 8
    return m


def deconv2x2_layer(x_main2d, x_skip2d, w, scale, shift, *, act, N, H, W,
                    out_dtype):
    """Fused ConvTranspose2d(k=2,s=2) [+ channel-concat skip] + affine + act.

    x_main2d: (M, C_main)  flattened NHWC activation, M = N*H*W
    x_skip2d: (M, C_skip)  flattened NHWC skip fmap (or None)
    w:        (C_main [+ C_skip], Cout, 2, 2)  PyTorch ConvTranspose2d weight
    scale, shift: (Cout,)   folded BN/bias affine
    Returns flattened NHWC output of shape (N*2H*2W, Cout).
    """
    Cin_total, Cout = w.shape[0], w.shape[1]
    C_main = x_main2d.shape[1]
    M = x_main2d.shape[0]
    assert M == N * H * W
    K = 4 * Cout

    # Pack (Cin, Cout, 2, 2) -> (Cin, 4*Cout), last axis ordered (a, b, c),
    # and fold the BN scale into the weights (host/XLA side, constant-folded).
    wp = jnp.transpose(w, (0, 2, 3, 1)).reshape(Cin_total, K)
    wp = (wp * jnp.tile(scale, 4)[None, :]).astype(jnp.bfloat16)
    shift4 = jnp.tile(shift, 4).reshape(1, K).astype(jnp.float32)

    xm = x_main2d.astype(jnp.bfloat16)
    wm = wp[:C_main]

    TM = _choose_row_tile(M)
    grid = (M // TM,)
    compiler_params = pltpu.CompilerParams(
        dimension_semantics=("parallel",),
        vmem_limit_bytes=32 * 1024 * 1024,
    )

    if x_skip2d is None:
        kernel = functools.partial(_deconv_kernel_noskip, act=act)
        y = pl.pallas_call(
            kernel,
            out_shape=jax.ShapeDtypeStruct((M, K), out_dtype),
            grid_spec=pltpu.PrefetchScalarGridSpec(
                num_scalar_prefetch=0,
                grid=grid,
                in_specs=[
                    pl.BlockSpec((TM, C_main), lambda i: (i, 0)),
                    pl.BlockSpec((C_main, K), lambda i: (0, 0)),
                    pl.BlockSpec((1, K), lambda i: (0, 0)),
                ],
                out_specs=pl.BlockSpec((TM, K), lambda i: (i, 0)),
            ),
            compiler_params=compiler_params,
        )(xm, wm, shift4)
    else:
        xs = x_skip2d.astype(jnp.bfloat16)
        C_skip = xs.shape[1]
        assert C_main + C_skip == Cin_total
        ws = wp[C_main:]
        kernel = functools.partial(_deconv_kernel_skip, act=act)
        y = pl.pallas_call(
            kernel,
            out_shape=jax.ShapeDtypeStruct((M, K), out_dtype),
            grid_spec=pltpu.PrefetchScalarGridSpec(
                num_scalar_prefetch=0,
                grid=grid,
                in_specs=[
                    pl.BlockSpec((TM, C_main), lambda i: (i, 0)),
                    pl.BlockSpec((TM, C_skip), lambda i: (i, 0)),
                    pl.BlockSpec((C_main, K), lambda i: (0, 0)),
                    pl.BlockSpec((C_skip, K), lambda i: (0, 0)),
                    pl.BlockSpec((1, K), lambda i: (0, 0)),
                ],
                out_specs=pl.BlockSpec((TM, K), lambda i: (i, 0)),
            ),
            compiler_params=compiler_params,
        )(xm, xs, wm, ws, shift4)

    # Scatter y[(n*H+i)*W+j, (a*2+b)*Cout+c] -> out[n, 2i+a, 2j+b, c]:
    # one small transpose on the lane-dense tensor, plus free reshapes.
    y = y.reshape(N, H, W, 2, 2, Cout)
    y = jnp.transpose(y, (0, 1, 3, 2, 4, 5)).reshape(N * 2 * H * 2 * W, Cout)
    return y


# ------------------------------ parameter setup -------------------------------

BN_EPS = 1e-5


def _init_layer(key, cin, cout, with_bn):
    kw, kb, kg, kbeta = jax.random.split(key, 4)
    w = 0.1 * jax.random.normal(kw, (cin, cout, 2, 2), dtype=jnp.float32)
    bias = 0.1 * jax.random.normal(kb, (cout,), dtype=jnp.float32)
    if with_bn:
        gamma = 1.0 + 0.1 * jax.random.normal(kg, (cout,), dtype=jnp.float32)
        beta = 0.1 * jax.random.normal(kbeta, (cout,), dtype=jnp.float32)
        running_mean = jnp.zeros((cout,), jnp.float32)
        running_var = jnp.ones((cout,), jnp.float32)
        scale = gamma / jnp.sqrt(running_var + BN_EPS)
        shift = (bias - running_mean) * scale + beta
    else:
        scale = jnp.ones((cout,), jnp.float32)
        shift = bias
    return {"w": w, "scale": scale, "shift": shift}


def init_decoder_params(key, last_fmap_channels, output_channels, n_classes):
    c5 = last_fmap_channels
    c1, c2, c3, c4 = c5 // 8, c5 // 8, c5 // 4, c5 // 2
    if c5 == 2048:
        c1 = c5 // 32
    keys = jax.random.split(key, 5)
    return {
        "layer1": _init_layer(keys[0], c5, c5, with_bn=True),
        "layer2": _init_layer(keys[1], c5 + c4, c5, with_bn=True),
        "layer3": _init_layer(keys[2], c5 + c3, c5, with_bn=True),
        "layer4": _init_layer(keys[3], c5 + c2, c5, with_bn=True),
        "layer5": _init_layer(keys[4], c5 + c1, output_channels * n_classes,
                              with_bn=False),
    }


# -------------------------------- forward pass ---------------------------------

def decoder_forward(params, fmap1, fmap2, fmap3, fmap4, fmap5):
    """Inputs are PyTorch-style NCHW float32 tensors; output is NCHW float32."""

    def flat_nhwc(x):
        n, c, h, w = x.shape
        return jnp.transpose(x, (0, 2, 3, 1)).reshape(n * h * w, c).astype(
            jnp.bfloat16)

    N, _, H, W = fmap5.shape
    x = flat_nhwc(fmap5)
    skips = [None, flat_nhwc(fmap4), flat_nhwc(fmap3), flat_nhwc(fmap2),
             flat_nhwc(fmap1)]
    names = ["layer1", "layer2", "layer3", "layer4", "layer5"]
    acts = ["tanh", "tanh", "tanh", "tanh", "sigmoid"]

    for li, (name, skip, act) in enumerate(zip(names, skips, acts)):
        p = params[name]
        out_dtype = jnp.float32 if li == 4 else jnp.bfloat16
        x = deconv2x2_layer(x, skip, p["w"], p["scale"], p["shift"],
                            act=act, N=N, H=H, W=W, out_dtype=out_dtype)
        H, W = 2 * H, 2 * W

    cout_final = params["layer5"]["w"].shape[1]
    out = x.reshape(N, H, W, cout_final)
    return jnp.transpose(out, (0, 3, 1, 2))  # NHWC -> NCHW


# ------------------------------------ main --------------------------------------

if __name__ == "__main__":
    last_fmap_channels = 32
    output_channels = 1
    n_classes = 2
    N, H5, W5 = 2, 2, 2

    c5 = last_fmap_channels
    c1, c2, c3, c4 = c5 // 8, c5 // 8, c5 // 4, c5 // 2

    key = jax.random.PRNGKey(0)
    kp, k1, k2, k3, k4, k5 = jax.random.split(key, 6)

    params = init_decoder_params(kp, last_fmap_channels, output_channels,
                                 n_classes)

    # NCHW inputs matching an encoder pyramid (fmap5 deepest).
    fmap5 = jax.random.normal(k5, (N, c5, H5, W5), dtype=jnp.float32)
    fmap4 = jax.random.normal(k4, (N, c4, 2 * H5, 2 * W5), dtype=jnp.float32)
    fmap3 = jax.random.normal(k3, (N, c3, 4 * H5, 4 * W5), dtype=jnp.float32)
    fmap2 = jax.random.normal(k2, (N, c2, 8 * H5, 8 * W5), dtype=jnp.float32)
    fmap1 = jax.random.normal(k1, (N, c1, 16 * H5, 16 * W5), dtype=jnp.float32)

    fwd = jax.jit(functools.partial(decoder_forward, params))
    out = fwd(fmap1, fmap2, fmap3, fmap4, fmap5)
    out = jax.block_until_ready(out)

    expected_shape = (N, output_channels * n_classes, 32 * H5, 32 * W5)
    assert out.shape == expected_shape, (out.shape, expected_shape)
    assert out.dtype == jnp.float32
    assert bool(jnp.all(jnp.isfinite(out)))
    assert bool(jnp.all((out >= 0.0) & (out <= 1.0)))  # sigmoid output range

    print("KERNEL_OK")
</pallas_src>

<mosaic_0001>
module attributes {stable_mosaic.version = 11 : i64} {
  func.func @_deconv_kernel_noskip(%arg0: i32, %arg1: memref<8x32xbf16, #tpu.memory_space<vmem>>, %arg2: memref<32x128xbf16, #tpu.memory_space<vmem>>, %arg3: memref<1x128xf32, #tpu.memory_space<vmem>>, %arg4: memref<8x128xbf16, #tpu.memory_space<vmem>>) attributes {dimension_semantics = [#tpu.dimension_semantics<parallel>], iteration_bounds = array<i64: 1>, scalar_prefetch = 0 : i64, scratch_operands = 0 : i64, tpu.core_type = #tpu.core_type<tc>, window_params = [{transform_indices = @transform_0, window_bounds = array<i64: 8, 32>}, {pipeline_mode = #tpu.pipeline_mode<synchronous>, transform_indices = @transform_1, window_bounds = array<i64: 32, 128>}, {pipeline_mode = #tpu.pipeline_mode<synchronous>, transform_indices = @transform_2, window_bounds = array<i64: 1, 128>}, {transform_indices = @transform_3, window_bounds = array<i64: 8, 128>}]} {
    %c0 = arith.constant 0 : index
    %c0_0 = arith.constant 0 : index
    %0 = vector.load %arg1[%c0, %c0_0] : memref<8x32xbf16, #tpu.memory_space<vmem>>, vector<8x32xbf16>
    %c0_1 = arith.constant 0 : index
    %c0_2 = arith.constant 0 : index
    %1 = vector.load %arg2[%c0_1, %c0_2] : memref<32x128xbf16, #tpu.memory_space<vmem>>, vector<32x128xbf16>
    %cst = arith.constant dense<0.000000e+00> : vector<8x128xf32>
    %2 = tpu.matmul %0, %1, %cst {dimension_numbers = #tpu.dot_dimension_numbers<[1], [0], [0], [1], [0, 0, 1, 1], [], []>} : vector<8x32xbf16>, vector<32x128xbf16>, vector<8x128xf32> -> vector<8x128xf32>
    %c0_3 = arith.constant 0 : index
    %c0_4 = arith.constant 0 : index
    %3 = vector.load %arg3[%c0_3, %c0_4] : memref<1x128xf32, #tpu.memory_space<vmem>>, vector<1x128xf32>
    %4 = vector.broadcast %3 : vector<1x128xf32> to vector<8x128xf32>
    %5 = arith.addf %2, %4 : vector<8x128xf32>
    %6 = math.tanh %5 : vector<8x128xf32>
    %7 = arith.truncf %6 : vector<8x128xf32> to vector<8x128xbf16>
    %c0_5 = arith.constant 0 : index
    %c0_6 = arith.constant 0 : index
    %8 = vector.load %arg4[%c0_5, %c0_6] : memref<8x128xbf16, #tpu.memory_space<vmem>>, vector<8x128xbf16>
    tpu.vector_store %arg4[%c0_5, %c0_6], %7 {strides = array<i32>} : memref<8x128xbf16, #tpu.memory_space<vmem>>, vector<8x128xbf16>,
    return
  }
  func.func @transform_0(%arg0: i32) -> (i32, i32) {
    %c0_i32 = arith.constant 0 : i32
    %c0_i32_0 = arith.constant 0 : i32
    return %arg0, %c0_i32 : i32, i32
  }
  func.func @transform_1(%arg0: i32) -> (i32, i32) {
    %c0_i32 = arith.constant 0 : i32
    %c0_i32_0 = arith.constant 0 : i32
    %c0_i32_1 = arith.constant 0 : i32
    return %c0_i32, %c0_i32_0 : i32, i32
  }
  func.func @transform_2(%arg0: i32) -> (i32, i32) {
    %c0_i32 = arith.constant 0 : i32
    %c0_i32_0 = arith.constant 0 : i32
    %c0_i32_1 = arith.constant 0 : i32
    return %c0_i32, %c0_i32_0 : i32, i32
  }
  func.func @transform_3(%arg0: i32) -> (i32, i32) {
    %c0_i32 = arith.constant 0 : i32
    %c0_i32_0 = arith.constant 0 : i32
    return %arg0, %c0_i32 : i32, i32
  }
}

module attributes {stable_mosaic.version = 11 : i64} {
  func.func @_deconv_kernel_skip(%arg0: i32, %arg1: memref<32x32xbf16, #tpu.memory_space<vmem>>, %arg2: memref<32x16xbf16, #tpu.memory_space<vmem>>, %arg3: memref<32x128xbf16, #tpu.memory_space<vmem>>, %arg4: memref<16x128xbf16, #tpu.memory_space<vmem>>, %arg5: memref<1x128xf32, #tpu.memory_space<vmem>>, %arg6: memref<32x128xbf16, #tpu.memory_space<vmem>>) attributes {dimension_semantics = [#tpu.dimension_semantics<parallel>], iteration_bounds = array<i64: 1>, scalar_prefetch = 0 : i64, scratch_operands = 0 : i64, tpu.core_type = #tpu.core_type<tc>, window_params = [{transform_indices = @transform_0, window_bounds = array<i64: 32, 32>}, {transform_indices = @transform_1, window_bounds = array<i64: 32, 16>}, {pipeline_mode = #tpu.pipeline_mode<synchronous>, transform_indices = @transform_2, window_bounds = array<i64: 32, 128>}, {pipeline_mode = #tpu.pipeline_mode<synchronous>, transform_indices = @transform_3, window_bounds = array<i64: 16, 128>}, {pipeline_mode = #tpu.pipeline_mode<synchronous>, transform_indices = @transform_4, window_bounds = array<i64: 1, 128>}, {transform_indices = @transform_5, window_bounds = array<i64: 32, 128>}]} {
    %c0 = arith.constant 0 : index
    %c0_0 = arith.constant 0 : index
    %0 = vector.load %arg1[%c0, %c0_0] : memref<32x32xbf16, #tpu.memory_space<vmem>>, vector<32x32xbf16>
    %c0_1 = arith.constant 0 : index
    %c0_2 = arith.constant 0 : index
    %1 = vector.load %arg3[%c0_1, %c0_2] : memref<32x128xbf16, #tpu.memory_space<vmem>>, vector<32x128xbf16>
    %cst = arith.constant dense<0.000000e+00> : vector<32x128xf32>
    %2 = tpu.matmul %0, %1, %cst {dimension_numbers = #tpu.dot_dimension_numbers<[1], [0], [0], [1], [0, 0, 1, 1], [], []>} : vector<32x32xbf16>, vector<32x128xbf16>, vector<32x128xf32> -> vector<32x128xf32>
    %c0_3 = arith.constant 0 : index
    %c0_4 = arith.constant 0 : index
    %3 = vector.load %arg2[%c0_3, %c0_4] : memref<32x16xbf16, #tpu.memory_space<vmem>>, vector<32x16xbf16>
    %c0_5 = arith.constant 0 : index
    %c0_6 = arith.constant 0 : index
    %4 = vector.load %arg4[%c0_5, %c0_6] : memref<16x128xbf16, #tpu.memory_space<vmem>>, vector<16x128xbf16>
    %cst_7 = arith.constant dense<0.000000e+00> : vector<32x128xf32>
    %5 = tpu.matmul %3, %4, %cst_7 {dimension_numbers = #tpu.dot_dimension_numbers<[1], [0], [0], [1], [0, 0, 1, 1], [], []>} : vector<32x16xbf16>, vector<16x128xbf16>, vector<32x128xf32> -> vector<32x128xf32>
    %6 = arith.addf %2, %5 : vector<32x128xf32>
    %c0_8 = arith.constant 0 : index
    %c0_9 = arith.constant 0 : index
    %7 = vector.load %arg5[%c0_8, %c0_9] : memref<1x128xf32, #tpu.memory_space<vmem>>, vector<1x128xf32>
    %8 = vector.broadcast %7 : vector<1x128xf32> to vector<32x128xf32>
    %9 = arith.addf %6, %8 : vector<32x128xf32>
    %10 = math.tanh %9 : vector<32x128xf32>
    %11 = arith.truncf %10 : vector<32x128xf32> to vector<32x128xbf16>
    %c0_10 = arith.constant 0 : index
    %c0_11 = arith.constant 0 : index
    %12 = vector.load %arg6[%c0_10, %c0_11] : memref<32x128xbf16, #tpu.memory_space<vmem>>, vector<32x128xbf16>
    tpu.vector_store %arg6[%c0_10, %c0_11], %11 {strides = array<i32>} : memref<32x128xbf16, #tpu.memory_space<vmem>>, vector<32x128xbf16>,
    return
  }
  func.func @transform_0(%arg0: i32) -> (i32, i32) {
    %c0_i32 = arith.constant 0 : i32
    %c0_i32_0 = arith.constant 0 : i32
    return %arg0, %c0_i32 : i32, i32
  }
  func.func @transform_1(%arg0: i32) -> (i32, i32) {
    %c0_i32 = arith.constant 0 : i32
    %c0_i32_0 = arith.constant 0 : i32
    return %arg0, %c0_i32 : i32, i32
  }
  func.func @transform_2(%arg0: i32) -> (i32, i32) {
    %c0_i32 = arith.constant 0 : i32
    %c0_i32_0 = arith.constant 0 : i32
    %c0_i32_1 = arith.constant 0 : i32
    return %c0_i32, %c0_i32_0 : i32, i32
  }
  func.func @transform_3(%arg0: i32) -> (i32, i32) {
    %c0_i32 = arith.constant 0 : i32
    %c0_i32_0 = arith.constant 0 : i32
    %c0_i32_1 = arith.constant 0 : i32
    return %c0_i32, %c0_i32_0 : i32, i32
  }
  func.func @transform_4(%arg0: i32) -> (i32, i32) {
    %c0_i32 = arith.constant 0 : i32
    %c0_i32_0 = arith.constant 0 : i32
    %c0_i32_1 = arith.constant 0 : i32
    return %c0_i32, %c0_i32_0 : i32, i32
  }
  func.func @transform_5(%arg0: i32) -> (i32, i32) {
    %c0_i32 = arith.constant 0 : i32
    %c0_i32_0 = arith.constant 0 : i32
    return %arg0, %c0_i32 : i32, i32
  }
}

module attributes {stable_mosaic.version = 11 : i64} {
  func.func @_deconv_kernel_skip(%arg0: i32, %arg1: memref<128x32xbf16, #tpu.memory_space<vmem>>, %arg2: memref<128x8xbf16, #tpu.memory_space<vmem>>, %arg3: memref<32x128xbf16, #tpu.memory_space<vmem>>, %arg4: memref<8x128xbf16, #tpu.memory_space<vmem>>, %arg5: memref<1x128xf32, #tpu.memory_space<vmem>>, %arg6: memref<128x128xbf16, #tpu.memory_space<vmem>>) attributes {dimension_semantics = [#tpu.dimension_semantics<parallel>], iteration_bounds = array<i64: 1>, scalar_prefetch = 0 : i64, scratch_operands = 0 : i64, tpu.core_type = #tpu.core_type<tc>, window_params = [{transform_indices = @transform_0, window_bounds = array<i64: 128, 32>}, {transform_indices = @transform_1, window_bounds = array<i64: 128, 8>}, {pipeline_mode = #tpu.pipeline_mode<synchronous>, transform_indices = @transform_2, window_bounds = array<i64: 32, 128>}, {pipeline_mode = #tpu.pipeline_mode<synchronous>, transform_indices = @transform_3, window_bounds = array<i64: 8, 128>}, {pipeline_mode = #tpu.pipeline_mode<synchronous>, transform_indices = @transform_4, window_bounds = array<i64: 1, 128>}, {transform_indices = @transform_5, window_bounds = array<i64: 128, 128>}]} {
    %c0 = arith.constant 0 : index
    %c0_0 = arith.constant 0 : index
    %0 = vector.load %arg1[%c0, %c0_0] : memref<128x32xbf16, #tpu.memory_space<vmem>>, vector<128x32xbf16>
    %c0_1 = arith.constant 0 : index
    %c0_2 = arith.constant 0 : index
    %1 = vector.load %arg3[%c0_1, %c0_2] : memref<32x128xbf16, #tpu.memory_space<vmem>>, vector<32x128xbf16>
    %cst = arith.constant dense<0.000000e+00> : vector<128x128xf32>
    %2 = tpu.matmul %0, %1, %cst {dimension_numbers = #tpu.dot_dimension_numbers<[1], [0], [0], [1], [0, 0, 1, 1], [], []>} : vector<128x32xbf16>, vector<32x128xbf16>, vector<128x128xf32> -> vector<128x128xf32>
    %c0_3 = arith.constant 0 : index
    %c0_4 = arith.constant 0 : index
    %3 = vector.load %arg2[%c0_3, %c0_4] : memref<128x8xbf16, #tpu.memory_space<vmem>>, vector<128x8xbf16>
    %c0_5 = arith.constant 0 : index
    %c0_6 = arith.constant 0 : index
    %4 = vector.load %arg4[%c0_5, %c0_6] : memref<8x128xbf16, #tpu.memory_space<vmem>>, vector<8x128xbf16>
    %cst_7 = arith.constant dense<0.000000e+00> : vector<128x128xf32>
    %5 = tpu.matmul %3, %4, %cst_7 {dimension_numbers = #tpu.dot_dimension_numbers<[1], [0], [0], [1], [0, 0, 1, 1], [], []>} : vector<128x8xbf16>, vector<8x128xbf16>, vector<128x128xf32> -> vector<128x128xf32>
    %6 = arith.addf %2, %5 : vector<128x128xf32>
    %c0_8 = arith.constant 0 : index
    %c0_9 = arith.constant 0 : index
    %7 = vector.load %arg5[%c0_8, %c0_9] : memref<1x128xf32, #tpu.memory_space<vmem>>, vector<1x128xf32>
    %8 = vector.broadcast %7 : vector<1x128xf32> to vector<128x128xf32>
    %9 = arith.addf %6, %8 : vector<128x128xf32>
    %10 = math.tanh %9 : vector<128x128xf32>
    %11 = arith.truncf %10 : vector<128x128xf32> to vector<128x128xbf16>
    %c0_10 = arith.constant 0 : index
    %c0_11 = arith.constant 0 : index
    %12 = vector.load %arg6[%c0_10, %c0_11] : memref<128x128xbf16, #tpu.memory_space<vmem>>, vector<128x128xbf16>
    tpu.vector_store %arg6[%c0_10, %c0_11], %11 {strides = array<i32>} : memref<128x128xbf16, #tpu.memory_space<vmem>>, vector<128x128xbf16>,
    return
  }
  func.func @transform_0(%arg0: i32) -> (i32, i32) {
    %c0_i32 = arith.constant 0 : i32
    %c0_i32_0 = arith.constant 0 : i32
    return %arg0, %c0_i32 : i32, i32
  }
  func.func @transform_1(%arg0: i32) -> (i32, i32) {
    %c0_i32 = arith.constant 0 : i32
    %c0_i32_0 = arith.constant 0 : i32
    return %arg0, %c0_i32 : i32, i32
  }
  func.func @transform_2(%arg0: i32) -> (i32, i32) {
    %c0_i32 = arith.constant 0 : i32
    %c0_i32_0 = arith.constant 0 : i32
    %c0_i32_1 = arith.constant 0 : i32
    return %c0_i32, %c0_i32_0 : i32, i32
  }
  func.func @transform_3(%arg0: i32) -> (i32, i32) {
    %c0_i32 = arith.constant 0 : i32
    %c0_i32_0 = arith.constant 0 : i32
    %c0_i32_1 = arith.constant 0 : i32
    return %c0_i32, %c0_i32_0 : i32, i32
  }
  func.func @transform_4(%arg0: i32) -> (i32, i32) {
    %c0_i32 = arith.constant 0 : i32
    %c0_i32_0 = arith.constant 0 : i32
    %c0_i32_1 = arith.constant 0 : i32
    return %c0_i32, %c0_i32_0 : i32, i32
  }
  func.func @transform_5(%arg0: i32) -> (i32, i32) {
    %c0_i32 = arith.constant 0 : i32
    %c0_i32_0 = arith.constant 0 : i32
    return %arg0, %c0_i32 : i32, i32
  }
}

module attributes {stable_mosaic.version = 11 : i64} {
  func.func @_deconv_kernel_skip(%arg0: i32, %arg1: memref<512x32xbf16, #tpu.memory_space<vmem>>, %arg2: memref<512x4xbf16, #tpu.memory_space<vmem>>, %arg3: memref<32x128xbf16, #tpu.memory_space<vmem>>, %arg4: memref<4x128xbf16, #tpu.memory_space<vmem>>, %arg5: memref<1x128xf32, #tpu.memory_space<vmem>>, %arg6: memref<512x128xbf16, #tpu.memory_space<vmem>>) attributes {dimension_semantics = [#tpu.dimension_semantics<parallel>], iteration_bounds = array<i64: 1>, scalar_prefetch = 0 : i64, scratch_operands = 0 : i64, tpu.core_type = #tpu.core_type<tc>, window_params = [{transform_indices = @transform_0, window_bounds = array<i64: 512, 32>}, {transform_indices = @transform_1, window_bounds = array<i64: 512, 4>}, {pipeline_mode = #tpu.pipeline_mode<synchronous>, transform_indices = @transform_2, window_bounds = array<i64: 32, 128>}, {pipeline_mode = #tpu.pipeline_mode<synchronous>, transform_indices = @transform_3, window_bounds = array<i64: 4, 128>}, {pipeline_mode = #tpu.pipeline_mode<synchronous>, transform_indices = @transform_4, window_bounds = array<i64: 1, 128>}, {transform_indices = @transform_5, window_bounds = array<i64: 512, 128>}]} {
    %c0 = arith.constant 0 : index
    %c0_0 = arith.constant 0 : index
    %0 = vector.load %arg1[%c0, %c0_0] : memref<512x32xbf16, #tpu.memory_space<vmem>>, vector<512x32xbf16>
    %c0_1 = arith.constant 0 : index
    %c0_2 = arith.constant 0 : index
    %1 = vector.load %arg3[%c0_1, %c0_2] : memref<32x128xbf16, #tpu.memory_space<vmem>>, vector<32x128xbf16>
    %cst = arith.constant dense<0.000000e+00> : vector<512x128xf32>
    %2 = tpu.matmul %0, %1, %cst {dimension_numbers = #tpu.dot_dimension_numbers<[1], [0], [0], [1], [0, 0, 1, 1], [], []>} : vector<512x32xbf16>, vector<32x128xbf16>, vector<512x128xf32> -> vector<512x128xf32>
    %c0_3 = arith.constant 0 : index
    %c0_4 = arith.constant 0 : index
    %3 = vector.load %arg2[%c0_3, %c0_4] : memref<512x4xbf16, #tpu.memory_space<vmem>>, vector<512x4xbf16>
    %c0_5 = arith.constant 0 : index
    %c0_6 = arith.constant 0 : index
    %4 = vector.load %arg4[%c0_5, %c0_6] : memref<4x128xbf16, #tpu.memory_space<vmem>>, vector<4x128xbf16>
    %cst_7 = arith.constant dense<0.000000e+00> : vector<512x128xf32>
    %5 = tpu.matmul %3, %4, %cst_7 {dimension_numbers = #tpu.dot_dimension_numbers<[1], [0], [0], [1], [0, 0, 1, 1], [], []>} : vector<512x4xbf16>, vector<4x128xbf16>, vector<512x128xf32> -> vector<512x128xf32>
    %6 = arith.addf %2, %5 : vector<512x128xf32>
    %c0_8 = arith.constant 0 : index
    %c0_9 = arith.constant 0 : index
    %7 = vector.load %arg5[%c0_8, %c0_9] : memref<1x128xf32, #tpu.memory_space<vmem>>, vector<1x128xf32>
    %8 = vector.broadcast %7 : vector<1x128xf32> to vector<512x128xf32>
    %9 = arith.addf %6, %8 : vector<512x128xf32>
    %10 = math.tanh %9 : vector<512x128xf32>
    %11 = arith.truncf %10 : vector<512x128xf32> to vector<512x128xbf16>
    %c0_10 = arith.constant 0 : index
    %c0_11 = arith.constant 0 : index
    %12 = vector.load %arg6[%c0_10, %c0_11] : memref<512x128xbf16, #tpu.memory_space<vmem>>, vector<512x128xbf16>
    tpu.vector_store %arg6[%c0_10, %c0_11], %11 {strides = array<i32>} : memref<512x128xbf16, #tpu.memory_space<vmem>>, vector<512x128xbf16>,
    return
  }
  func.func @transform_0(%arg0: i32) -> (i32, i32) {
    %c0_i32 = arith.constant 0 : i32
    %c0_i32_0 = arith.constant 0 : i32
    return %arg0, %c0_i32 : i32, i32
  }
  func.func @transform_1(%arg0: i32) -> (i32, i32) {
    %c0_i32 = arith.constant 0 : i32
    %c0_i32_0 = arith.constant 0 : i32
    return %arg0, %c0_i32 : i32, i32
  }
  func.func @transform_2(%arg0: i32) -> (i32, i32) {
    %c0_i32 = arith.constant 0 : i32
    %c0_i32_0 = arith.constant 0 : i32
    %c0_i32_1 = arith.constant 0 : i32
    return %c0_i32, %c0_i32_0 : i32, i32
  }
  func.func @transform_3(%arg0: i32) -> (i32, i32) {
    %c0_i32 = arith.constant 0 : i32
    %c0_i32_0 = arith.constant 0 : i32
    %c0_i32_1 = arith.constant 0 : i32
    return %c0_i32, %c0_i32_0 : i32, i32
  }
  func.func @transform_4(%arg0: i32) -> (i32, i32) {
    %c0_i32 = arith.constant 0 : i32
    %c0_i32_0 = arith.constant 0 : i32
    %c0_i32_1 = arith.constant 0 : i32
    return %c0_i32, %c0_i32_0 : i32, i32
  }
  func.func @transform_5(%arg0: i32) -> (i32, i32) {
    %c0_i32 = arith.constant 0 : i32
    %c0_i32_0 = arith.constant 0 : i32
    return %arg0, %c0_i32 : i32, i32
  }
}

module attributes {stable_mosaic.version = 11 : i64} {
  func.func @_deconv_kernel_skip(%arg0: i32, %arg1: memref<1024x32xbf16, #tpu.memory_space<vmem>>, %arg2: memref<1024x4xbf16, #tpu.memory_space<vmem>>, %arg3: memref<32x8xbf16, #tpu.memory_space<vmem>>, %arg4: memref<4x8xbf16, #tpu.memory_space<vmem>>, %arg5: memref<1x8xf32, #tpu.memory_space<vmem>>, %arg6: memref<1024x8xf32, #tpu.memory_space<vmem>>) attributes {dimension_semantics = [#tpu.dimension_semantics<parallel>], iteration_bounds = array<i64: 2>, scalar_prefetch = 0 : i64, scratch_operands = 0 : i64, tpu.core_type = #tpu.core_type<tc>, window_params = [{transform_indices = @transform_0, window_bounds = array<i64: 1024, 32>}, {transform_indices = @transform_1, window_bounds = array<i64: 1024, 4>}, {pipeline_mode = #tpu.pipeline_mode<synchronous>, transform_indices = @transform_2, window_bounds = array<i64: 32, 8>}, {pipeline_mode = #tpu.pipeline_mode<synchronous>, transform_indices = @transform_3, window_bounds = array<i64: 4, 8>}, {pipeline_mode = #tpu.pipeline_mode<synchronous>, transform_indices = @transform_4, window_bounds = array<i64: 1, 8>}, {transform_indices = @transform_5, window_bounds = array<i64: 1024, 8>}]} {
    %c0 = arith.constant 0 : index
    %c0_0 = arith.constant 0 : index
    %0 = vector.load %arg1[%c0, %c0_0] : memref<1024x32xbf16, #tpu.memory_space<vmem>>, vector<1024x32xbf16>
    %c0_1 = arith.constant 0 : index
    %c0_2 = arith.constant 0 : index
    %1 = vector.load %arg3[%c0_1, %c0_2] : memref<32x8xbf16, #tpu.memory_space<vmem>>, vector<32x8xbf16>
    %cst = arith.constant dense<0.000000e+00> : vector<1024x8xf32>
    %2 = tpu.matmul %0, %1, %cst {dimension_numbers = #tpu.dot_dimension_numbers<[1], [0], [0], [1], [0, 0, 1, 1], [], []>} : vector<1024x32xbf16>, vector<32x8xbf16>, vector<1024x8xf32> -> vector<1024x8xf32>
    %c0_3 = arith.constant 0 : index
    %c0_4 = arith.constant 0 : index
    %3 = vector.load %arg2[%c0_3, %c0_4] : memref<1024x4xbf16, #tpu.memory_space<vmem>>, vector<1024x4xbf16>
    %c0_5 = arith.constant 0 : index
    %c0_6 = arith.constant 0 : index
    %4 = vector.load %arg4[%c0_5, %c0_6] : memref<4x8xbf16, #tpu.memory_space<vmem>>, vector<4x8xbf16>
    %cst_7 = arith.constant dense<0.000000e+00> : vector<1024x8xf32>
    %5 = tpu.matmul %3, %4, %cst_7 {dimension_numbers = #tpu.dot_dimension_numbers<[1], [0], [0], [1], [0, 0, 1, 1], [], []>} : vector<1024x4xbf16>, vector<4x8xbf16>, vector<1024x8xf32> -> vector<1024x8xf32>
    %6 = arith.addf %2, %5 : vector<1024x8xf32>
    %c0_8 = arith.constant 0 : index
    %c0_9 = arith.constant 0 : index
    %7 = vector.load %arg5[%c0_8, %c0_9] : memref<1x8xf32, #tpu.memory_space<vmem>>, vector<1x8xf32>
    %8 = vector.broadcast %7 : vector<1x8xf32> to vector<1024x8xf32>
    %9 = arith.addf %6, %8 : vector<1024x8xf32>
    %10 = arith.negf %9 : vector<1024x8xf32>
    %11 = math.exp %10 : vector<1024x8xf32>
    %cst_10 = arith.constant 1.000000e+00 : f32
    %12 = vector.broadcast %cst_10 : f32 to vector<1024x8xf32>
    %13 = arith.addf %12, %11 : vector<1024x8xf32>
    %14 = arith.divf %12, %13 : vector<1024x8xf32>
    %c0_11 = arith.constant 0 : index
    %c0_12 = arith.constant 0 : index
    %15 = vector.load %arg6[%c0_11, %c0_12] : memref<1024x8xf32, #tpu.memory_space<vmem>>, vector<1024x8xf32>
    tpu.vector_store %arg6[%c0_11, %c0_12], %14 {strides = array<i32>} : memref<1024x8xf32, #tpu.memory_space<vmem>>, vector<1024x8xf32>,
    return
  }
  func.func @transform_0(%arg0: i32) -> (i32, i32) {
    %c0_i32 = arith.constant 0 : i32
    %c0_i32_0 = arith.constant 0 : i32
    return %arg0, %c0_i32 : i32, i32
  }
  func.func @transform_1(%arg0: i32) -> (i32, i32) {
    %c0_i32 = arith.constant 0 : i32
    %c0_i32_0 = arith.constant 0 : i32
    return %arg0, %c0_i32 : i32, i32
  }
  func.func @transform_2(%arg0: i32) -> (i32, i32) {
    %c0_i32 = arith.constant 0 : i32
    %c0_i32_0 = arith.constant 0 : i32
    %c0_i32_1 = arith.constant 0 : i32
    return %c0_i32, %c0_i32_0 : i32, i32
  }
  func.func @transform_3(%arg0: i32) -> (i32, i32) {
    %c0_i32 = arith.constant 0 : i32
    %c0_i32_0 = arith.constant 0 : i32
    %c0_i32_1 = arith.constant 0 : i32
    return %c0_i32, %c0_i32_0 : i32, i32
  }
  func.func @transform_4(%arg0: i32) -> (i32, i32) {
    %c0_i32 = arith.constant 0 : i32
    %c0_i32_0 = arith.constant 0 : i32
    %c0_i32_1 = arith.constant 0 : i32
    return %c0_i32, %c0_i32_0 : i32, i32
  }
  func.func @transform_5(%arg0: i32) -> (i32, i32) {
    %c0_i32 = arith.constant 0 : i32
    %c0_i32_0 = arith.constant 0 : i32
    return %arg0, %c0_i32 : i32, i32
  }
}

</mosaic_0001>

<bundles_post_ra>
// kernel: tile.43
= control target key start
LH: loop header
LB: loop body
LE: loop exit
PB: predicated region body
PF: predicated region fallthrough
CT: control target
= control target key end

     0   :  { %vm7_vm0 = vcmask 261120   ;;  %s37_s8 = smov 32   ;;  %s38_s9 = smov 64   ;;  %vm13_vm1 = vcmask 1048320   ;;  %vm19_vm2 = vcmask 785920   ;;  %vm25_vm3 = vcmask 523520   ;;  %s55_s0 = inlined_call_operand.vmem [shape: f32[4,32], index: 0, kind: input, shape index: {}]   ;;  %s56_s1 = inlined_call_operand.vmem [shape: f32[1,128], index: 1, kind: output, shape index: {}]  }
   0x1   :  { %v4_v0 = vld [vmem:[%s55_s0] sm:$0xf]  ;;  %s36_s0 = smov 96  }
   0x2   :  { %5 = vst [vmem:[#allocation1] sm:$0xf] %v4_v0 }
   0x9   :  { %v10_v1 = vld [vmem:[#allocation1 + $0x3] sm:$0x1]   ;;  %v22_v2 = vld [vmem:[#allocation1 + $0x1] sm:$0x1]   ;;  %v6_v3 = vld [vmem:[#allocation1] sm:$0x1]  }
   0xa   :  { %11 = vrot.lane.b32.xlu0 %v10_v1, %s36_s0  ;;  %23 = vrot.lane.b32.xlu1 %v22_v2, %s37_s8  ;;  %v16_v4 = vld [vmem:[#allocation1 + $0x2] sm:$0x1]   ;;  %8 = vst.msk [vmem:[#allocation0] sm:$0x1] %vm7_vm0, %v6_v3  }
   0xe   :  { %17 = vrot.lane.b32.xlu0 %v16_v4, %s38_s9 }
  0x7c   :  { %v12_v5 = vpop.permute.xlu0 %11   ;;  %v24_v6 = vpop.permute.xlu1 %23  }
  0x7d   :  { %14 = vst.msk [vmem:[#allocation0] sm:$0x1] %vm13_vm1, %v12_v5  }
  0x80   :  { %v18_v7 = vpop.permute.xlu0 %17  }
  0x81   :  { %20 = vst.msk [vmem:[#allocation0] sm:$0x1] %vm19_vm2, %v18_v7  }
  0x82   :  { %26 = vst.msk [vmem:[#allocation0] sm:$0x1] %vm25_vm3, %v24_v6  }
  0x89   :  { %v30_v8 = vld [vmem:[#allocation0] sm:$0x1] }
  0x8a   :  { %32 = vst [vmem:[%s56_s1] sm:$0x1] %v30_v8 }

// kernel: mul.13
= control target key start
LH: loop header
LB: loop body
LE: loop exit
PB: predicated region body
PF: predicated region fallthrough
CT: control target
= control target key end

     0   :  { %vm7_vm0 = vcmask 261120   ;;  %s37_s8 = smov 32   ;;  %s38_s9 = smov 64   ;;  %vm13_vm1 = vcmask 1048320   ;;  %vm19_vm2 = vcmask 785920   ;;  %vm25_vm3 = vcmask 523520   ;;  %s55_s0 = inlined_call_operand.vmem [shape: f32[4,32], index: 0, kind: input, shape index: {}]   ;;  %s56_s1 = inlined_call_operand.vmem [shape: f32[128], index: 1, kind: output, shape index: {}]  }
   0x1   :  { %v4_v0 = vld [vmem:[%s55_s0] sm:$0xf]  ;;  %s36_s0 = smov 96  }
   0x2   :  { %5 = vst [vmem:[#allocation1] sm:$0xf] %v4_v0 }
   0x9   :  { %v10_v1 = vld [vmem:[#allocation1 + $0x3] sm:$0x1]   ;;  %v22_v2 = vld [vmem:[#allocation1 + $0x1] sm:$0x1]   ;;  %v6_v3 = vld [vmem:[#allocation1] sm:$0x1]  }
   0xa   :  { %11 = vrot.lane.b32.xlu0 %v10_v1, %s36_s0  ;;  %23 = vrot.lane.b32.xlu1 %v22_v2, %s37_s8  ;;  %v16_v4 = vld [vmem:[#allocation1 + $0x2] sm:$0x1]   ;;  %8 = vst.msk [vmem:[#allocation0] sm:$0x1] %vm7_vm0, %v6_v3  }
   0xe   :  { %17 = vrot.lane.b32.xlu0 %v16_v4, %s38_s9 }
  0x7c   :  { %v12_v5 = vpop.permute.xlu0 %11   ;;  %v24_v6 = vpop.permute.xlu1 %23  }
  0x7d   :  { %14 = vst.msk [vmem:[#allocation0] sm:$0x1] %vm13_vm1, %v12_v5  }
  0x80   :  { %v18_v7 = vpop.permute.xlu0 %17  }
  0x81   :  { %20 = vst.msk [vmem:[#allocation0] sm:$0x1] %vm19_vm2, %v18_v7  }
  0x82   :  { %26 = vst.msk [vmem:[#allocation0] sm:$0x1] %vm25_vm3, %v24_v6  }
  0x89   :  { %v30_v8 = vld [vmem:[#allocation0] sm:$0x1] }
  0x8a   :  { %32 = vst [vmem:[%s56_s1] sm:$0x1] %v30_v8 }

// kernel: tile.38
= control target key start
LH: loop header
LB: loop body
LE: loop exit
PB: predicated region body
PF: predicated region fallthrough
CT: control target
= control target key end

     0   :  { %2 = vsyncpa [#allocation1], 0  ;;  %s44_s6 = smov [#allocation0]   ;;  %s70_s0 = inlined_call_operand.hbm [shape: f32[32], index: 0, kind: input, shape index: {}]   ;;  %s71_s1 = inlined_call_operand.vmem [shape: f32[4,32], index: 1, kind: output, shape index: {}]  }
   0x1   :  { %s9_s7 = sshll.u32 %s44_s6, 4  ;;  %s20_s10 = scalar_lea.hbm %s70_s0, 16  ;;  %s10_s7 = int_to_ptr.vmem [resolvable:$true] %s9_s7 }
   0x2   :  { %p21_p0 = scmp.ne.s32.totalorder %s70_s0, %s20_s10  ;;  %p24_p1 = scmp.lt.u32.totalorder %s20_s10, %s70_s0 }
   0x4   :  { %p26_p2 = pnand %p24_p1, %p21_p0 }
   0x6   :  { %29 = shalt.err (!%p26_p2)
}
   0x7   :  { %s30_s15 = scalar_lea.vmem %s10_s7, 16  ;;  %s34_s16 = scalar_lea.vmem %s10_s7, 32 }
   0x8   :  { %p31_p3 = scmp.ne.s32.totalorder %s10_s7, %s30_s15  ;;  %p35_p4 = scmp.lt.s32.totalorder %s10_s7, %s10_s7 }
   0x9   :  { %p36_p5 = scmp.lt.s32.totalorder %s34_s16, %s30_s15 }
   0xb   :  { %p37_p6 = por %p36_p5, %p35_p4 }
   0xd   :  { %p38_p7 = pnand %p37_p6, %p31_p3 }
   0xf   :  { %41 = shalt.err (!%p38_p7)
}
  0x10   :  { %12 = dma.hbm_to_vmem [thread:$0]  %s70_s0, 16, %s10_s7, [#allocation1]  }
  0x11   :  { %42 = dma.done.wait [#allocation1], 16  }
  0x12   :  { %43 = vsyncadd [#allocation1], 4294967280  ;;  %v16_v0 = vld [vmem:[#allocation0] ss:$0 sm:$0xff] }
  0x13   :  { %17 = vst [vmem:[%s71_s1] sm:$0xf] %v16_v0 }
  0x14   :  { %18 = vsyncpa [#allocation1], 1 }

// kernel: tile.71
= control target key start
LH: loop header
LB: loop body
LE: loop exit
PB: predicated region body
PF: predicated region fallthrough
CT: control target
= control target key end

     0   :  { %vm7_vm0 = vcmask 15360   ;;  %s37_s8 = smov 2   ;;  %s38_s9 = smov 4   ;;  %vm13_vm1 = vcmask 64560   ;;  %vm19_vm2 = vcmask 48160   ;;  %vm25_vm3 = vcmask 31760   ;;  %s55_s0 = inlined_call_operand.vmem [shape: f32[4,2], index: 0, kind: input, shape index: {}]   ;;  %s56_s1 = inlined_call_operand.vmem [shape: f32[1,8], index: 1, kind: output, shape index: {}]  }
   0x1   :  { %v4_v0 = vld [vmem:[%s55_s0] sm:$0xf]  ;;  %s36_s0 = smov 6  }
   0x2   :  { %5 = vst [vmem:[#allocation1] sm:$0xf] %v4_v0 }
   0x9   :  { %v10_v1 = vld [vmem:[#allocation1 + $0x3] sm:$0x1]   ;;  %v22_v2 = vld [vmem:[#allocation1 + $0x1] sm:$0x1]   ;;  %v6_v3 = vld [vmem:[#allocation1] sm:$0x1]  }
   0xa   :  { %11 = vrot.lane.b32.xlu0 %v10_v1, %s36_s0  ;;  %23 = vrot.lane.b32.xlu1 %v22_v2, %s37_s8  ;;  %v16_v4 = vld [vmem:[#allocation1 + $0x2] sm:$0x1]   ;;  %8 = vst.msk [vmem:[#allocation0] sm:$0x1] %vm7_vm0, %v6_v3  }
   0xe   :  { %17 = vrot.lane.b32.xlu0 %v16_v4, %s38_s9 }
  0x7c   :  { %v12_v5 = vpop.permute.xlu0 %11   ;;  %v24_v6 = vpop.permute.xlu1 %23  }
  0x7d   :  { %14 = vst.msk [vmem:[#allocation0] sm:$0x1] %vm13_vm1, %v12_v5  }
  0x80   :  { %v18_v7 = vpop.permute.xlu0 %17  }
  0x81   :  { %20 = vst.msk [vmem:[#allocation0] sm:$0x1] %vm19_vm2, %v18_v7  }
  0x82   :  { %26 = vst.msk [vmem:[#allocation0] sm:$0x1] %vm25_vm3, %v24_v6  }
  0x89   :  { %v30_v8 = vld [vmem:[#allocation0] sm:$0x1] }
  0x8a   :  { %32 = vst [vmem:[%s56_s1] sm:$0x1] %v30_v8 }

// kernel: tile.70
= control target key start
LH: loop header
LB: loop body
LE: loop exit
PB: predicated region body
PF: predicated region fallthrough
CT: control target
= control target key end

     0   :  { %2 = vsyncpa [#allocation1], 0  ;;  %s44_s6 = smov [#allocation0]   ;;  %s70_s0 = inlined_call_operand.hbm [shape: f32[2], index: 0, kind: input, shape index: {}]   ;;  %s71_s1 = inlined_call_operand.vmem [shape: f32[4,2], index: 1, kind: output, shape index: {}]  }
   0x1   :  { %s9_s7 = sshll.u32 %s44_s6, 4  ;;  %s20_s10 = scalar_lea.hbm %s70_s0, 16  ;;  %s10_s7 = int_to_ptr.vmem [resolvable:$true] %s9_s7 }
   0x2   :  { %p21_p0 = scmp.ne.s32.totalorder %s70_s0, %s20_s10  ;;  %p24_p1 = scmp.lt.u32.totalorder %s20_s10, %s70_s0 }
   0x4   :  { %p26_p2 = pnand %p24_p1, %p21_p0 }
   0x6   :  { %29 = shalt.err (!%p26_p2)
}
   0x7   :  { %s30_s15 = scalar_lea.vmem %s10_s7, 16  ;;  %s34_s16 = scalar_lea.vmem %s10_s7, 32 }
   0x8   :  { %p31_p3 = scmp.ne.s32.totalorder %s10_s7, %s30_s15  ;;  %p35_p4 = scmp.lt.s32.totalorder %s10_s7, %s10_s7 }
   0x9   :  { %p36_p5 = scmp.lt.s32.totalorder %s34_s16, %s30_s15 }
   0xb   :  { %p37_p6 = por %p36_p5, %p35_p4 }
   0xd   :  { %p38_p7 = pnand %p37_p6, %p31_p3 }
   0xf   :  { %41 = shalt.err (!%p38_p7)
}
  0x10   :  { %12 = dma.hbm_to_vmem [thread:$0]  %s70_s0, 16, %s10_s7, [#allocation1]  }
  0x11   :  { %42 = dma.done.wait [#allocation1], 16  }
  0x12   :  { %43 = vsyncadd [#allocation1], 4294967280  ;;  %v16_v0 = vld [vmem:[#allocation0] ss:$0 sm:$0xff] }
  0x13   :  { %17 = vst [vmem:[%s71_s1] sm:$0xf] %v16_v0 }
  0x14   :  { %18 = vsyncpa [#allocation1], 1 }

// kernel: decoder_forward.5
= control target key start
LH: loop header
LB: loop body
LE: loop exit
PB: predicated region body
PF: predicated region fallthrough
CT: control target
= control target key end

     0   :  { %v111_v0 = vmov 0.0   ;;  %vm112_vm0 = vmmov 0   ;;  %vm39_vm1 = vcmask 261120   ;;  %s148_s1 = inlined_call_operand.vmem [shape: bf16[32,128], index: 1, kind: input, shape index: {}]   ;;  %s149_s0 = inlined_call_operand.vmem [shape: bf16[8,32], index: 0, kind: input, shape index: {}]   ;;  %s150_s2 = inlined_call_operand.vmem [shape: f32[1,128], index: 2, kind: input, shape index: {}]   ;;  %s151_s3 = inlined_call_operand.vmem [shape: bf16[8,128], index: 3, kind: output, shape index: {}]  }
   0x1   :  { %97 = vmatprep.subr.bf16.mxu0 %v111_v0  ;;  %v107_v1 = vld [vmem:[%s148_s1] sm:$0xff]   ;;  %101 = vmatprep.mubr.msk.bf16.mxu0 %vm112_vm0, %v111_v0  ;;  %v108_v2 = vld [vmem:[%s148_s1 + $0x8] sm:$0xff]  }
   0x2   :  { %98 = vmatpush3.bf16.msra.mxu0 %v107_v1  ;;  %v15_v3 = vld [vmem:[%s149_s0] sm:$0xf] }
   0x3   :  { %99 = vmatprep.subr.bf16.mxu0 %v111_v0  ;;  %v90_v4 = vld [vmem:[%s150_s2] ss:$0 sm:$0xff] }
   0x6   :  { %100 = vmatpush3.bf16.msra.mxu0 %v108_v2 }
   0x9   :  { %102 = vmatmul.mubr.msk.bf16.vlgmr.msra.gmra.mrb[0].mxu0 %vm39_vm1, %v15_v3 }
  0xdc   :  { %v77_v5 = vpop.f32.mrb[0].mxu0 }
  0xdd   :  { %v78_v6 = vadd.f32 %v90_v4, %v77_v5  ;;  %v103_v7 = vpop.f32.mrb[1].mxu0 }
  0xde   :  { %v80_v8 = vpop.f32.mrb[2].mxu0 }
  0xdf   :  { %109 = vtanh.f32 %v78_v6  ;;  %v104_v9 = vpop.f32.mrb[3].mxu0 }
  0xe9   :  { %v110_v10 = vpop.eup %109 }
  0xea   :  { %v84_v11 = vpack.c.bf16 %v110_v10, %v110_v10 }
  0xec   :  { %85 = vst [vmem:[%s151_s3] sm:$0xf] %v84_v11 }

// kernel: decoder_forward.6
= control target key start
LH: loop header
LB: loop body
LE: loop exit
PB: predicated region body
PF: predicated region fallthrough
CT: control target
= control target key end

     0   :  { %vm51_vm0 = vcmask 130048   ;;  %vm129_vm1 = vcmask 261120   ;;  %s355_s2 = inlined_call_operand.vmem [shape: bf16[32,128], index: 2, kind: input, shape index: {}]   ;;  %s356_s3 = inlined_call_operand.vmem [shape: bf16[16,128], index: 3, kind: input, shape index: {}]   ;;  %s357_s1 = inlined_call_operand.vmem [shape: bf16[32,16], index: 1, kind: input, shape index: {}]   ;;  %s358_s0 = inlined_call_operand.vmem [shape: bf16[32,32], index: 0, kind: input, shape index: {}]   ;;  %s359_s4 = inlined_call_operand.vmem [shape: f32[1,128], index: 4, kind: input, shape index: {}]   ;;  %s360_s5 = inlined_call_operand.vmem [shape: bf16[32,128], index: 5, kind: output, shape index: {}]  }
   0x1   :  { %v280_v0 = vld [vmem:[%s355_s2] sm:$0xff]   ;;  %v283_v3 = vld [vmem:[%s355_s2 + $0x8] sm:$0xff]  }
   0x2   :  { %v281_v1 = vld [vmem:[%s356_s3] sm:$0xff]   ;;  %268 = vmatprep.subr.bf16.mxu0 %v280_v0  ;;  %v284_v4 = vld [vmem:[%s357_s1 + $0x8] sm:$0xff]  }
   0x3   :  { %v282_v2 = vld [vmem:[%s357_s1] sm:$0xff]   ;;  %262 = vmatprep.subr.bf16.mxu1 %v281_v1  ;;  %269 = vmatpush3.bf16.msra.mxu0 %v280_v0  ;;  %v286_v6 = vld [vmem:[%s358_s0 + $0x8] sm:$0xff]  }
   0x4   :  { %263 = vmatpush3.bf16.msra.mxu1 %v281_v1  ;;  %264 = vmatprep.mubr.msk.bf16.mxu1 %vm51_vm0, %v282_v2  ;;  %v285_v5 = vld [vmem:[%s358_s0] sm:$0xff]  }
   0x5   :  { %270 = vmatprep.subr.bf16.mxu0 %v283_v3  ;;  %272 = vmatprep.mubr.msk.bf16.mxu0 %vm129_vm1, %v285_v5  ;;  %v235_v12 = vld [vmem:[%s359_s4] ss:$0 sm:$0xff] }
   0x7   :  { %265 = vmatmul.mubr.msk.bf16.vlgmr.msra.gmra.mrb[0].mxu1 %vm51_vm0, %v284_v4  ;;  %271 = vmatpush3.bf16.msra.mxu0 %v283_v3 }
   0xa   :  { %273 = vmatmul.mubr.msk.bf16.vlgmr.msra.gmra.mrb[0].mxu0 %vm129_vm1, %v286_v6 }
  0xda   :  { %v266_v7 = vpop.f32.mrb[0].mxu1 }
  0xdb   :  { %v92_v8 = vpop.f32.mrb[1].mxu1 }
  0xdc   :  { %v267_v9 = vpop.f32.mrb[2].mxu1 }
  0xdd   :  { %v95_v10 = vpop.f32.mrb[3].mxu1  ;;  %v274_v11 = vpop.f32.mrb[0].mxu0 }
  0xde   :  { %v179_v13 = vadd.f32 %v274_v11, %v266_v7  ;;  %v170_v14 = vpop.f32.mrb[1].mxu0 }
  0xdf   :  { %v171_v15 = vadd.f32 %v170_v14, %v92_v8  ;;  %v275_v16 = vpop.f32.mrb[2].mxu0 }
  0xe0   :  { %v194_v17 = vadd.f32 %v235_v12, %v179_v13  ;;  %v182_v18 = vadd.f32 %v275_v16, %v267_v9  ;;  %v173_v19 = vpop.f32.mrb[3].mxu0 }
  0xe1   :  { %v192_v20 = vadd.f32 %v235_v12, %v171_v15  ;;  %v174_v21 = vadd.f32 %v173_v19, %v95_v10 }
  0xe2   :  { %287 = vtanh.f32 %v194_v17  ;;  %v195_v22 = vadd.f32 %v235_v12, %v182_v18 }
  0xe3   :  { %289 = vtanh.f32 %v192_v20  ;;  %v193_v23 = vadd.f32 %v235_v12, %v174_v21 }
  0xe4   :  { %291 = vtanh.f32 %v195_v22 }
  0xe5   :  { %293 = vtanh.f32 %v193_v23 }
  0xec   :  { %v288_v24 = vpop.eup %287 }
  0xed   :  { %v290_v25 = vpop.eup %289 }
  0xee   :  { %v292_v26 = vpop.eup %291 }
  0xef   :  { %v294_v27 = vpop.eup %293  ;;  %v252_v28 = vpack.c.bf16 %v292_v26, %v288_v24 }
  0xf0   :  { %v247_v29 = vpack.c.bf16 %v294_v27, %v290_v25 }
  0xf1   :  { %254 = vst [vmem:[%s360_s5 + $0x8] sm:$0xff] %v252_v28  }
  0xf2   :  { %248 = vst [vmem:[%s360_s5] sm:$0xff] %v247_v29  }

// kernel: decoder_forward.7
= control target key start
LH: loop header
LB: loop body
LE: loop exit
PB: predicated region body
PF: predicated region fallthrough
CT: control target
= control target key end

     0   :  { %vm123_vm0 = vcmask 1043456   ;;  %vm98_vm1 = vcmask 64512   ;;  %vm276_vm2 = vcmask 261120   ;;  %s907_s2 = inlined_call_operand.vmem [shape: bf16[32,128], index: 2, kind: input, shape index: {}]   ;;  %s908_s3 = inlined_call_operand.vmem [shape: bf16[8,128], index: 3, kind: input, shape index: {}]   ;;  %s909_s1 = inlined_call_operand.vmem [shape: bf16[128,8], index: 1, kind: input, shape index: {}]   ;;  %s910_s0 = inlined_call_operand.vmem [shape: bf16[128,32], index: 0, kind: input, shape index: {}]   ;;  %s911_s4 = inlined_call_operand.vmem [shape: f32[1,128], index: 4, kind: input, shape index: {}]   ;;  %s912_s5 = inlined_call_operand.vmem [shape: bf16[128,128], index: 5, kind: output, shape index: {}]  }
   0x1   :  { %v709_v0 = vld [vmem:[%s907_s2] sm:$0xff]   ;;  %v711_v4 = vld [vmem:[%s907_s2 + $0x8] sm:$0xff]   ;;  %v715_v8 = vld [vmem:[%s909_s1 + $0x10] sm:$0xff]  }
   0x2   :  { %v57_v1 = vld [vmem:[%s908_s3] sm:$0xf]  ;;  %672 = vmatprep.subr.bf16.mxu0 %v709_v0  ;;  %v712_v5 = vld [vmem:[%s909_s1 + $0x8] sm:$0xff]   ;;  %v717_v9 = vld [vmem:[%s910_s0 + $0x10] sm:$0xff]  }
   0x3   :  { %708 = vmatprep.subr.msk.bf16.mxu1 %vm123_vm0, %v57_v1  ;;  %v125_v2 = vsel %vm123_vm0, %v57_v1, 0  ;;  %v710_v3 = vld [vmem:[%s909_s1] sm:$0xff]   ;;  %673 = vmatpush3.bf16.msra.mxu0 %v709_v0  ;;  %v714_v7 = vld [vmem:[%s910_s0 + $0x8] sm:$0xff]   ;;  %v716_v10 = vld [vmem:[%s909_s1 + $0x18] sm:$0xff]  }
   0x4   :  { %655 = vmatpush3.bf16.msra.mxu1 %v125_v2  ;;  %656 = vmatprep.mubr.msk.bf16.mxu1 %vm98_vm1, %v710_v3  ;;  %v713_v6 = vld [vmem:[%s910_s0] sm:$0xff]   ;;  %v718_v12 = vld [vmem:[%s910_s0 + $0x18] sm:$0xff]   ;;  %v720_v14 = vld [vmem:[%s909_s1 + $0x28] sm:$0xff]  }
   0x5   :  { %674 = vmatprep.subr.bf16.mxu0 %v711_v4  ;;  %676 = vmatprep.mubr.msk.bf16.mxu0 %vm276_vm2, %v713_v6  ;;  %v719_v11 = vld [vmem:[%s909_s1 + $0x20] sm:$0xff]   ;;  %v723_v15 = vld [vmem:[%s909_s1 + $0x30] sm:$0xff]   ;;  %v722_v16 = vld [vmem:[%s910_s0 + $0x28] sm:$0xff]  }
   0x6   :  { %v721_v13 = vld [vmem:[%s910_s0 + $0x20] sm:$0xff]   ;;  %v725_v17 = vld [vmem:[%s910_s0 + $0x30] sm:$0xff]   ;;  %v724_v18 = vld [vmem:[%s909_s1 + $0x38] sm:$0xff]  }
   0x7   :  { %657 = vmatmul.mubr.msk.bf16.vlgmr.msra.gmra.mrb[0].mxu1 %vm98_vm1, %v712_v5  ;;  %675 = vmatpush3.bf16.msra.mxu0 %v711_v4  ;;  %v726_v19 = vld [vmem:[%s910_s0 + $0x38] sm:$0xff]   ;;  %v865_v25 = vld [vmem:[%s911_s4] ss:$0 sm:$0xff] }
   0x8   :  { %660 = vmatprep.mubr.msk.bf16.mxu1 %vm98_vm1, %v715_v8 }
   0xa   :  { %677 = vmatmul.mubr.msk.bf16.vlgmr.msra.gmra.mrb[0].mxu0 %vm276_vm2, %v714_v7 }
   0xb   :  { %680 = vmatprep.mubr.msk.bf16.mxu0 %vm276_vm2, %v717_v9 }
   0xf   :  { %661 = vmatmul.mubr.msk.bf16.gmra.mrb[4].mxu1 %vm98_vm1, %v716_v10 }
  0x10   :  { %664 = vmatprep.mubr.msk.bf16.mxu1 %vm98_vm1, %v719_v11 }
  0x12   :  { %681 = vmatmul.mubr.msk.bf16.gmra.mrb[4].mxu0 %vm276_vm2, %v718_v12 }
  0x13   :  { %684 = vmatprep.mubr.msk.bf16.mxu0 %vm276_vm2, %v721_v13 }
  0x17   :  { %665 = vmatmul.mubr.msk.bf16.gmra.mrb[8].mxu1 %vm98_vm1, %v720_v14 }
  0x18   :  { %668 = vmatprep.mubr.msk.bf16.mxu1 %vm98_vm1, %v723_v15 }
  0x1a   :  { %685 = vmatmul.mubr.msk.bf16.gmra.mrb[8].mxu0 %vm276_vm2, %v722_v16 }
  0x1b   :  { %688 = vmatprep.mubr.msk.bf16.mxu0 %vm276_vm2, %v725_v17 }
  0x1f   :  { %669 = vmatmul.mubr.msk.bf16.gmra.mrb[12].mxu1 %vm98_vm1, %v724_v18 }
  0x22   :  { %689 = vmatmul.mubr.msk.bf16.gmra.mrb[12].mxu0 %vm276_vm2, %v726_v19 }
  0xda   :  { %v658_v20 = vpop.f32.mrb[0].mxu1 }
  0xdb   :  { %v161_v21 = vpop.f32.mrb[1].mxu1 }
  0xdc   :  { %v659_v22 = vpop.f32.mrb[2].mxu1 }
  0xdd   :  { %v164_v23 = vpop.f32.mrb[3].mxu1  ;;  %v678_v24 = vpop.f32.mrb[0].mxu0 }
  0xde   :  { %v344_v26 = vadd.f32 %v678_v24, %v658_v20  ;;  %v335_v27 = vpop.f32.mrb[1].mxu0 }
  0xdf   :  { %v336_v28 = vadd.f32 %v335_v27, %v161_v21  ;;  %v679_v29 = vpop.f32.mrb[2].mxu0 }
  0xe0   :  { %v407_v30 = vadd.f32 %v865_v25, %v344_v26  ;;  %v347_v31 = vadd.f32 %v679_v29, %v659_v22  ;;  %v338_v32 = vpop.f32.mrb[3].mxu0 }
  0xe1   :  { %v405_v33 = vadd.f32 %v865_v25, %v336_v28  ;;  %v339_v34 = vadd.f32 %v338_v32, %v164_v23 }
  0xe2   :  { %v662_v35 = vpop.f32.mrb[4].mxu1  ;;  %727 = vtanh.f32 %v407_v30  ;;  %v408_v36 = vadd.f32 %v865_v25, %v347_v31 }
  0xe3   :  { %v177_v37 = vpop.f32.mrb[5].mxu1  ;;  %729 = vtanh.f32 %v405_v33  ;;  %v406_v38 = vadd.f32 %v865_v25, %v339_v34 }
  0xe4   :  { %v663_v39 = vpop.f32.mrb[6].mxu1  ;;  %731 = vtanh.f32 %v408_v36 }
  0xe5   :  { %v180_v40 = vpop.f32.mrb[7].mxu1  ;;  %733 = vtanh.f32 %v406_v38  ;;  %v682_v41 = vpop.f32.mrb[4].mxu0 }
  0xe6   :  { %v360_v42 = vadd.f32 %v682_v41, %v662_v35  ;;  %v351_v43 = vpop.f32.mrb[5].mxu0 }
  0xe7   :  { %v352_v44 = vadd.f32 %v351_v43, %v177_v37  ;;  %v683_v45 = vpop.f32.mrb[6].mxu0 }
  0xe8   :  { %v411_v46 = vadd.f32 %v865_v25, %v360_v42  ;;  %v363_v47 = vadd.f32 %v683_v45, %v663_v39  ;;  %v354_v48 = vpop.f32.mrb[7].mxu0 }
  0xe9   :  { %v409_v49 = vadd.f32 %v865_v25, %v352_v44  ;;  %v355_v50 = vadd.f32 %v354_v48, %v180_v40 }
  0xea   :  { %v666_v51 = vpop.f32.mrb[8].mxu1  ;;  %735 = vtanh.f32 %v411_v46  ;;  %v412_v52 = vadd.f32 %v865_v25, %v363_v47 }
  0xeb   :  { %v193_v53 = vpop.f32.mrb[9].mxu1  ;;  %737 = vtanh.f32 %v409_v49  ;;  %v410_v54 = vadd.f32 %v865_v25, %v355_v50 }
  0xec   :  { %v667_v55 = vpop.f32.mrb[10].mxu1  ;;  %v728_v56 = vpop.eup %727  ;;  %739 = vtanh.f32 %v412_v52 }
  0xed   :  { %v196_v57 = vpop.f32.mrb[11].mxu1  ;;  %v730_v58 = vpop.eup %729  ;;  %741 = vtanh.f32 %v410_v54 }
  0xee   :  { %v686_v59 = vpop.f32.mrb[8].mxu0  ;;  %v732_v60 = vpop.eup %731 }
  0xef   :  { %v376_v61 = vadd.f32 %v686_v59, %v666_v51  ;;  %v367_v62 = vpop.f32.mrb[9].mxu0  ;;  %v734_v63 = vpop.eup %733  ;;  %v596_v0 = vpack.c.bf16 %v732_v60, %v728_v56 }
  0xf0   :  { %v368_v1 = vadd.f32 %v367_v62, %v193_v53  ;;  %v687_v2 = vpop.f32.mrb[10].mxu0  ;;  %v591_v3 = vpack.c.bf16 %v734_v63, %v730_v58 }
  0xf1   :  { %v415_v4 = vadd.f32 %v865_v25, %v376_v61  ;;  %v379_v5 = vadd.f32 %v687_v2, %v667_v55  ;;  %v370_v6 = vpop.f32.mrb[11].mxu0  ;;  %628 = vst [vmem:[%s912_s5 + $0x8] sm:$0xff] %v596_v0  }
  0xf2   :  { %v413_v7 = vadd.f32 %v865_v25, %v368_v1  ;;  %v371_v8 = vadd.f32 %v370_v6, %v196_v57  ;;  %v670_v9 = vpop.f32.mrb[12].mxu1  ;;  %592 = vst [vmem:[%s912_s5] sm:$0xff] %v591_v3  }
  0xf3   :  { %743 = vtanh.f32 %v415_v4  ;;  %v416_v10 = vadd.f32 %v865_v25, %v379_v5  ;;  %v209_v11 = vpop.f32.mrb[13].mxu1 }
  0xf4   :  { %745 = vtanh.f32 %v413_v7  ;;  %v414_v12 = vadd.f32 %v865_v25, %v371_v8  ;;  %v671_v13 = vpop.f32.mrb[14].mxu1  ;;  %v736_v14 = vpop.eup %735 }
  0xf5   :  { %747 = vtanh.f32 %v416_v10  ;;  %v212_v15 = vpop.f32.mrb[15].mxu1  ;;  %v738_v16 = vpop.eup %737 }
  0xf6   :  { %749 = vtanh.f32 %v414_v12  ;;  %v690_v17 = vpop.f32.mrb[12].mxu0  ;;  %v740_v18 = vpop.eup %739 }
  0xf7   :  { %v392_v19 = vadd.f32 %v690_v17, %v670_v9  ;;  %v383_v20 = vpop.f32.mrb[13].mxu0  ;;  %v742_v21 = vpop.eup %741  ;;  %v606_v22 = vpack.c.bf16 %v740_v18, %v736_v14 }
  0xf8   :  { %v384_v23 = vadd.f32 %v383_v20, %v209_v11  ;;  %v691_v24 = vpop.f32.mrb[14].mxu0  ;;  %v601_v26 = vpack.c.bf16 %v742_v21, %v738_v16 }
  0xf9   :  { %v419_v27 = vadd.f32 %v865_v25, %v392_v19  ;;  %v395_v28 = vadd.f32 %v691_v24, %v671_v13  ;;  %v386_v29 = vpop.f32.mrb[15].mxu0  ;;  %630 = vst [vmem:[%s912_s5 + $0x18] sm:$0xff] %v606_v22  }
  0xfa   :  { %v417_v30 = vadd.f32 %v865_v25, %v384_v23  ;;  %v387_v31 = vadd.f32 %v386_v29, %v212_v15  ;;  %629 = vst [vmem:[%s912_s5 + $0x10] sm:$0xff] %v601_v26  }
  0xfb   :  { %751 = vtanh.f32 %v419_v27  ;;  %v420_v32 = vadd.f32 %v865_v25, %v395_v28 }
  0xfc   :  { %753 = vtanh.f32 %v417_v30  ;;  %v418_v33 = vadd.f32 %v865_v25, %v387_v31 }
  0xfd   :  { %v744_v34 = vpop.eup %743  ;;  %755 = vtanh.f32 %v420_v32 }
  0xfe   :  { %v746_v35 = vpop.eup %745  ;;  %757 = vtanh.f32 %v418_v33 }
  0xff   :  { %v748_v36 = vpop.eup %747 }
 0x100   :  { %v750_v37 = vpop.eup %749  ;;  %v616_v38 = vpack.c.bf16 %v748_v36, %v744_v34 }
 0x101   :  { %v611_v39 = vpack.c.bf16 %v750_v37, %v746_v35 }
 0x102   :  { %632 = vst [vmem:[%s912_s5 + $0x28] sm:$0xff] %v616_v38  }
 0x103   :  { %631 = vst [vmem:[%s912_s5 + $0x20] sm:$0xff] %v611_v39  }
 0x105   :  { %v752_v40 = vpop.eup %751 }
 0x106   :  { %v754_v41 = vpop.eup %753 }
 0x107   :  { %v756_v42 = vpop.eup %755 }
 0x108   :  { %v758_v25 = vpop.eup %757  ;;  %v626_v43 = vpack.c.bf16 %v756_v42, %v752_v40 }
 0x109   :  { %v621_v44 = vpack.c.bf16 %v758_v25, %v754_v41 }
 0x10a   :  { %634 = vst [vmem:[%s912_s5 + $0x38] sm:$0xff] %v626_v43  }
 0x10b   :  { %633 = vst [vmem:[%s912_s5 + $0x30] sm:$0xff] %v621_v44  }

// kernel: decoder_forward.8
= control target key start
LH: loop header
LB: loop body
LE: loop exit
PB: predicated region body
PF: predicated region fallthrough
CT: control target
= control target key end

     0   :  { %vm411_vm0 = vcmask 1041408   ;;  %vm314_vm1 = vcmask 31744   ;;  %vm876_vm2 = vcmask 261120   ;;  %s3091_s2 = inlined_call_operand.vmem [shape: bf16[32,128], index: 2, kind: input, shape index: {}]   ;;  %s3092_s3 = inlined_call_operand.vmem [shape: bf16[4,128], index: 3, kind: input, shape index: {}]   ;;  %s3093_s1 = inlined_call_operand.vmem [shape: bf16[512,4], index: 1, kind: input, shape index: {}]   ;;  %s3094_s0 = inlined_call_operand.vmem [shape: bf16[512,32], index: 0, kind: input, shape index: {}]   ;;  %s3095_s4 = inlined_call_operand.vmem [shape: f32[1,128], index: 4, kind: input, shape index: {}]   ;;  %s3096_s5 = inlined_call_operand.vmem [shape: bf16[512,128], index: 5, kind: output, shape index: {}]  }
   0x1   :  { %v2437_v0 = vld [vmem:[%s3091_s2] sm:$0xff]   ;;  %v2439_v4 = vld [vmem:[%s3091_s2 + $0x8] sm:$0xff]   ;;  %v2443_v8 = vld [vmem:[%s3093_s1 + $0x10] sm:$0xff]  }
   0x2   :  { %v153_v1 = vld [vmem:[%s3092_s3] sm:$0x3]  ;;  %2304 = vmatprep.subr.bf16.mxu0 %v2437_v0  ;;  %v2440_v5 = vld [vmem:[%s3093_s1 + $0x8] sm:$0xff]   ;;  %v2445_v9 = vld [vmem:[%s3094_s0 + $0x10] sm:$0xff]  }
   0x3   :  { %2436 = vmatprep.subr.msk.bf16.mxu1 %vm411_vm0, %v153_v1  ;;  %v413_v2 = vsel %vm411_vm0, %v153_v1, 0  ;;  %v2438_v3 = vld [vmem:[%s3093_s1] sm:$0xff]   ;;  %2305 = vmatpush3.bf16.msra.mxu0 %v2437_v0  ;;  %v2442_v7 = vld [vmem:[%s3094_s0 + $0x8] sm:$0xff]   ;;  %v2444_v10 = vld [vmem:[%s3093_s1 + $0x18] sm:$0xff]  }
   0x4   :  { %2239 = vmatpush3.bf16.msra.mxu1 %v413_v2  ;;  %2240 = vmatprep.mubr.msk.bf16.mxu1 %vm314_vm1, %v2438_v3  ;;  %v2441_v6 = vld [vmem:[%s3094_s0] sm:$0xff]   ;;  %v2446_v12 = vld [vmem:[%s3094_s0 + $0x18] sm:$0xff]   ;;  %v2448_v14 = vld [vmem:[%s3093_s1 + $0x28] sm:$0xff]  }
   0x5   :  { %2306 = vmatprep.subr.bf16.mxu0 %v2439_v4  ;;  %2308 = vmatprep.mubr.msk.bf16.mxu0 %vm876_vm2, %v2441_v6  ;;  %v2447_v11 = vld [vmem:[%s3093_s1 + $0x20] sm:$0xff]   ;;  %v2451_v15 = vld [vmem:[%s3093_s1 + $0x30] sm:$0xff]   ;;  %v2450_v16 = vld [vmem:[%s3094_s0 + $0x28] sm:$0xff]  }
   0x6   :  { %v2449_v13 = vld [vmem:[%s3094_s0 + $0x20] sm:$0xff]   ;;  %v2453_v17 = vld [vmem:[%s3094_s0 + $0x30] sm:$0xff]   ;;  %v2452_v18 = vld [vmem:[%s3093_s1 + $0x38] sm:$0xff]  }
   0x7   :  { %2241 = vmatmul.mubr.msk.bf16.vlgmr.msra.gmra.mrb[0].mxu1 %vm314_vm1, %v2440_v5  ;;  %2307 = vmatpush3.bf16.msra.mxu0 %v2439_v4  ;;  %v2455_v19 = vld [vmem:[%s3093_s1 + $0x40] sm:$0xff]   ;;  %v2454_v20 = vld [vmem:[%s3094_s0 + $0x38] sm:$0xff]   ;;  %v2456_v22 = vld [vmem:[%s3093_s1 + $0x48] sm:$0xff]  }
   0x8   :  { %2244 = vmatprep.mubr.msk.bf16.mxu1 %vm314_vm1, %v2443_v8  ;;  %v2457_v21 = vld [vmem:[%s3094_s0 + $0x40] sm:$0xff]   ;;  %v2459_v23 = vld [vmem:[%s3093_s1 + $0x50] sm:$0xff]   ;;  %v2458_v24 = vld [vmem:[%s3094_s0 + $0x48] sm:$0xff]  }
   0x9   :  { %v2461_v25 = vld [vmem:[%s3094_s0 + $0x50] sm:$0xff]   ;;  %v2460_v26 = vld [vmem:[%s3093_s1 + $0x58] sm:$0xff]   ;;  %v2463_v27 = vld [vmem:[%s3093_s1 + $0x60] sm:$0xff]  }
   0xa   :  { %2309 = vmatmul.mubr.msk.bf16.vlgmr.msra.gmra.mrb[0].mxu0 %vm876_vm2, %v2442_v7  ;;  %v2462_v28 = vld [vmem:[%s3094_s0 + $0x58] sm:$0xff]   ;;  %v2465_v29 = vld [vmem:[%s3094_s0 + $0x60] sm:$0xff]   ;;  %v2464_v30 = vld [vmem:[%s3093_s1 + $0x68] sm:$0xff]  }
   0xb   :  { %2312 = vmatprep.mubr.msk.bf16.mxu0 %vm876_vm2, %v2445_v9  ;;  %v2467_v31 = vld [vmem:[%s3093_s1 + $0x70] sm:$0xff]   ;;  %v2466_v32 = vld [vmem:[%s3094_s0 + $0x68] sm:$0xff]   ;;  %v2468_v34 = vld [vmem:[%s3093_s1 + $0x78] sm:$0xff]  }
   0xc   :  { %v2469_v33 = vld [vmem:[%s3094_s0 + $0x70] sm:$0xff]   ;;  %v2471_v35 = vld [vmem:[%s3093_s1 + $0x80] sm:$0xff]   ;;  %v2470_v36 = vld [vmem:[%s3094_s0 + $0x78] sm:$0xff]  }
   0xd   :  { %v2473_v37 = vld [vmem:[%s3094_s0 + $0x80] sm:$0xff]   ;;  %v2472_v38 = vld [vmem:[%s3093_s1 + $0x88] sm:$0xff]   ;;  %v2475_v39 = vld [vmem:[%s3093_s1 + $0x90] sm:$0xff]  }
   0xe   :  { %v2474_v40 = vld [vmem:[%s3094_s0 + $0x88] sm:$0xff]   ;;  %v2477_v41 = vld [vmem:[%s3094_s0 + $0x90] sm:$0xff]   ;;  %v2476_v42 = vld [vmem:[%s3093_s1 + $0x98] sm:$0xff]  }
   0xf   :  { %2245 = vmatmul.mubr.msk.bf16.gmra.mrb[4].mxu1 %vm314_vm1, %v2444_v10  ;;  %v2479_v43 = vld [vmem:[%s3093_s1 + $0xa0] sm:$0xff]   ;;  %v2478_v44 = vld [vmem:[%s3094_s0 + $0x98] sm:$0xff]   ;;  %v2480_v46 = vld [vmem:[%s3093_s1 + $0xa8] sm:$0xff]  }
  0x10   :  { %2248 = vmatprep.mubr.msk.bf16.mxu1 %vm314_vm1, %v2447_v11  ;;  %v2481_v45 = vld [vmem:[%s3094_s0 + $0xa0] sm:$0xff]   ;;  %v2483_v47 = vld [vmem:[%s3093_s1 + $0xb0] sm:$0xff]   ;;  %v2482_v48 = vld [vmem:[%s3094_s0 + $0xa8] sm:$0xff]  }
  0x11   :  { %v2485_v49 = vld [vmem:[%s3094_s0 + $0xb0] sm:$0xff]   ;;  %v2484_v50 = vld [vmem:[%s3093_s1 + $0xb8] sm:$0xff]   ;;  %v2487_v51 = vld [vmem:[%s3093_s1 + $0xc0] sm:$0xff]  }
  0x12   :  { %2313 = vmatmul.mubr.msk.bf16.gmra.mrb[4].mxu0 %vm876_vm2, %v2446_v12  ;;  %v2486_v52 = vld [vmem:[%s3094_s0 + $0xb8] sm:$0xff]   ;;  %v2489_v53 = vld [vmem:[%s3094_s0 + $0xc0] sm:$0xff]   ;;  %v2488_v54 = vld [vmem:[%s3093_s1 + $0xc8] sm:$0xff]  }
  0x13   :  { %2316 = vmatprep.mubr.msk.bf16.mxu0 %vm876_vm2, %v2449_v13  ;;  %v2491_v55 = vld [vmem:[%s3093_s1 + $0xd0] sm:$0xff]   ;;  %v2490_v56 = vld [vmem:[%s3094_s0 + $0xc8] sm:$0xff]   ;;  %v2492_v58 = vld [vmem:[%s3093_s1 + $0xd8] sm:$0xff]  }
  0x14   :  { %v2493_v57 = vld [vmem:[%s3094_s0 + $0xd0] sm:$0xff]   ;;  %v2495_v59 = vld [vmem:[%s3093_s1 + $0xe0] sm:$0xff]   ;;  %v2494_v60 = vld [vmem:[%s3094_s0 + $0xd8] sm:$0xff]  }
  0x15   :  { %v2497_v61 = vld [vmem:[%s3094_s0 + $0xe0] sm:$0xff]   ;;  %v2496_v62 = vld [vmem:[%s3093_s1 + $0xe8] sm:$0xff]   ;;  %v2499_v63 = vld [vmem:[%s3093_s1 + $0xf0] sm:$0xff]  }
  0x16   :  { %v2498_v0 = vld [vmem:[%s3094_s0 + $0xe8] sm:$0xff]   ;;  %v2501_v1 = vld [vmem:[%s3094_s0 + $0xf0] sm:$0xff]   ;;  %v2500_v2 = vld [vmem:[%s3093_s1 + $0xf8] sm:$0xff]  }
  0x17   :  { %2249 = vmatmul.mubr.msk.bf16.gmra.mrb[8].mxu1 %vm314_vm1, %v2448_v14  ;;  %v2502_v3 = vld [vmem:[%s3094_s0 + $0xf8] sm:$0xff]   ;;  %v2929_v9 = vld [vmem:[%s3095_s4] ss:$0 sm:$0xff] }
  0x18   :  { %2252 = vmatprep.mubr.msk.bf16.mxu1 %vm314_vm1, %v2451_v15 }
  0x1a   :  { %2317 = vmatmul.mubr.msk.bf16.gmra.mrb[8].mxu0 %vm876_vm2, %v2450_v16 }
  0x1b   :  { %2320 = vmatprep.mubr.msk.bf16.mxu0 %vm876_vm2, %v2453_v17 }
  0x1f   :  { %2253 = vmatmul.mubr.msk.bf16.gmra.mrb[12].mxu1 %vm314_vm1, %v2452_v18 }
  0x20   :  { %2256 = vmatprep.mubr.msk.bf16.mxu1 %vm314_vm1, %v2455_v19 }
  0x22   :  { %2321 = vmatmul.mubr.msk.bf16.gmra.mrb[12].mxu0 %vm876_vm2, %v2454_v20 }
  0x23   :  { %2324 = vmatprep.mubr.msk.bf16.mxu0 %vm876_vm2, %v2457_v21 }
  0x27   :  { %2257 = vmatmul.mubr.msk.bf16.gmra.mrb[16].mxu1 %vm314_vm1, %v2456_v22 }
  0x28   :  { %2260 = vmatprep.mubr.msk.bf16.mxu1 %vm314_vm1, %v2459_v23 }
  0x2a   :  { %2325 = vmatmul.mubr.msk.bf16.gmra.mrb[16].mxu0 %vm876_vm2, %v2458_v24 }
  0x2b   :  { %2328 = vmatprep.mubr.msk.bf16.mxu0 %vm876_vm2, %v2461_v25 }
  0x2f   :  { %2261 = vmatmul.mubr.msk.bf16.gmra.mrb[20].mxu1 %vm314_vm1, %v2460_v26 }
  0x30   :  { %2264 = vmatprep.mubr.msk.bf16.mxu1 %vm314_vm1, %v2463_v27 }
  0x32   :  { %2329 = vmatmul.mubr.msk.bf16.gmra.mrb[20].mxu0 %vm876_vm2, %v2462_v28 }
  0x33   :  { %2332 = vmatprep.mubr.msk.bf16.mxu0 %vm876_vm2, %v2465_v29 }
  0x37   :  { %2265 = vmatmul.mubr.msk.bf16.gmra.mrb[24].mxu1 %vm314_vm1, %v2464_v30 }
  0x38   :  { %2268 = vmatprep.mubr.msk.bf16.mxu1 %vm314_vm1, %v2467_v31 }
  0x3a   :  { %2333 = vmatmul.mubr.msk.bf16.gmra.mrb[24].mxu0 %vm876_vm2, %v2466_v32 }
  0x3b   :  { %2336 = vmatprep.mubr.msk.bf16.mxu0 %vm876_vm2, %v2469_v33 }
  0x3f   :  { %2269 = vmatmul.mubr.msk.bf16.gmra.mrb[28].mxu1 %vm314_vm1, %v2468_v34 }
  0x40   :  { %2272 = vmatprep.mubr.msk.bf16.mxu1 %vm314_vm1, %v2471_v35 }
  0x42   :  { %2337 = vmatmul.mubr.msk.bf16.gmra.mrb[28].mxu0 %vm876_vm2, %v2470_v36 }
  0x43   :  { %2340 = vmatprep.mubr.msk.bf16.mxu0 %vm876_vm2, %v2473_v37 }
  0x47   :  { %2273 = vmatmul.mubr.msk.bf16.gmra.mrb[32].mxu1 %vm314_vm1, %v2472_v38 }
  0x48   :  { %2276 = vmatprep.mubr.msk.bf16.mxu1 %vm314_vm1, %v2475_v39 }
  0x4a   :  { %2341 = vmatmul.mubr.msk.bf16.gmra.mrb[32].mxu0 %vm876_vm2, %v2474_v40 }
  0x4b   :  { %2344 = vmatprep.mubr.msk.bf16.mxu0 %vm876_vm2, %v2477_v41 }
  0x4f   :  { %2277 = vmatmul.mubr.msk.bf16.gmra.mrb[36].mxu1 %vm314_vm1, %v2476_v42 }
  0x50   :  { %2280 = vmatprep.mubr.msk.bf16.mxu1 %vm314_vm1, %v2479_v43 }
  0x52   :  { %2345 = vmatmul.mubr.msk.bf16.gmra.mrb[36].mxu0 %vm876_vm2, %v2478_v44 }
  0x53   :  { %2348 = vmatprep.mubr.msk.bf16.mxu0 %vm876_vm2, %v2481_v45 }
  0x57   :  { %2281 = vmatmul.mubr.msk.bf16.gmra.mrb[40].mxu1 %vm314_vm1, %v2480_v46 }
  0x58   :  { %2284 = vmatprep.mubr.msk.bf16.mxu1 %vm314_vm1, %v2483_v47 }
  0x5a   :  { %2349 = vmatmul.mubr.msk.bf16.gmra.mrb[40].mxu0 %vm876_vm2, %v2482_v48 }
  0x5b   :  { %2352 = vmatprep.mubr.msk.bf16.mxu0 %vm876_vm2, %v2485_v49 }
  0x5f   :  { %2285 = vmatmul.mubr.msk.bf16.gmra.mrb[44].mxu1 %vm314_vm1, %v2484_v50 }
  0x60   :  { %2288 = vmatprep.mubr.msk.bf16.mxu1 %vm314_vm1, %v2487_v51 }
  0x62   :  { %2353 = vmatmul.mubr.msk.bf16.gmra.mrb[44].mxu0 %vm876_vm2, %v2486_v52 }
  0x63   :  { %2356 = vmatprep.mubr.msk.bf16.mxu0 %vm876_vm2, %v2489_v53 }
  0x67   :  { %2289 = vmatmul.mubr.msk.bf16.gmra.mrb[48].mxu1 %vm314_vm1, %v2488_v54 }
  0x68   :  { %2292 = vmatprep.mubr.msk.bf16.mxu1 %vm314_vm1, %v2491_v55 }
  0x6a   :  { %2357 = vmatmul.mubr.msk.bf16.gmra.mrb[48].mxu0 %vm876_vm2, %v2490_v56 }
  0x6b   :  { %2360 = vmatprep.mubr.msk.bf16.mxu0 %vm876_vm2, %v2493_v57 }
  0x6f   :  { %2293 = vmatmul.mubr.msk.bf16.gmra.mrb[52].mxu1 %vm314_vm1, %v2492_v58 }
  0x70   :  { %2296 = vmatprep.mubr.msk.bf16.mxu1 %vm314_vm1, %v2495_v59 }
  0x72   :  { %2361 = vmatmul.mubr.msk.bf16.gmra.mrb[52].mxu0 %vm876_vm2, %v2494_v60 }
  0x73   :  { %2364 = vmatprep.mubr.msk.bf16.mxu0 %vm876_vm2, %v2497_v61 }
  0x77   :  { %2297 = vmatmul.mubr.msk.bf16.gmra.mrb[56].mxu1 %vm314_vm1, %v2496_v62 }
  0x78   :  { %2300 = vmatprep.mubr.msk.bf16.mxu1 %vm314_vm1, %v2499_v63 }
  0x7a   :  { %2365 = vmatmul.mubr.msk.bf16.gmra.mrb[56].mxu0 %vm876_vm2, %v2498_v0 }
  0x7b   :  { %2368 = vmatprep.mubr.msk.bf16.mxu0 %vm876_vm2, %v2501_v1 }
  0x7f   :  { %2301 = vmatmul.mubr.msk.bf16.gmra.mrb[60].mxu1 %vm314_vm1, %v2500_v2 }
  0x82   :  { %2369 = vmatmul.mubr.msk.bf16.gmra.mrb[60].mxu0 %vm876_vm2, %v2502_v3 }
  0xda   :  { %v2242_v4 = vpop.f32.mrb[0].mxu1 }
  0xdb   :  { %v449_v5 = vpop.f32.mrb[1].mxu1 }
  0xdc   :  { %v2243_v6 = vpop.f32.mrb[2].mxu1 }
  0xdd   :  { %v452_v7 = vpop.f32.mrb[3].mxu1  ;;  %v2310_v8 = vpop.f32.mrb[0].mxu0 }
  0xde   :  { %v1016_v10 = vadd.f32 %v2310_v8, %v2242_v4  ;;  %v1007_v11 = vpop.f32.mrb[1].mxu0 }
  0xdf   :  { %v1008_v12 = vadd.f32 %v1007_v11, %v449_v5  ;;  %v2311_v13 = vpop.f32.mrb[2].mxu0 }
  0xe0   :  { %v1271_v14 = vadd.f32 %v2929_v9, %v1016_v10  ;;  %v1019_v15 = vadd.f32 %v2311_v13, %v2243_v6  ;;  %v1010_v16 = vpop.f32.mrb[3].mxu0 }
  0xe1   :  { %v1269_v17 = vadd.f32 %v2929_v9, %v1008_v12  ;;  %v1011_v18 = vadd.f32 %v1010_v16, %v452_v7 }
  0xe2   :  { %v2246_v19 = vpop.f32.mrb[4].mxu1  ;;  %2503 = vtanh.f32 %v1271_v14  ;;  %v1272_v20 = vadd.f32 %v2929_v9, %v1019_v15 }
  0xe3   :  { %v465_v21 = vpop.f32.mrb[5].mxu1  ;;  %2505 = vtanh.f32 %v1269_v17  ;;  %v1270_v22 = vadd.f32 %v2929_v9, %v1011_v18 }
  0xe4   :  { %v2247_v23 = vpop.f32.mrb[6].mxu1  ;;  %2507 = vtanh.f32 %v1272_v20 }
  0xe5   :  { %v468_v24 = vpop.f32.mrb[7].mxu1  ;;  %2509 = vtanh.f32 %v1270_v22  ;;  %v2314_v25 = vpop.f32.mrb[4].mxu0 }
  0xe6   :  { %v1032_v26 = vadd.f32 %v2314_v25, %v2246_v19  ;;  %v1023_v27 = vpop.f32.mrb[5].mxu0 }
  0xe7   :  { %v1024_v28 = vadd.f32 %v1023_v27, %v465_v21  ;;  %v2315_v29 = vpop.f32.mrb[6].mxu0 }
  0xe8   :  { %v1275_v30 = vadd.f32 %v2929_v9, %v1032_v26  ;;  %v1035_v31 = vadd.f32 %v2315_v29, %v2247_v23  ;;  %v1026_v32 = vpop.f32.mrb[7].mxu0 }
  0xe9   :  { %v1273_v33 = vadd.f32 %v2929_v9, %v1024_v28  ;;  %v1027_v34 = vadd.f32 %v1026_v32, %v468_v24 }
  0xea   :  { %v2250_v35 = vpop.f32.mrb[8].mxu1  ;;  %2511 = vtanh.f32 %v1275_v30  ;;  %v1276_v36 = vadd.f32 %v2929_v9, %v1035_v31 }
  0xeb   :  { %v481_v37 = vpop.f32.mrb[9].mxu1  ;;  %2513 = vtanh.f32 %v1273_v33  ;;  %v1274_v38 = vadd.f32 %v2929_v9, %v1027_v34 }
  0xec   :  { %v2251_v39 = vpop.f32.mrb[10].mxu1  ;;  %v2504_v40 = vpop.eup %2503  ;;  %2515 = vtanh.f32 %v1276_v36 }
  0xed   :  { %v484_v41 = vpop.f32.mrb[11].mxu1  ;;  %v2506_v42 = vpop.eup %2505  ;;  %2517 = vtanh.f32 %v1274_v38 }
  0xee   :  { %v2318_v43 = vpop.f32.mrb[8].mxu0  ;;  %v2508_v44 = vpop.eup %2507 }
  0xef   :  { %v1048_v45 = vadd.f32 %v2318_v43, %v2250_v35  ;;  %v1039_v46 = vpop.f32.mrb[9].mxu0  ;;  %v2510_v47 = vpop.eup %2509  ;;  %v1988_v48 = vpack.c.bf16 %v2508_v44, %v2504_v40 }
  0xf0   :  { %v1040_v49 = vadd.f32 %v1039_v46, %v481_v37  ;;  %v2319_v50 = vpop.f32.mrb[10].mxu0  ;;  %v1983_v51 = vpack.c.bf16 %v2510_v47, %v2506_v42 }
  0xf1   :  { %v1279_v52 = vadd.f32 %v2929_v9, %v1048_v45  ;;  %v1051_v53 = vadd.f32 %v2319_v50, %v2251_v39  ;;  %v1042_v54 = vpop.f32.mrb[11].mxu0  ;;  %2140 = vst [vmem:[%s3096_s5 + $0x8] sm:$0xff] %v1988_v48  }
  0xf2   :  { %v1277_v55 = vadd.f32 %v2929_v9, %v1040_v49  ;;  %v1043_v56 = vadd.f32 %v1042_v54, %v484_v41  ;;  %v2254_v57 = vpop.f32.mrb[12].mxu1  ;;  %1984 = vst [vmem:[%s3096_s5] sm:$0xff] %v1983_v51  }
  0xf3   :  { %2519 = vtanh.f32 %v1279_v52  ;;  %v1280_v58 = vadd.f32 %v2929_v9, %v1051_v53  ;;  %v497_v59 = vpop.f32.mrb[13].mxu1 }
  0xf4   :  { %2521 = vtanh.f32 %v1277_v55  ;;  %v1278_v60 = vadd.f32 %v2929_v9, %v1043_v56  ;;  %v2255_v61 = vpop.f32.mrb[14].mxu1  ;;  %v2512_v62 = vpop.eup %2511 }
  0xf5   :  { %2523 = vtanh.f32 %v1280_v58  ;;  %v500_v63 = vpop.f32.mrb[15].mxu1  ;;  %v2514_v0 = vpop.eup %2513 }
  0xf6   :  { %2525 = vtanh.f32 %v1278_v60  ;;  %v2322_v1 = vpop.f32.mrb[12].mxu0  ;;  %v2516_v2 = vpop.eup %2515 }
  0xf7   :  { %v1064_v3 = vadd.f32 %v2322_v1, %v2254_v57  ;;  %v1055_v4 = vpop.f32.mrb[13].mxu0  ;;  %v2518_v5 = vpop.eup %2517  ;;  %v1998_v6 = vpack.c.bf16 %v2516_v2, %v2512_v62 }
  0xf8   :  { %v1056_v7 = vadd.f32 %v1055_v4, %v497_v59  ;;  %v2323_v8 = vpop.f32.mrb[14].mxu0  ;;  %v1993_v10 = vpack.c.bf16 %v2518_v5, %v2514_v0 }
  0xf9   :  { %v1283_v11 = vadd.f32 %v2929_v9, %v1064_v3  ;;  %v1067_v12 = vadd.f32 %v2323_v8, %v2255_v61  ;;  %v1058_v13 = vpop.f32.mrb[15].mxu0  ;;  %2142 = vst [vmem:[%s3096_s5 + $0x18] sm:$0xff] %v1998_v6  }
  0xfa   :  { %v1281_v14 = vadd.f32 %v2929_v9, %v1056_v7  ;;  %v1059_v15 = vadd.f32 %v1058_v13, %v500_v63  ;;  %v2258_v16 = vpop.f32.mrb[16].mxu1  ;;  %2141 = vst [vmem:[%s3096_s5 + $0x10] sm:$0xff] %v1993_v10  }
  0xfb   :  { %2527 = vtanh.f32 %v1283_v11  ;;  %v1284_v17 = vadd.f32 %v2929_v9, %v1067_v12  ;;  %v513_v18 = vpop.f32.mrb[17].mxu1 }
  0xfc   :  { %2529 = vtanh.f32 %v1281_v14  ;;  %v1282_v19 = vadd.f32 %v2929_v9, %v1059_v15  ;;  %v2259_v20 = vpop.f32.mrb[18].mxu1 }
  0xfd   :  { %v2520_v21 = vpop.eup %2519  ;;  %2531 = vtanh.f32 %v1284_v17  ;;  %v516_v22 = vpop.f32.mrb[19].mxu1 }
  0xfe   :  { %v2522_v23 = vpop.eup %2521  ;;  %2533 = vtanh.f32 %v1282_v19  ;;  %v2326_v24 = vpop.f32.mrb[16].mxu0 }
  0xff   :  { %v2524_v25 = vpop.eup %2523  ;;  %v1080_v26 = vadd.f32 %v2326_v24, %v2258_v16  ;;  %v1071_v27 = vpop.f32.mrb[17].mxu0 }
 0x100   :  { %v2526_v28 = vpop.eup %2525  ;;  %v2008_v29 = vpack.c.bf16 %v2524_v25, %v2520_v21  ;;  %v1072_v30 = vadd.f32 %v1071_v27, %v513_v18  ;;  %v2327_v31 = vpop.f32.mrb[18].mxu0 }
 0x101   :  { %v2003_v32 = vpack.c.bf16 %v2526_v28, %v2522_v23  ;;  %v1287_v33 = vadd.f32 %v2929_v9, %v1080_v26  ;;  %v1083_v34 = vadd.f32 %v2327_v31, %v2259_v20  ;;  %v1074_v35 = vpop.f32.mrb[19].mxu0 }
 0x102   :  { %2144 = vst [vmem:[%s3096_s5 + $0x28] sm:$0xff] %v2008_v29   ;;  %v1285_v36 = vadd.f32 %v2929_v9, %v1072_v30  ;;  %v1075_v37 = vadd.f32 %v1074_v35, %v516_v22  ;;  %v2262_v38 = vpop.f32.mrb[20].mxu1 }
 0x103   :  { %2143 = vst [vmem:[%s3096_s5 + $0x20] sm:$0xff] %v2003_v32   ;;  %2535 = vtanh.f32 %v1287_v33  ;;  %v1288_v39 = vadd.f32 %v2929_v9, %v1083_v34  ;;  %v529_v40 = vpop.f32.mrb[21].mxu1 }
 0x104   :  { %2537 = vtanh.f32 %v1285_v36  ;;  %v1286_v41 = vadd.f32 %v2929_v9, %v1075_v37  ;;  %v2263_v42 = vpop.f32.mrb[22].mxu1 }
 0x105   :  { %v2528_v43 = vpop.eup %2527  ;;  %2539 = vtanh.f32 %v1288_v39  ;;  %v532_v44 = vpop.f32.mrb[23].mxu1 }
 0x106   :  { %v2530_v45 = vpop.eup %2529  ;;  %2541 = vtanh.f32 %v1286_v41  ;;  %v2330_v46 = vpop.f32.mrb[20].mxu0 }
 0x107   :  { %v2532_v47 = vpop.eup %2531  ;;  %v1096_v48 = vadd.f32 %v2330_v46, %v2262_v38  ;;  %v1087_v49 = vpop.f32.mrb[21].mxu0 }
 0x108   :  { %v2534_v50 = vpop.eup %2533  ;;  %v2018_v51 = vpack.c.bf16 %v2532_v47, %v2528_v43  ;;  %v1088_v52 = vadd.f32 %v1087_v49, %v529_v40  ;;  %v2331_v53 = vpop.f32.mrb[22].mxu0 }
 0x109   :  { %v2013_v54 = vpack.c.bf16 %v2534_v50, %v2530_v45  ;;  %v1291_v55 = vadd.f32 %v2929_v9, %v1096_v48  ;;  %v1099_v56 = vadd.f32 %v2331_v53, %v2263_v42  ;;  %v1090_v57 = vpop.f32.mrb[23].mxu0 }
 0x10a   :  { %2146 = vst [vmem:[%s3096_s5 + $0x38] sm:$0xff] %v2018_v51   ;;  %v1289_v58 = vadd.f32 %v2929_v9, %v1088_v52  ;;  %v1091_v59 = vadd.f32 %v1090_v57, %v532_v44  ;;  %v2266_v60 = vpop.f32.mrb[24].mxu1 }
 0x10b   :  { %2145 = vst [vmem:[%s3096_s5 + $0x30] sm:$0xff] %v2013_v54   ;;  %2543 = vtanh.f32 %v1291_v55  ;;  %v1292_v61 = vadd.f32 %v2929_v9, %v1099_v56  ;;  %v545_v62 = vpop.f32.mrb[25].mxu1 }
 0x10c   :  { %2545 = vtanh.f32 %v1289_v58  ;;  %v1290_v63 = vadd.f32 %v2929_v9, %v1091_v59  ;;  %v2267_v0 = vpop.f32.mrb[26].mxu1 }
 0x10d   :  { %v2536_v1 = vpop.eup %2535  ;;  %2547 = vtanh.f32 %v1292_v61  ;;  %v548_v2 = vpop.f32.mrb[27].mxu1 }
 0x10e   :  { %v2538_v3 = vpop.eup %2537  ;;  %2549 = vtanh.f32 %v1290_v63  ;;  %v2334_v4 = vpop.f32.mrb[24].mxu0 }
 0x10f   :  { %v2540_v5 = vpop.eup %2539  ;;  %v1112_v6 = vadd.f32 %v2334_v4, %v2266_v60  ;;  %v1103_v7 = vpop.f32.mrb[25].mxu0 }
 0x110   :  { %v2542_v8 = vpop.eup %2541  ;;  %v2028_v10 = vpack.c.bf16 %v2540_v5, %v2536_v1  ;;  %v1104_v11 = vadd.f32 %v1103_v7, %v545_v62  ;;  %v2335_v12 = vpop.f32.mrb[26].mxu0 }
 0x111   :  { %v2023_v13 = vpack.c.bf16 %v2542_v8, %v2538_v3  ;;  %v1295_v14 = vadd.f32 %v2929_v9, %v1112_v6  ;;  %v1115_v15 = vadd.f32 %v2335_v12, %v2267_v0  ;;  %v1106_v16 = vpop.f32.mrb[27].mxu0 }
 0x112   :  { %2148 = vst [vmem:[%s3096_s5 + $0x48] sm:$0xff] %v2028_v10   ;;  %v1293_v17 = vadd.f32 %v2929_v9, %v1104_v11  ;;  %v1107_v18 = vadd.f32 %v1106_v16, %v548_v2  ;;  %v2270_v19 = vpop.f32.mrb[28].mxu1 }
 0x113   :  { %2147 = vst [vmem:[%s3096_s5 + $0x40] sm:$0xff] %v2023_v13   ;;  %2551 = vtanh.f32 %v1295_v14  ;;  %v1296_v20 = vadd.f32 %v2929_v9, %v1115_v15  ;;  %v561_v21 = vpop.f32.mrb[29].mxu1 }
 0x114   :  { %2553 = vtanh.f32 %v1293_v17  ;;  %v1294_v22 = vadd.f32 %v2929_v9, %v1107_v18  ;;  %v2271_v23 = vpop.f32.mrb[30].mxu1 }
 0x115   :  { %v2544_v24 = vpop.eup %2543  ;;  %2555 = vtanh.f32 %v1296_v20  ;;  %v564_v25 = vpop.f32.mrb[31].mxu1 }
 0x116   :  { %v2546_v26 = vpop.eup %2545  ;;  %2557 = vtanh.f32 %v1294_v22  ;;  %v2338_v27 = vpop.f32.mrb[28].mxu0 }
 0x117   :  { %v2548_v28 = vpop.eup %2547  ;;  %v1128_v29 = vadd.f32 %v2338_v27, %v2270_v19  ;;  %v1119_v30 = vpop.f32.mrb[29].mxu0 }
 0x118   :  { %v2550_v31 = vpop.eup %2549  ;;  %v2038_v32 = vpack.c.bf16 %v2548_v28, %v2544_v24  ;;  %v1120_v33 = vadd.f32 %v1119_v30, %v561_v21  ;;  %v2339_v34 = vpop.f32.mrb[30].mxu0 }
 0x119   :  { %v2033_v35 = vpack.c.bf16 %v2550_v31, %v2546_v26  ;;  %v1299_v36 = vadd.f32 %v2929_v9, %v1128_v29  ;;  %v1131_v37 = vadd.f32 %v2339_v34, %v2271_v23  ;;  %v1122_v38 = vpop.f32.mrb[31].mxu0 }
 0x11a   :  { %2150 = vst [vmem:[%s3096_s5 + $0x58] sm:$0xff] %v2038_v32   ;;  %v1297_v39 = vadd.f32 %v2929_v9, %v1120_v33  ;;  %v1123_v40 = vadd.f32 %v1122_v38, %v564_v25  ;;  %v2274_v41 = vpop.f32.mrb[32].mxu1 }
 0x11b   :  { %2149 = vst [vmem:[%s3096_s5 + $0x50] sm:$0xff] %v2033_v35   ;;  %2559 = vtanh.f32 %v1299_v36  ;;  %v1300_v42 = vadd.f32 %v2929_v9, %v1131_v37  ;;  %v577_v43 = vpop.f32.mrb[33].mxu1 }
 0x11c   :  { %2561 = vtanh.f32 %v1297_v39  ;;  %v1298_v44 = vadd.f32 %v2929_v9, %v1123_v40  ;;  %v2275_v45 = vpop.f32.mrb[34].mxu1 }
 0x11d   :  { %v2552_v46 = vpop.eup %2551  ;;  %2563 = vtanh.f32 %v1300_v42  ;;  %v580_v47 = vpop.f32.mrb[35].mxu1 }
 0x11e   :  { %v2554_v48 = vpop.eup %2553  ;;  %2565 = vtanh.f32 %v1298_v44  ;;  %v2342_v49 = vpop.f32.mrb[32].mxu0 }
 0x11f   :  { %v2556_v50 = vpop.eup %2555  ;;  %v1144_v51 = vadd.f32 %v2342_v49, %v2274_v41  ;;  %v1135_v52 = vpop.f32.mrb[33].mxu0 }
 0x120   :  { %v2558_v53 = vpop.eup %2557  ;;  %v2048_v54 = vpack.c.bf16 %v2556_v50, %v2552_v46  ;;  %v1136_v55 = vadd.f32 %v1135_v52, %v577_v43  ;;  %v2343_v56 = vpop.f32.mrb[34].mxu0 }
 0x121   :  { %v2043_v57 = vpack.c.bf16 %v2558_v53, %v2554_v48  ;;  %v1303_v58 = vadd.f32 %v2929_v9, %v1144_v51  ;;  %v1147_v59 = vadd.f32 %v2343_v56, %v2275_v45  ;;  %v1138_v60 = vpop.f32.mrb[35].mxu0 }
 0x122   :  { %2152 = vst [vmem:[%s3096_s5 + $0x68] sm:$0xff] %v2048_v54   ;;  %v1301_v61 = vadd.f32 %v2929_v9, %v1136_v55  ;;  %v1139_v62 = vadd.f32 %v1138_v60, %v580_v47  ;;  %v2278_v63 = vpop.f32.mrb[36].mxu1 }
 0x123   :  { %2151 = vst [vmem:[%s3096_s5 + $0x60] sm:$0xff] %v2043_v57   ;;  %2567 = vtanh.f32 %v1303_v58  ;;  %v1304_v0 = vadd.f32 %v2929_v9, %v1147_v59  ;;  %v593_v1 = vpop.f32.mrb[37].mxu1 }
 0x124   :  { %2569 = vtanh.f32 %v1301_v61  ;;  %v1302_v2 = vadd.f32 %v2929_v9, %v1139_v62  ;;  %v2279_v3 = vpop.f32.mrb[38].mxu1 }
 0x125   :  { %v2560_v4 = vpop.eup %2559  ;;  %2571 = vtanh.f32 %v1304_v0  ;;  %v596_v5 = vpop.f32.mrb[39].mxu1 }
 0x126   :  { %v2562_v6 = vpop.eup %2561  ;;  %2573 = vtanh.f32 %v1302_v2  ;;  %v2346_v7 = vpop.f32.mrb[36].mxu0 }
 0x127   :  { %v2564_v8 = vpop.eup %2563  ;;  %v1160_v10 = vadd.f32 %v2346_v7, %v2278_v63  ;;  %v1151_v11 = vpop.f32.mrb[37].mxu0 }
 0x128   :  { %v2566_v12 = vpop.eup %2565  ;;  %v2058_v13 = vpack.c.bf16 %v2564_v8, %v2560_v4  ;;  %v1152_v14 = vadd.f32 %v1151_v11, %v593_v1  ;;  %v2347_v15 = vpop.f32.mrb[38].mxu0 }
 0x129   :  { %v2053_v16 = vpack.c.bf16 %v2566_v12, %v2562_v6  ;;  %v1307_v17 = vadd.f32 %v2929_v9, %v1160_v10  ;;  %v1163_v18 = vadd.f32 %v2347_v15, %v2279_v3  ;;  %v1154_v19 = vpop.f32.mrb[39].mxu0 }
 0x12a   :  { %2154 = vst [vmem:[%s3096_s5 + $0x78] sm:$0xff] %v2058_v13   ;;  %v1305_v20 = vadd.f32 %v2929_v9, %v1152_v14  ;;  %v1155_v21 = vadd.f32 %v1154_v19, %v596_v5  ;;  %v2282_v22 = vpop.f32.mrb[40].mxu1 }
 0x12b   :  { %2153 = vst [vmem:[%s3096_s5 + $0x70] sm:$0xff] %v2053_v16   ;;  %2575 = vtanh.f32 %v1307_v17  ;;  %v1308_v23 = vadd.f32 %v2929_v9, %v1163_v18  ;;  %v609_v24 = vpop.f32.mrb[41].mxu1 }
 0x12c   :  { %2577 = vtanh.f32 %v1305_v20  ;;  %v1306_v25 = vadd.f32 %v2929_v9, %v1155_v21  ;;  %v2283_v26 = vpop.f32.mrb[42].mxu1 }
 0x12d   :  { %v2568_v27 = vpop.eup %2567  ;;  %2579 = vtanh.f32 %v1308_v23  ;;  %v612_v28 = vpop.f32.mrb[43].mxu1 }
 0x12e   :  { %v2570_v29 = vpop.eup %2569  ;;  %2581 = vtanh.f32 %v1306_v25  ;;  %v2350_v30 = vpop.f32.mrb[40].mxu0 }
 0x12f   :  { %v2572_v31 = vpop.eup %2571  ;;  %v1176_v32 = vadd.f32 %v2350_v30, %v2282_v22  ;;  %v1167_v33 = vpop.f32.mrb[41].mxu0 }
 0x130   :  { %v2574_v34 = vpop.eup %2573  ;;  %v2068_v35 = vpack.c.bf16 %v2572_v31, %v2568_v27  ;;  %v1168_v36 = vadd.f32 %v1167_v33, %v609_v24  ;;  %v2351_v37 = vpop.f32.mrb[42].mxu0 }
 0x131   :  { %v2063_v38 = vpack.c.bf16 %v2574_v34, %v2570_v29  ;;  %v1311_v39 = vadd.f32 %v2929_v9, %v1176_v32  ;;  %v1179_v40 = vadd.f32 %v2351_v37, %v2283_v26  ;;  %v1170_v41 = vpop.f32.mrb[43].mxu0 }
 0x132   :  { %2156 = vst [vmem:[%s3096_s5 + $0x88] sm:$0xff] %v2068_v35   ;;  %v1309_v42 = vadd.f32 %v2929_v9, %v1168_v36  ;;  %v1171_v43 = vadd.f32 %v1170_v41, %v612_v28  ;;  %v2286_v44 = vpop.f32.mrb[44].mxu1 }
 0x133   :  { %2155 = vst [vmem:[%s3096_s5 + $0x80] sm:$0xff] %v2063_v38   ;;  %2583 = vtanh.f32 %v1311_v39  ;;  %v1312_v45 = vadd.f32 %v2929_v9, %v1179_v40  ;;  %v625_v46 = vpop.f32.mrb[45].mxu1 }
 0x134   :  { %2585 = vtanh.f32 %v1309_v42  ;;  %v1310_v47 = vadd.f32 %v2929_v9, %v1171_v43  ;;  %v2287_v48 = vpop.f32.mrb[46].mxu1 }
 0x135   :  { %v2576_v49 = vpop.eup %2575  ;;  %2587 = vtanh.f32 %v1312_v45  ;;  %v628_v50 = vpop.f32.mrb[47].mxu1 }
 0x136   :  { %v2578_v51 = vpop.eup %2577  ;;  %2589 = vtanh.f32 %v1310_v47  ;;  %v2354_v52 = vpop.f32.mrb[44].mxu0 }
 0x137   :  { %v2580_v53 = vpop.eup %2579  ;;  %v1192_v54 = vadd.f32 %v2354_v52, %v2286_v44  ;;  %v1183_v55 = vpop.f32.mrb[45].mxu0 }
 0x138   :  { %v2582_v56 = vpop.eup %2581  ;;  %v2078_v57 = vpack.c.bf16 %v2580_v53, %v2576_v49  ;;  %v1184_v58 = vadd.f32 %v1183_v55, %v625_v46  ;;  %v2355_v59 = vpop.f32.mrb[46].mxu0 }
 0x139   :  { %v2073_v60 = vpack.c.bf16 %v2582_v56, %v2578_v51  ;;  %v1315_v61 = vadd.f32 %v2929_v9, %v1192_v54  ;;  %v1195_v62 = vadd.f32 %v2355_v59, %v2287_v48  ;;  %v1186_v63 = vpop.f32.mrb[47].mxu0 }
 0x13a   :  { %2158 = vst [vmem:[%s3096_s5 + $0x98] sm:$0xff] %v2078_v57   ;;  %v1313_v0 = vadd.f32 %v2929_v9, %v1184_v58  ;;  %v1187_v1 = vadd.f32 %v1186_v63, %v628_v50  ;;  %v2290_v2 = vpop.f32.mrb[48].mxu1 }
 0x13b   :  { %2157 = vst [vmem:[%s3096_s5 + $0x90] sm:$0xff] %v2073_v60   ;;  %2591 = vtanh.f32 %v1315_v61  ;;  %v1316_v3 = vadd.f32 %v2929_v9, %v1195_v62  ;;  %v641_v4 = vpop.f32.mrb[49].mxu1 }
 0x13c   :  { %2593 = vtanh.f32 %v1313_v0  ;;  %v1314_v5 = vadd.f32 %v2929_v9, %v1187_v1  ;;  %v2291_v6 = vpop.f32.mrb[50].mxu1 }
 0x13d   :  { %v2584_v7 = vpop.eup %2583  ;;  %2595 = vtanh.f32 %v1316_v3  ;;  %v644_v8 = vpop.f32.mrb[51].mxu1 }
 0x13e   :  { %v2586_v10 = vpop.eup %2585  ;;  %2597 = vtanh.f32 %v1314_v5  ;;  %v2358_v11 = vpop.f32.mrb[48].mxu0 }
 0x13f   :  { %v2588_v12 = vpop.eup %2587  ;;  %v1208_v13 = vadd.f32 %v2358_v11, %v2290_v2  ;;  %v1199_v14 = vpop.f32.mrb[49].mxu0 }
 0x140   :  { %v2590_v15 = vpop.eup %2589  ;;  %v2088_v16 = vpack.c.bf16 %v2588_v12, %v2584_v7  ;;  %v1200_v17 = vadd.f32 %v1199_v14, %v641_v4  ;;  %v2359_v18 = vpop.f32.mrb[50].mxu0 }
 0x141   :  { %v2083_v19 = vpack.c.bf16 %v2590_v15, %v2586_v10  ;;  %v1319_v20 = vadd.f32 %v2929_v9, %v1208_v13  ;;  %v1211_v21 = vadd.f32 %v2359_v18, %v2291_v6  ;;  %v1202_v22 = vpop.f32.mrb[51].mxu0 }
 0x142   :  { %2160 = vst [vmem:[%s3096_s5 + $0xa8] sm:$0xff] %v2088_v16   ;;  %v1317_v23 = vadd.f32 %v2929_v9, %v1200_v17  ;;  %v1203_v24 = vadd.f32 %v1202_v22, %v644_v8  ;;  %v2294_v25 = vpop.f32.mrb[52].mxu1 }
 0x143   :  { %2159 = vst [vmem:[%s3096_s5 + $0xa0] sm:$0xff] %v2083_v19   ;;  %2599 = vtanh.f32 %v1319_v20  ;;  %v1320_v26 = vadd.f32 %v2929_v9, %v1211_v21  ;;  %v657_v27 = vpop.f32.mrb[53].mxu1 }
 0x144   :  { %2601 = vtanh.f32 %v1317_v23  ;;  %v1318_v28 = vadd.f32 %v2929_v9, %v1203_v24  ;;  %v2295_v29 = vpop.f32.mrb[54].mxu1 }
 0x145   :  { %v2592_v30 = vpop.eup %2591  ;;  %2603 = vtanh.f32 %v1320_v26  ;;  %v660_v31 = vpop.f32.mrb[55].mxu1 }
 0x146   :  { %v2594_v32 = vpop.eup %2593  ;;  %2605 = vtanh.f32 %v1318_v28  ;;  %v2362_v33 = vpop.f32.mrb[52].mxu0 }
 0x147   :  { %v2596_v34 = vpop.eup %2595  ;;  %v1224_v35 = vadd.f32 %v2362_v33, %v2294_v25  ;;  %v1215_v36 = vpop.f32.mrb[53].mxu0 }
 0x148   :  { %v2598_v37 = vpop.eup %2597  ;;  %v2098_v38 = vpack.c.bf16 %v2596_v34, %v2592_v30  ;;  %v1216_v39 = vadd.f32 %v1215_v36, %v657_v27  ;;  %v2363_v40 = vpop.f32.mrb[54].mxu0 }
 0x149   :  { %v2093_v41 = vpack.c.bf16 %v2598_v37, %v2594_v32  ;;  %v1323_v42 = vadd.f32 %v2929_v9, %v1224_v35  ;;  %v1227_v43 = vadd.f32 %v2363_v40, %v2295_v29  ;;  %v1218_v44 = vpop.f32.mrb[55].mxu0 }
 0x14a   :  { %2162 = vst [vmem:[%s3096_s5 + $0xb8] sm:$0xff] %v2098_v38   ;;  %v1321_v45 = vadd.f32 %v2929_v9, %v1216_v39  ;;  %v1219_v46 = vadd.f32 %v1218_v44, %v660_v31  ;;  %v2298_v47 = vpop.f32.mrb[56].mxu1 }
 0x14b   :  { %2161 = vst [vmem:[%s3096_s5 + $0xb0] sm:$0xff] %v2093_v41   ;;  %2607 = vtanh.f32 %v1323_v42  ;;  %v1324_v48 = vadd.f32 %v2929_v9, %v1227_v43  ;;  %v673_v49 = vpop.f32.mrb[57].mxu1 }
 0x14c   :  { %2609 = vtanh.f32 %v1321_v45  ;;  %v1322_v50 = vadd.f32 %v2929_v9, %v1219_v46  ;;  %v2299_v51 = vpop.f32.mrb[58].mxu1 }
 0x14d   :  { %v2600_v52 = vpop.eup %2599  ;;  %2611 = vtanh.f32 %v1324_v48  ;;  %v676_v53 = vpop.f32.mrb[59].mxu1 }
 0x14e   :  { %v2602_v54 = vpop.eup %2601  ;;  %2613 = vtanh.f32 %v1322_v50  ;;  %v2366_v55 = vpop.f32.mrb[56].mxu0 }
 0x14f   :  { %v2604_v56 = vpop.eup %2603  ;;  %v1240_v57 = vadd.f32 %v2366_v55, %v2298_v47  ;;  %v1231_v58 = vpop.f32.mrb[57].mxu0 }
 0x150   :  { %v2606_v59 = vpop.eup %2605  ;;  %v2108_v60 = vpack.c.bf16 %v2604_v56, %v2600_v52  ;;  %v1232_v61 = vadd.f32 %v1231_v58, %v673_v49  ;;  %v2367_v62 = vpop.f32.mrb[58].mxu0 }
 0x151   :  { %v2103_v63 = vpack.c.bf16 %v2606_v59, %v2602_v54  ;;  %v1327_v0 = vadd.f32 %v2929_v9, %v1240_v57  ;;  %v1243_v1 = vadd.f32 %v2367_v62, %v2299_v51  ;;  %v1234_v2 = vpop.f32.mrb[59].mxu0 }
 0x152   :  { %2164 = vst [vmem:[%s3096_s5 + $0xc8] sm:$0xff] %v2108_v60   ;;  %v1325_v3 = vadd.f32 %v2929_v9, %v1232_v61  ;;  %v1235_v4 = vadd.f32 %v1234_v2, %v676_v53  ;;  %v2302_v5 = vpop.f32.mrb[60].mxu1 }
 0x153   :  { %2163 = vst [vmem:[%s3096_s5 + $0xc0] sm:$0xff] %v2103_v63   ;;  %2615 = vtanh.f32 %v1327_v0  ;;  %v1328_v6 = vadd.f32 %v2929_v9, %v1243_v1  ;;  %v689_v7 = vpop.f32.mrb[61].mxu1 }
 0x154   :  { %2617 = vtanh.f32 %v1325_v3  ;;  %v1326_v8 = vadd.f32 %v2929_v9, %v1235_v4  ;;  %v2303_v10 = vpop.f32.mrb[62].mxu1 }
 0x155   :  { %v2608_v11 = vpop.eup %2607  ;;  %2619 = vtanh.f32 %v1328_v6  ;;  %v692_v12 = vpop.f32.mrb[63].mxu1 }
 0x156   :  { %v2610_v13 = vpop.eup %2609  ;;  %2621 = vtanh.f32 %v1326_v8  ;;  %v2370_v14 = vpop.f32.mrb[60].mxu0 }
 0x157   :  { %v2612_v15 = vpop.eup %2611  ;;  %v1256_v16 = vadd.f32 %v2370_v14, %v2302_v5  ;;  %v1247_v17 = vpop.f32.mrb[61].mxu0 }
 0x158   :  { %v2614_v18 = vpop.eup %2613  ;;  %v2118_v19 = vpack.c.bf16 %v2612_v15, %v2608_v11  ;;  %v1248_v20 = vadd.f32 %v1247_v17, %v689_v7  ;;  %v2371_v21 = vpop.f32.mrb[62].mxu0 }
 0x159   :  { %v2113_v22 = vpack.c.bf16 %v2614_v18, %v2610_v13  ;;  %v1331_v23 = vadd.f32 %v2929_v9, %v1256_v16  ;;  %v1259_v24 = vadd.f32 %v2371_v21, %v2303_v10  ;;  %v1250_v25 = vpop.f32.mrb[63].mxu0 }
 0x15a   :  { %2166 = vst [vmem:[%s3096_s5 + $0xd8] sm:$0xff] %v2118_v19   ;;  %v1329_v26 = vadd.f32 %v2929_v9, %v1248_v20  ;;  %v1251_v27 = vadd.f32 %v1250_v25, %v692_v12 }
 0x15b   :  { %2165 = vst [vmem:[%s3096_s5 + $0xd0] sm:$0xff] %v2113_v22   ;;  %2623 = vtanh.f32 %v1331_v23  ;;  %v1332_v28 = vadd.f32 %v2929_v9, %v1259_v24 }
 0x15c   :  { %2625 = vtanh.f32 %v1329_v26  ;;  %v1330_v29 = vadd.f32 %v2929_v9, %v1251_v27 }
 0x15d   :  { %v2616_v30 = vpop.eup %2615  ;;  %2627 = vtanh.f32 %v1332_v28 }
 0x15e   :  { %v2618_v31 = vpop.eup %2617  ;;  %2629 = vtanh.f32 %v1330_v29 }
 0x15f   :  { %v2620_v32 = vpop.eup %2619 }
 0x160   :  { %v2622_v33 = vpop.eup %2621  ;;  %v2128_v34 = vpack.c.bf16 %v2620_v32, %v2616_v30 }
 0x161   :  { %v2123_v35 = vpack.c.bf16 %v2622_v33, %v2618_v31 }
 0x162   :  { %2168 = vst [vmem:[%s3096_s5 + $0xe8] sm:$0xff] %v2128_v34  }
 0x163   :  { %2167 = vst [vmem:[%s3096_s5 + $0xe0] sm:$0xff] %v2123_v35  }
 0x165   :  { %v2624_v36 = vpop.eup %2623 }
 0x166   :  { %v2626_v37 = vpop.eup %2625 }
 0x167   :  { %v2628_v38 = vpop.eup %2627 }
 0x168   :  { %v2630_v9 = vpop.eup %2629  ;;  %v2138_v39 = vpack.c.bf16 %v2628_v38, %v2624_v36 }
 0x169   :  { %v2133_v40 = vpack.c.bf16 %v2630_v9, %v2626_v37 }
 0x16a   :  { %2170 = vst [vmem:[%s3096_s5 + $0xf8] sm:$0xff] %v2138_v39  }
 0x16b   :  { %2169 = vst [vmem:[%s3096_s5 + $0xf0] sm:$0xff] %v2133_v40  }

// kernel: decoder_forward.9
= control target key start
LH: loop header
LB: loop body
LE: loop exit
PB: predicated region body
PF: predicated region fallthrough
CT: control target
= control target key end

     0   :  { %s5356_s18 = smov 0   ;;  %s6050_s0 = inlined_call_operand.vmem [shape: bf16[2048,32], index: 0, kind: input, shape index: {}]   ;;  %s6051_s1 = inlined_call_operand.vmem [shape: bf16[2048,4], index: 1, kind: input, shape index: {}]   ;;  %s6052_s2 = inlined_call_operand.vmem [shape: bf16[32,8], index: 2, kind: input, shape index: {}]   ;;  %s6053_s3 = inlined_call_operand.vmem [shape: bf16[4,8], index: 3, kind: input, shape index: {}]   ;;  %s6054_s4 = inlined_call_operand.vmem [shape: f32[1,8], index: 4, kind: input, shape index: {}]   ;;  %s6055_s5 = inlined_call_operand.vmem [shape: f32[2048,8], index: 5, kind: output, shape index: {}]  }
   0x1 LB: > { %s3744_s19 = sadd.s32 4294967295, %s5324_s18   ;;  %p3748_p0 = scmp.ge.s32.totalorder %s5324_s18, 1  ;;  %s5324_s18 = sphi %s5356_s18, %s15_s18  }
   0x2   : > { %p199_p1 = scmp.lt.s32.totalorder %s5324_s18, 3 }
   0x4   : > { %p200_p2 = pnand %p3748_p0, %p199_p1 }
   0x5   : > { %v4674_v0 = vld [vmem:[%s6052_s2] sm:$0xff] (!%p200_p2)   ;;  %vm1025_vm0 = vcmask (!%p200_p2), 1041408   ;;  %v4675_v2 = vld [vmem:[%s6052_s2 + $0x8] sm:$0xff] (!%p200_p2)   ;;  %s3749_s26 = sshll.u32 (!%p200_p2), %s3744_s19, 7  ;;  %vm832_vm1 = vcmask (!%p200_p2), 31744   ;;  %vm1906_vm2 = vcmask (!%p200_p2), 261120  }
   0x6   : > { %203 = sbr.rel (%p200_p2) target bundleno = 522 (0x20a), region = 40  ;;  %v511_v1 = vld [vmem:[%s6053_s3] sm:$0x3] (!%p200_p2)  ;;  %4405 = vmatprep.subr.bf16.mxu0 (!%p200_p2), %v4674_v0  ;;  %p233_p3 = scmp.lt.s32.totalorder (!%p200_p2), %s3749_s26, 255  ;;  %vm3547_vm3 = vcmask (!%p200_p2), 64512  }
   0x7   : > { %4665 = vmatprep.subr.msk.bf16.mxu1 (!%p200_p2), %vm1025_vm0, %v511_v1  ;;  %v1027_v3 = vsel (!%p200_p2), %vm1025_vm0, %v511_v1, 0  ;;  %4406 = vmatpush3.bf16.msra.mxu0 (!%p200_p2), %v4674_v0 }
   0x8   : > { %4276 = vmatpush3.bf16.msra.mxu1 (!%p200_p2), %v1027_v3  ;;  %4407 = vmatprep.subr.bf16.mxu0 (!%p200_p2), %v4675_v2 }
   0xb   : > { %4408 = vmatpush3.bf16.msra.mxu0 (!%p200_p2), %v4675_v2 }
   0xd   : > { %s6057_s26 = smov (!%p233_p3, %s3749_s26), 255 }
   0xe   : > { %s3750_s27 = sshll.u32 %s6057_s26, 2  ;;  %s3754_s11 = sshll.u32 %s6057_s26, 3 }
   0xf   : > { %s5379_s30 = scalar_lea.vmem %s6051_s1, %s3750_s27  ;;  %s5385_s8 = scalar_lea.vmem %s6050_s0, %s3750_s27 }
  0x10   : > { %v4676_v4 = vld [vmem:[%s5379_s30] sm:$0xff]   ;;  %v4678_v6 = vld [vmem:[%s5379_s30 + $0x8] sm:$0xff]   ;;  %v4680_v8 = vld [vmem:[%s5379_s30 + $0x10] sm:$0xff]   ;;  %s5656_s14 = scalar_lea.vmem %s6055_s5, %s3754_s11 }
  0x11   : > { %v4677_v5 = vld [vmem:[%s5385_s8] sm:$0xff]   ;;  %4277 = vmatprep.mubr.msk.bf16.mxu1 %vm832_vm1, %v4676_v4  ;;  %v4679_v7 = vld [vmem:[%s5385_s8 + $0x8] sm:$0xff]   ;;  %v4681_v9 = vld [vmem:[%s5385_s8 + $0x10] sm:$0xff]  }
  0x12   : > { %4409 = vmatprep.mubr.msk.bf16.mxu0 %vm1906_vm2, %v4677_v5  ;;  %4278 = vmatmul.mubr.msk.bf16.vlgmr.msra.gmra.mrb[0].mxu1 %vm832_vm1, %v4678_v6  ;;  %v4682_v10 = vld [vmem:[%s5379_s30 + $0x18] sm:$0xff]   ;;  %v4684_v12 = vld [vmem:[%s5379_s30 + $0x20] sm:$0xff]   ;;  %v4686_v14 = vld [vmem:[%s5379_s30 + $0x28] sm:$0xff]  }
  0x13   : > { %4410 = vmatmul.mubr.msk.bf16.vlgmr.msra.gmra.mrb[0].mxu0 %vm1906_vm2, %v4679_v7  ;;  %4281 = vmatprep.mubr.msk.bf16.mxu1 %vm832_vm1, %v4680_v8  ;;  %v4683_v11 = vld [vmem:[%s5385_s8 + $0x18] sm:$0xff]   ;;  %v4685_v13 = vld [vmem:[%s5385_s8 + $0x20] sm:$0xff]   ;;  %v4687_v15 = vld [vmem:[%s5385_s8 + $0x28] sm:$0xff]  }
  0x14   : > { %4413 = vmatprep.mubr.msk.bf16.mxu0 %vm1906_vm2, %v4681_v9  ;;  %v4688_v16 = vld [vmem:[%s5379_s30 + $0x30] sm:$0xff]   ;;  %v4690_v18 = vld [vmem:[%s5379_s30 + $0x38] sm:$0xff]   ;;  %v4692_v20 = vld [vmem:[%s5379_s30 + $0x40] sm:$0xff]  }
  0x15   : > { %v4689_v17 = vld [vmem:[%s5385_s8 + $0x30] sm:$0xff]   ;;  %v4691_v19 = vld [vmem:[%s5385_s8 + $0x38] sm:$0xff]   ;;  %v4693_v21 = vld [vmem:[%s5385_s8 + $0x40] sm:$0xff]  }
  0x16   : > { %v4694_v22 = vld [vmem:[%s5379_s30 + $0x48] sm:$0xff]   ;;  %v4696_v24 = vld [vmem:[%s5379_s30 + $0x50] sm:$0xff]   ;;  %v4698_v26 = vld [vmem:[%s5379_s30 + $0x58] sm:$0xff]  }
  0x17   : > { %v4695_v23 = vld [vmem:[%s5385_s8 + $0x48] sm:$0xff]   ;;  %v4697_v25 = vld [vmem:[%s5385_s8 + $0x50] sm:$0xff]   ;;  %v4699_v27 = vld [vmem:[%s5385_s8 + $0x58] sm:$0xff]  }
  0x18   : > { %v4700_v28 = vld [vmem:[%s5379_s30 + $0x60] sm:$0xff]   ;;  %v4702_v30 = vld [vmem:[%s5379_s30 + $0x68] sm:$0xff]   ;;  %v4704_v32 = vld [vmem:[%s5379_s30 + $0x70] sm:$0xff]  }
  0x19   : > { %v4701_v29 = vld [vmem:[%s5385_s8 + $0x60] sm:$0xff]   ;;  %v4703_v31 = vld [vmem:[%s5385_s8 + $0x68] sm:$0xff]   ;;  %v4705_v33 = vld [vmem:[%s5385_s8 + $0x70] sm:$0xff]  }
  0x1a   : > { %4282 = vmatmul.mubr.msk.bf16.gmra.mrb[4].mxu1 %vm832_vm1, %v4682_v10  ;;  %v4706_v34 = vld [vmem:[%s5379_s30 + $0x78] sm:$0xff]   ;;  %v4708_v36 = vld [vmem:[%s5379_s30 + $0x80] sm:$0xff]   ;;  %v4710_v38 = vld [vmem:[%s5379_s30 + $0x88] sm:$0xff]  }
  0x1b   : > { %4414 = vmatmul.mubr.msk.bf16.gmra.mrb[4].mxu0 %vm1906_vm2, %v4683_v11  ;;  %4285 = vmatprep.mubr.msk.bf16.mxu1 %vm832_vm1, %v4684_v12  ;;  %v4707_v35 = vld [vmem:[%s5385_s8 + $0x78] sm:$0xff]   ;;  %v4709_v37 = vld [vmem:[%s5385_s8 + $0x80] sm:$0xff]   ;;  %v4711_v39 = vld [vmem:[%s5385_s8 + $0x88] sm:$0xff]  }
  0x1c   : > { %4417 = vmatprep.mubr.msk.bf16.mxu0 %vm1906_vm2, %v4685_v13  ;;  %v4712_v40 = vld [vmem:[%s5379_s30 + $0x90] sm:$0xff]   ;;  %v4714_v42 = vld [vmem:[%s5379_s30 + $0x98] sm:$0xff]   ;;  %v4716_v44 = vld [vmem:[%s5379_s30 + $0xa0] sm:$0xff]  }
  0x1d   : > { %v4713_v41 = vld [vmem:[%s5385_s8 + $0x90] sm:$0xff]   ;;  %v4715_v43 = vld [vmem:[%s5385_s8 + $0x98] sm:$0xff]   ;;  %v4717_v45 = vld [vmem:[%s5385_s8 + $0xa0] sm:$0xff]  }
  0x1e   : > { %v4718_v46 = vld [vmem:[%s5379_s30 + $0xa8] sm:$0xff]   ;;  %v4720_v48 = vld [vmem:[%s5379_s30 + $0xb0] sm:$0xff]   ;;  %v4722_v50 = vld [vmem:[%s5379_s30 + $0xb8] sm:$0xff]  }
  0x1f   : > { %v4719_v47 = vld [vmem:[%s5385_s8 + $0xa8] sm:$0xff]   ;;  %v4721_v49 = vld [vmem:[%s5385_s8 + $0xb0] sm:$0xff]   ;;  %v4723_v51 = vld [vmem:[%s5385_s8 + $0xb8] sm:$0xff]  }
  0x20   : > { %v4724_v52 = vld [vmem:[%s5379_s30 + $0xc0] sm:$0xff]   ;;  %v4726_v54 = vld [vmem:[%s5379_s30 + $0xc8] sm:$0xff]   ;;  %v4728_v56 = vld [vmem:[%s5379_s30 + $0xd0] sm:$0xff]  }
  0x21   : > { %v4725_v53 = vld [vmem:[%s5385_s8 + $0xc0] sm:$0xff]   ;;  %v4727_v55 = vld [vmem:[%s5385_s8 + $0xc8] sm:$0xff]   ;;  %v4729_v57 = vld [vmem:[%s5385_s8 + $0xd0] sm:$0xff]  }
  0x22   : > { %4286 = vmatmul.mubr.msk.bf16.gmra.mrb[8].mxu1 %vm832_vm1, %v4686_v14  ;;  %v4730_v58 = vld [vmem:[%s5379_s30 + $0xd8] sm:$0xff]   ;;  %v4732_v60 = vld [vmem:[%s5379_s30 + $0xe0] sm:$0xff]   ;;  %v4734_v62 = vld [vmem:[%s5379_s30 + $0xe8] sm:$0xff]  }
  0x23   : > { %4418 = vmatmul.mubr.msk.bf16.gmra.mrb[8].mxu0 %vm1906_vm2, %v4687_v15  ;;  %4289 = vmatprep.mubr.msk.bf16.mxu1 %vm832_vm1, %v4688_v16  ;;  %v4731_v59 = vld [vmem:[%s5385_s8 + $0xd8] sm:$0xff]   ;;  %v4733_v61 = vld [vmem:[%s5385_s8 + $0xe0] sm:$0xff]   ;;  %v4735_v63 = vld [vmem:[%s5385_s8 + $0xe8] sm:$0xff]  }
  0x24   : > { %4421 = vmatprep.mubr.msk.bf16.mxu0 %vm1906_vm2, %v4689_v17  ;;  %v4736_v0 = vld [vmem:[%s5379_s30 + $0xf0] sm:$0xff]   ;;  %v4738_v2 = vld [vmem:[%s5379_s30 + $0xf8] sm:$0xff]   ;;  %v4740_v4 = vld [vmem:[%s5379_s30 + $0x100] sm:$0xff]  }
  0x25   : > { %v4737_v1 = vld [vmem:[%s5385_s8 + $0xf0] sm:$0xff]   ;;  %v4739_v3 = vld [vmem:[%s5385_s8 + $0xf8] sm:$0xff]   ;;  %v4741_v5 = vld [vmem:[%s5385_s8 + $0x100] sm:$0xff]  }
  0x26   : > { %v4742_v6 = vld [vmem:[%s5379_s30 + $0x108] sm:$0xff]   ;;  %v4744_v8 = vld [vmem:[%s5379_s30 + $0x110] sm:$0xff]   ;;  %v4746_v10 = vld [vmem:[%s5379_s30 + $0x118] sm:$0xff]  }
  0x27   : > { %v4743_v7 = vld [vmem:[%s5385_s8 + $0x108] sm:$0xff]   ;;  %v4745_v9 = vld [vmem:[%s5385_s8 + $0x110] sm:$0xff]   ;;  %v4747_v11 = vld [vmem:[%s5385_s8 + $0x118] sm:$0xff]  }
  0x28   : > { %v4748_v12 = vld [vmem:[%s5379_s30 + $0x120] sm:$0xff]   ;;  %v4750_v14 = vld [vmem:[%s5379_s30 + $0x128] sm:$0xff]   ;;  %v4752_v16 = vld [vmem:[%s5379_s30 + $0x130] sm:$0xff]  }
  0x29   : > { %v4749_v13 = vld [vmem:[%s5385_s8 + $0x120] sm:$0xff]   ;;  %v4751_v15 = vld [vmem:[%s5385_s8 + $0x128] sm:$0xff]   ;;  %v4753_v17 = vld [vmem:[%s5385_s8 + $0x130] sm:$0xff]  }
  0x2a   : > { %4290 = vmatmul.mubr.msk.bf16.gmra.mrb[12].mxu1 %vm832_vm1, %v4690_v18  ;;  %v4754_v18 = vld [vmem:[%s5379_s30 + $0x138] sm:$0xff]  }
  0x2b   : > { %4422 = vmatmul.mubr.msk.bf16.gmra.mrb[12].mxu0 %vm1906_vm2, %v4691_v19  ;;  %4293 = vmatprep.mubr.msk.bf16.mxu1 %vm832_vm1, %v4692_v20  ;;  %v4755_v19 = vld [vmem:[%s5385_s8 + $0x138] sm:$0xff]   ;;  %v4756_v20 = vld [vmem:[%s5379_s30 + $0x140] sm:$0xff]  }
  0x2c   : > { %4425 = vmatprep.mubr.msk.bf16.mxu0 %vm1906_vm2, %v4693_v21  ;;  %v4757_v21 = vld [vmem:[%s5385_s8 + $0x140] sm:$0xff]  }
  0x32   : > { %4294 = vmatmul.mubr.msk.bf16.gmra.mrb[16].mxu1 %vm832_vm1, %v4694_v22  ;;  %v4758_v22 = vld [vmem:[%s5379_s30 + $0x148] sm:$0xff]  }
  0x33   : > { %4426 = vmatmul.mubr.msk.bf16.gmra.mrb[16].mxu0 %vm1906_vm2, %v4695_v23  ;;  %4297 = vmatprep.mubr.msk.bf16.mxu1 %vm832_vm1, %v4696_v24  ;;  %v4759_v23 = vld [vmem:[%s5385_s8 + $0x148] sm:$0xff]   ;;  %v4760_v24 = vld [vmem:[%s5379_s30 + $0x150] sm:$0xff]  }
  0x34   : > { %4429 = vmatprep.mubr.msk.bf16.mxu0 %vm1906_vm2, %v4697_v25  ;;  %v4761_v25 = vld [vmem:[%s5385_s8 + $0x150] sm:$0xff]  }
  0x3a   : > { %4298 = vmatmul.mubr.msk.bf16.gmra.mrb[20].mxu1 %vm832_vm1, %v4698_v26  ;;  %v4762_v26 = vld [vmem:[%s5379_s30 + $0x158] sm:$0xff]  }
  0x3b   : > { %4430 = vmatmul.mubr.msk.bf16.gmra.mrb[20].mxu0 %vm1906_vm2, %v4699_v27  ;;  %4301 = vmatprep.mubr.msk.bf16.mxu1 %vm832_vm1, %v4700_v28  ;;  %v4763_v27 = vld [vmem:[%s5385_s8 + $0x158] sm:$0xff]   ;;  %v4764_v28 = vld [vmem:[%s5379_s30 + $0x160] sm:$0xff]  }
  0x3c   : > { %4433 = vmatprep.mubr.msk.bf16.mxu0 %vm1906_vm2, %v4701_v29  ;;  %v4765_v29 = vld [vmem:[%s5385_s8 + $0x160] sm:$0xff]  }
  0x42   : > { %4302 = vmatmul.mubr.msk.bf16.gmra.mrb[24].mxu1 %vm832_vm1, %v4702_v30  ;;  %v4766_v30 = vld [vmem:[%s5379_s30 + $0x168] sm:$0xff]  }
  0x43   : > { %4434 = vmatmul.mubr.msk.bf16.gmra.mrb[24].mxu0 %vm1906_vm2, %v4703_v31  ;;  %4305 = vmatprep.mubr.msk.bf16.mxu1 %vm832_vm1, %v4704_v32  ;;  %v4767_v31 = vld [vmem:[%s5385_s8 + $0x168] sm:$0xff]   ;;  %v4768_v32 = vld [vmem:[%s5379_s30 + $0x170] sm:$0xff]  }
  0x44   : > { %4437 = vmatprep.mubr.msk.bf16.mxu0 %vm1906_vm2, %v4705_v33  ;;  %v4769_v33 = vld [vmem:[%s5385_s8 + $0x170] sm:$0xff]  }
  0x4a   : > { %4306 = vmatmul.mubr.msk.bf16.gmra.mrb[28].mxu1 %vm832_vm1, %v4706_v34  ;;  %v4770_v34 = vld [vmem:[%s5379_s30 + $0x178] sm:$0xff]  }
  0x4b   : > { %4438 = vmatmul.mubr.msk.bf16.gmra.mrb[28].mxu0 %vm1906_vm2, %v4707_v35  ;;  %4309 = vmatprep.mubr.msk.bf16.mxu1 %vm832_vm1, %v4708_v36  ;;  %v4771_v35 = vld [vmem:[%s5385_s8 + $0x178] sm:$0xff]   ;;  %v4772_v36 = vld [vmem:[%s5379_s30 + $0x180] sm:$0xff]  }
  0x4c   : > { %4441 = vmatprep.mubr.msk.bf16.mxu0 %vm1906_vm2, %v4709_v37  ;;  %v4773_v37 = vld [vmem:[%s5385_s8 + $0x180] sm:$0xff]  }
  0x52   : > { %4310 = vmatmul.mubr.msk.bf16.gmra.mrb[32].mxu1 %vm832_vm1, %v4710_v38  ;;  %v4774_v38 = vld [vmem:[%s5379_s30 + $0x188] sm:$0xff]  }
  0x53   : > { %4442 = vmatmul.mubr.msk.bf16.gmra.mrb[32].mxu0 %vm1906_vm2, %v4711_v39  ;;  %4313 = vmatprep.mubr.msk.bf16.mxu1 %vm832_vm1, %v4712_v40  ;;  %v4775_v39 = vld [vmem:[%s5385_s8 + $0x188] sm:$0xff]   ;;  %v4776_v40 = vld [vmem:[%s5379_s30 + $0x190] sm:$0xff]  }
  0x54   : > { %4445 = vmatprep.mubr.msk.bf16.mxu0 %vm1906_vm2, %v4713_v41  ;;  %v4777_v41 = vld [vmem:[%s5385_s8 + $0x190] sm:$0xff]  }
  0x5a   : > { %4314 = vmatmul.mubr.msk.bf16.gmra.mrb[36].mxu1 %vm832_vm1, %v4714_v42  ;;  %v4778_v42 = vld [vmem:[%s5379_s30 + $0x198] sm:$0xff]  }
  0x5b   : > { %4446 = vmatmul.mubr.msk.bf16.gmra.mrb[36].mxu0 %vm1906_vm2, %v4715_v43  ;;  %4317 = vmatprep.mubr.msk.bf16.mxu1 %vm832_vm1, %v4716_v44  ;;  %v4779_v43 = vld [vmem:[%s5385_s8 + $0x198] sm:$0xff]   ;;  %v4780_v44 = vld [vmem:[%s5379_s30 + $0x1a0] sm:$0xff]  }
  0x5c   : > { %4449 = vmatprep.mubr.msk.bf16.mxu0 %vm1906_vm2, %v4717_v45  ;;  %v4781_v45 = vld [vmem:[%s5385_s8 + $0x1a0] sm:$0xff]  }
  0x62   : > { %4318 = vmatmul.mubr.msk.bf16.gmra.mrb[40].mxu1 %vm832_vm1, %v4718_v46  ;;  %v4782_v46 = vld [vmem:[%s5379_s30 + $0x1a8] sm:$0xff]  }
  0x63   : > { %4450 = vmatmul.mubr.msk.bf16.gmra.mrb[40].mxu0 %vm1906_vm2, %v4719_v47  ;;  %4321 = vmatprep.mubr.msk.bf16.mxu1 %vm832_vm1, %v4720_v48  ;;  %v4783_v47 = vld [vmem:[%s5385_s8 + $0x1a8] sm:$0xff]   ;;  %v4784_v48 = vld [vmem:[%s5379_s30 + $0x1b0] sm:$0xff]  }
  0x64   : > { %4453 = vmatprep.mubr.msk.bf16.mxu0 %vm1906_vm2, %v4721_v49  ;;  %v4785_v49 = vld [vmem:[%s5385_s8 + $0x1b0] sm:$0xff]  }
  0x6a   : > { %4322 = vmatmul.mubr.msk.bf16.gmra.mrb[44].mxu1 %vm832_vm1, %v4722_v50 }
  0x6b   : > { %4454 = vmatmul.mubr.msk.bf16.gmra.mrb[44].mxu0 %vm1906_vm2, %v4723_v51  ;;  %4325 = vmatprep.mubr.msk.bf16.mxu1 %vm832_vm1, %v4724_v52  ;;  %v5609_v52 = vld [vmem:[%s6054_s4] ss:$0 sm:$0xff] }
  0x6c   : > { %4457 = vmatprep.mubr.msk.bf16.mxu0 %vm1906_vm2, %v4725_v53 }
  0x72   : > { %4326 = vmatmul.mubr.msk.bf16.gmra.mrb[48].mxu1 %vm832_vm1, %v4726_v54  ;;  %v4786_v54 = vld [vmem:[%s5379_s30 + $0x1b8] sm:$0xff]  }
  0x73   : > { %4458 = vmatmul.mubr.msk.bf16.gmra.mrb[48].mxu0 %vm1906_vm2, %v4727_v55  ;;  %4329 = vmatprep.mubr.msk.bf16.mxu1 %vm832_vm1, %v4728_v56 }
  0x74   : > { %4461 = vmatprep.mubr.msk.bf16.mxu0 %vm1906_vm2, %v4729_v57 }
  0x7a   : > { %4330 = vmatmul.mubr.msk.bf16.gmra.mrb[52].mxu1 %vm832_vm1, %v4730_v58  ;;  %v4787_v58 = vld [vmem:[%s5385_s8 + $0x1b8] sm:$0xff]  }
  0x7b   : > { %4462 = vmatmul.mubr.msk.bf16.gmra.mrb[52].mxu0 %vm1906_vm2, %v4731_v59  ;;  %4333 = vmatprep.mubr.msk.bf16.mxu1 %vm832_vm1, %v4732_v60  ;;  %v4788_v59 = vld [vmem:[%s5379_s30 + $0x1c0] sm:$0xff]  }
  0x7c   : > { %4465 = vmatprep.mubr.msk.bf16.mxu0 %vm1906_vm2, %v4733_v61 }
  0x82   : > { %4334 = vmatmul.mubr.msk.bf16.gmra.mrb[56].mxu1 %vm832_vm1, %v4734_v62 }
  0x83   : > { %4466 = vmatmul.mubr.msk.bf16.gmra.mrb[56].mxu0 %vm1906_vm2, %v4735_v63  ;;  %4337 = vmatprep.mubr.msk.bf16.mxu1 %vm832_vm1, %v4736_v0  ;;  %v4789_v63 = vld [vmem:[%s5385_s8 + $0x1c0] sm:$0xff]  }
  0x84   : > { %4469 = vmatprep.mubr.msk.bf16.mxu0 %vm1906_vm2, %v4737_v1 }
  0x8a   : > { %4338 = vmatmul.mubr.msk.bf16.gmra.mrb[60].mxu1 %vm832_vm1, %v4738_v2 }
  0x8b   : > { %4470 = vmatmul.mubr.msk.bf16.gmra.mrb[60].mxu0 %vm1906_vm2, %v4739_v3  ;;  %4341 = vmatprep.mubr.msk.bf16.mxu1 %vm832_vm1, %v4740_v4 }
  0x8c   : > { %4473 = vmatprep.mubr.msk.bf16.mxu0 %vm1906_vm2, %v4741_v5 }
  0x92   : > { %4342 = vmatmul.mubr.msk.bf16.gmra.mrb[64].mxu1 %vm832_vm1, %v4742_v6 }
  0x93   : > { %4474 = vmatmul.mubr.msk.bf16.gmra.mrb[64].mxu0 %vm1906_vm2, %v4743_v7  ;;  %4345 = vmatprep.mubr.msk.bf16.mxu1 %vm832_vm1, %v4744_v8 }
  0x94   : > { %4477 = vmatprep.mubr.msk.bf16.mxu0 %vm1906_vm2, %v4745_v9 }
  0x9a   : > { %4346 = vmatmul.mubr.msk.bf16.gmra.mrb[68].mxu1 %vm832_vm1, %v4746_v10 }
  0x9b   : > { %4478 = vmatmul.mubr.msk.bf16.gmra.mrb[68].mxu0 %vm1906_vm2, %v4747_v11  ;;  %4349 = vmatprep.mubr.msk.bf16.mxu1 %vm832_vm1, %v4748_v12 }
  0x9c   : > { %4481 = vmatprep.mubr.msk.bf16.mxu0 %vm1906_vm2, %v4749_v13 }
  0xa2   : > { %4350 = vmatmul.mubr.msk.bf16.gmra.mrb[72].mxu1 %vm832_vm1, %v4750_v14  ;;  %v4790_v14 = vld [vmem:[%s5379_s30 + $0x1c8] sm:$0xff]  }
  0xa3   : > { %4482 = vmatmul.mubr.msk.bf16.gmra.mrb[72].mxu0 %vm1906_vm2, %v4751_v15  ;;  %4353 = vmatprep.mubr.msk.bf16.mxu1 %vm832_vm1, %v4752_v16 }
  0xa4   : > { %4485 = vmatprep.mubr.msk.bf16.mxu0 %vm1906_vm2, %v4753_v17 }
  0xaa   : > { %4354 = vmatmul.mubr.msk.bf16.gmra.mrb[76].mxu1 %vm832_vm1, %v4754_v18  ;;  %v4791_v18 = vld [vmem:[%s5385_s8 + $0x1c8] sm:$0xff]  }
  0xab   : > { %4486 = vmatmul.mubr.msk.bf16.gmra.mrb[76].mxu0 %vm1906_vm2, %v4755_v19  ;;  %4357 = vmatprep.mubr.msk.bf16.mxu1 %vm832_vm1, %v4756_v20  ;;  %v4792_v19 = vld [vmem:[%s5379_s30 + $0x1d0] sm:$0xff]  }
  0xac   : > { %4489 = vmatprep.mubr.msk.bf16.mxu0 %vm1906_vm2, %v4757_v21 }
  0xb2   : > { %4358 = vmatmul.mubr.msk.bf16.gmra.mrb[80].mxu1 %vm832_vm1, %v4758_v22 }
  0xb3   : > { %4490 = vmatmul.mubr.msk.bf16.gmra.mrb[80].mxu0 %vm1906_vm2, %v4759_v23  ;;  %4361 = vmatprep.mubr.msk.bf16.mxu1 %vm832_vm1, %v4760_v24  ;;  %v4793_v23 = vld [vmem:[%s5385_s8 + $0x1d0] sm:$0xff]  }
  0xb4   : > { %4493 = vmatprep.mubr.msk.bf16.mxu0 %vm1906_vm2, %v4761_v25 }
  0xba   : > { %4362 = vmatmul.mubr.msk.bf16.gmra.mrb[84].mxu1 %vm832_vm1, %v4762_v26 }
  0xbb   : > { %4494 = vmatmul.mubr.msk.bf16.gmra.mrb[84].mxu0 %vm1906_vm2, %v4763_v27  ;;  %4365 = vmatprep.mubr.msk.bf16.mxu1 %vm832_vm1, %v4764_v28 }
  0xbc   : > { %4497 = vmatprep.mubr.msk.bf16.mxu0 %vm1906_vm2, %v4765_v29 }
  0xc2   : > { %4366 = vmatmul.mubr.msk.bf16.gmra.mrb[88].mxu1 %vm832_vm1, %v4766_v30 }
  0xc3   : > { %4498 = vmatmul.mubr.msk.bf16.gmra.mrb[88].mxu0 %vm1906_vm2, %v4767_v31  ;;  %4369 = vmatprep.mubr.msk.bf16.mxu1 %vm832_vm1, %v4768_v32 }
  0xc4   : > { %4501 = vmatprep.mubr.msk.bf16.mxu0 %vm1906_vm2, %v4769_v33 }
  0xca   : > { %4370 = vmatmul.mubr.msk.bf16.gmra.mrb[92].mxu1 %vm832_vm1, %v4770_v34 }
  0xcb   : > { %4502 = vmatmul.mubr.msk.bf16.gmra.mrb[92].mxu0 %vm1906_vm2, %v4771_v35  ;;  %4373 = vmatprep.mubr.msk.bf16.mxu1 %vm832_vm1, %v4772_v36 }
  0xcc   : > { %4505 = vmatprep.mubr.msk.bf16.mxu0 %vm1906_vm2, %v4773_v37 }
  0xd2   : > { %4374 = vmatmul.mubr.msk.bf16.gmra.mrb[96].mxu1 %vm832_vm1, %v4774_v38  ;;  %v4794_v38 = vld [vmem:[%s5379_s30 + $0x1d8] sm:$0xff]  }
  0xd3   : > { %4506 = vmatmul.mubr.msk.bf16.gmra.mrb[96].mxu0 %vm1906_vm2, %v4775_v39  ;;  %4377 = vmatprep.mubr.msk.bf16.mxu1 %vm832_vm1, %v4776_v40 }
  0xd4   : > { %4509 = vmatprep.mubr.msk.bf16.mxu0 %vm1906_vm2, %v4777_v41 }
  0xda   : > { %4378 = vmatmul.mubr.msk.bf16.gmra.mrb[100].mxu1 %vm832_vm1, %v4778_v42 }
  0xdb   : > { %4510 = vmatmul.mubr.msk.bf16.gmra.mrb[100].mxu0 %vm1906_vm2, %v4779_v43  ;;  %4381 = vmatprep.mubr.msk.bf16.mxu1 %vm832_vm1, %v4780_v44  ;;  %v4795_v43 = vld [vmem:[%s5385_s8 + $0x1d8] sm:$0xff]   ;;  %v4796_v44 = vld [vmem:[%s5379_s30 + $0x1e0] sm:$0xff]  }
  0xdc   : > { %4513 = vmatprep.mubr.msk.bf16.mxu0 %vm1906_vm2, %v4781_v45 }
  0xe2   : > { %4382 = vmatmul.mubr.msk.bf16.gmra.mrb[104].mxu1 %vm832_vm1, %v4782_v46 }
  0xe3   : > { %4514 = vmatmul.mubr.msk.bf16.gmra.mrb[104].mxu0 %vm1906_vm2, %v4783_v47  ;;  %4385 = vmatprep.mubr.msk.bf16.mxu1 %vm832_vm1, %v4784_v48 }
  0xe4   : > { %4517 = vmatprep.mubr.msk.bf16.mxu0 %vm1906_vm2, %v4785_v49 }
  0xe5   : > { %v4279_v50 = vpop.f32.mrb[0].mxu1 }
  0xe6   : > { %v4411_v51 = vpop.f32.mrb[0].mxu0  ;;  %v1063_v53 = vpop.f32.mrb[1].mxu1 }
  0xe7   : > { %v2142_v55 = vadd.f32 %v4411_v51, %v4279_v50  ;;  %v2133_v56 = vpop.f32.mrb[1].mxu0  ;;  %v4280_v57 = vpop.f32.mrb[2].mxu1  ;;  %v4797_v50 = vld [vmem:[%s5385_s8 + $0x1e0] sm:$0xff]  }
  0xe8   : > { %v2134_v60 = vadd.f32 %v2133_v56, %v1063_v53  ;;  %v4412_v61 = vpop.f32.mrb[2].mxu0  ;;  %v1066_v62 = vpop.f32.mrb[3].mxu1 }
  0xe9   : > { %v2653_v0 = vadd.f32 %v5609_v52, %v2142_v55  ;;  %v2145_v1 = vadd.f32 %v4412_v61, %v4280_v57  ;;  %v2136_v2 = vpop.f32.mrb[3].mxu0 }
  0xea   : > { %v2651_v3 = vadd.f32 %v5609_v52, %v2134_v60  ;;  %v2137_v4 = vadd.f32 %v2136_v2, %v1066_v62  ;;  %4386 = vmatmul.mubr.msk.bf16.gmra.mrb[108].mxu1 %vm832_vm1, %v4786_v54 }
  0xeb   : > { %v4016_v5 = vmul.f32 -1.442695, %v2653_v0  ;;  %v2654_v6 = vadd.f32 %v5609_v52, %v2145_v1  ;;  %4518 = vmatmul.mubr.msk.bf16.gmra.mrb[108].mxu0 %vm1906_vm2, %v4787_v58  ;;  %4389 = vmatprep.mubr.msk.bf16.mxu1 %vm832_vm1, %v4788_v59 }
  0xec   : > { %v4014_v7 = vmul.f32 -1.442695, %v2651_v3  ;;  %v2652_v8 = vadd.f32 %v5609_v52, %v2137_v4  ;;  %4521 = vmatprep.mubr.msk.bf16.mxu0 %vm1906_vm2, %v4789_v63 }
  0xed   : > { %4804 = vpow2.f32 %v4016_v5  ;;  %v4017_v9 = vmul.f32 -1.442695, %v2654_v6  ;;  %v4283_v10 = vpop.f32.mrb[4].mxu1 }
  0xee   : > { %4806 = vpow2.f32 %v4014_v7  ;;  %v4015_v11 = vmul.f32 -1.442695, %v2652_v8  ;;  %v4415_v12 = vpop.f32.mrb[4].mxu0  ;;  %v1079_v13 = vpop.f32.mrb[5].mxu1  ;;  %v4798_v7 = vld [vmem:[%s5379_s30 + $0x1e8] sm:$0xff]  }
  0xef   : > { %4808 = vpow2.f32 %v4017_v9  ;;  %v2158_v15 = vadd.f32 %v4415_v12, %v4283_v10  ;;  %v2149_v16 = vpop.f32.mrb[5].mxu0  ;;  %v4284_v17 = vpop.f32.mrb[6].mxu1  ;;  %v4799_v12 = vld [vmem:[%s5385_s8 + $0x1e8] sm:$0xff]  }
  0xf0   : > { %4810 = vpow2.f32 %v4015_v11  ;;  %v2150_v20 = vadd.f32 %v2149_v16, %v1079_v13  ;;  %v4416_v21 = vpop.f32.mrb[6].mxu0  ;;  %v1082_v22 = vpop.f32.mrb[7].mxu1  ;;  %v4800_v13 = vld [vmem:[%s5379_s30 + $0x1f0] sm:$0xff]  }
  0xf1   : > { %v2657_v24 = vadd.f32 %v5609_v52, %v2158_v15  ;;  %v2161_v25 = vadd.f32 %v4416_v21, %v4284_v17  ;;  %v2152_v26 = vpop.f32.mrb[7].mxu0 }
  0xf2   : > { %v2655_v27 = vadd.f32 %v5609_v52, %v2150_v20  ;;  %v2153_v28 = vadd.f32 %v2152_v26, %v1082_v22  ;;  %4390 = vmatmul.mubr.msk.bf16.gmra.mrb[112].mxu1 %vm832_vm1, %v4790_v14 }
  0xf3   : > { %v4020_v29 = vmul.f32 -1.442695, %v2657_v24  ;;  %v2658_v30 = vadd.f32 %v5609_v52, %v2161_v25  ;;  %4522 = vmatmul.mubr.msk.bf16.gmra.mrb[112].mxu0 %vm1906_vm2, %v4791_v18  ;;  %4393 = vmatprep.mubr.msk.bf16.mxu1 %vm832_vm1, %v4792_v19  ;;  %v4801_v19 = vld [vmem:[%s5385_s8 + $0x1f0] sm:$0xff]  }
  0xf4   : > { %v4018_v31 = vmul.f32 -1.442695, %v2655_v27  ;;  %v2656_v32 = vadd.f32 %v5609_v52, %v2153_v28  ;;  %4525 = vmatprep.mubr.msk.bf16.mxu0 %vm1906_vm2, %v4793_v23 }
  0xf5   : > { %4812 = vpow2.f32 %v4020_v29  ;;  %v4021_v33 = vmul.f32 -1.442695, %v2658_v30  ;;  %v4287_v34 = vpop.f32.mrb[8].mxu1 }
  0xf6   : > { %4814 = vpow2.f32 %v4018_v31  ;;  %v4019_v35 = vmul.f32 -1.442695, %v2656_v32  ;;  %v4419_v36 = vpop.f32.mrb[8].mxu0  ;;  %v1095_v37 = vpop.f32.mrb[9].mxu1 }
  0xf7   : > { %v4805_v39 = vpop.eup %4804  ;;  %4816 = vpow2.f32 %v4021_v33  ;;  %v2174_v40 = vadd.f32 %v4419_v36, %v4287_v34  ;;  %v2165_v41 = vpop.f32.mrb[9].mxu0 }
  0xf8   : > { %v4288_v42 = vpop.f32.mrb[10].mxu1  ;;  %v4807_v45 = vpop.eup %4806  ;;  %v3165_v46 = vadd.f32 1.0, %v4805_v39  ;;  %4818 = vpow2.f32 %v4019_v35  ;;  %v2166_v47 = vadd.f32 %v2165_v41, %v1095_v37 }
  0xf9   : > { %v4420_v48 = vpop.f32.mrb[10].mxu0  ;;  %v1098_v49 = vpop.f32.mrb[11].mxu1  ;;  %v3163_v53 = vadd.f32 1.0, %v4807_v45  ;;  %v2661_v54 = vadd.f32 %v5609_v52, %v2174_v40 }
  0xfa   : > { %v4809_v51 = vpop.eup %4808  ;;  %v2177_v55 = vadd.f32 %v4420_v48, %v4288_v42  ;;  %v2168_v56 = vpop.f32.mrb[11].mxu0  ;;  %4820 = vrcp.f32 %v3165_v46  ;;  %v2659_v59 = vadd.f32 %v5609_v52, %v2166_v47  ;;  %4394 = vmatmul.mubr.msk.bf16.gmra.mrb[116].mxu1 %vm832_vm1, %v4794_v38  ;;  %v4802_v42 = vld [vmem:[%s5379_s30 + $0x1f8] sm:$0xff]  }
  0xfb   : > { %v4811_v57 = vpop.eup %4810  ;;  %v3166_v58 = vadd.f32 1.0, %v4809_v51  ;;  %v2169_v60 = vadd.f32 %v2168_v56, %v1098_v49  ;;  %4822 = vrcp.f32 %v3163_v53  ;;  %v4024_v62 = vmul.f32 -1.442695, %v2661_v54  ;;  %4526 = vmatmul.mubr.msk.bf16.gmra.mrb[116].mxu0 %vm1906_vm2, %v4795_v43  ;;  %4397 = vmatprep.mubr.msk.bf16.mxu1 %vm832_vm1, %v4796_v44  ;;  %v4803_v47 = vld [vmem:[%s5385_s8 + $0x1f8] sm:$0xff]  }
  0xfc   : > { %v3164_v61 = vadd.f32 1.0, %v4811_v57  ;;  %v2662_v63 = vadd.f32 %v5609_v52, %v2177_v55  ;;  %v4022_v0 = vmul.f32 -1.442695, %v2659_v59  ;;  %4529 = vmatprep.mubr.msk.bf16.mxu0 %vm1906_vm2, %v4797_v50 }
  0xfd   : > { %4824 = vrcp.f32 %v3166_v58  ;;  %v2660_v1 = vadd.f32 %v5609_v52, %v2169_v60  ;;  %v4291_v3 = vpop.f32.mrb[12].mxu1 }
  0xfe   : > { %4826 = vrcp.f32 %v3164_v61  ;;  %v4025_v2 = vmul.f32 -1.442695, %v2662_v63  ;;  %v4423_v5 = vpop.f32.mrb[12].mxu0  ;;  %v1111_v6 = vpop.f32.mrb[13].mxu1 }
  0xff   : > { %4828 = vpow2.f32 %v4024_v62  ;;  %v4023_v4 = vmul.f32 -1.442695, %v2660_v1  ;;  %v4813_v8 = vpop.eup %4812  ;;  %v2190_v9 = vadd.f32 %v4423_v5, %v4291_v3  ;;  %v2181_v10 = vpop.f32.mrb[13].mxu0 }
 0x100   : > { %4830 = vpow2.f32 %v4022_v0  ;;  %v4292_v11 = vpop.f32.mrb[14].mxu1  ;;  %v4815_v14 = vpop.eup %4814  ;;  %v3169_v15 = vadd.f32 1.0, %v4813_v8  ;;  %v2182_v16 = vadd.f32 %v2181_v10, %v1111_v6 }
 0x101   : > { %4832 = vpow2.f32 %v4025_v2  ;;  %v4424_v17 = vpop.f32.mrb[14].mxu0  ;;  %v1114_v18 = vpop.f32.mrb[15].mxu1  ;;  %v3167_v21 = vadd.f32 1.0, %v4815_v14  ;;  %v2665_v22 = vadd.f32 %v5609_v52, %v2190_v9 }
 0x102   : > { %v4817_v20 = vpop.eup %4816  ;;  %4834 = vpow2.f32 %v4023_v4  ;;  %v2193_v23 = vadd.f32 %v4424_v17, %v4292_v11  ;;  %v2184_v24 = vpop.f32.mrb[15].mxu0  ;;  %v2663_v27 = vadd.f32 %v5609_v52, %v2182_v16  ;;  %4398 = vmatmul.mubr.msk.bf16.gmra.mrb[120].mxu1 %vm832_vm1, %v4798_v7 }
 0x103   : > { %v4819_v25 = vpop.eup %4818  ;;  %4836 = vrcp.f32 %v3169_v15  ;;  %v3170_v26 = vadd.f32 1.0, %v4817_v20  ;;  %v2185_v28 = vadd.f32 %v2184_v24, %v1114_v18  ;;  %v4028_v30 = vmul.f32 -1.442695, %v2665_v22  ;;  %4530 = vmatmul.mubr.msk.bf16.gmra.mrb[120].mxu0 %vm1906_vm2, %v4799_v12  ;;  %4401 = vmatprep.mubr.msk.bf16.mxu1 %vm832_vm1, %v4800_v13 }
 0x104   : > { %4838 = vrcp.f32 %v3167_v21  ;;  %v3168_v29 = vadd.f32 1.0, %v4819_v25  ;;  %v2666_v31 = vadd.f32 %v5609_v52, %v2193_v23  ;;  %v4821_v32 = vpop.eup %4820  ;;  %v4026_v33 = vmul.f32 -1.442695, %v2663_v27  ;;  %4533 = vmatprep.mubr.msk.bf16.mxu0 %vm1906_vm2, %v4801_v19 }
 0x105   : > { %4840 = vrcp.f32 %v3170_v26  ;;  %v2664_v34 = vadd.f32 %v5609_v52, %v2185_v28  ;;  %v4823_v35 = vpop.eup %4822  ;;  %3550 = vst.msk [vmem:[%s5656_s14 + $0x10] sm:$0xff] %vm3547_vm3, %v4821_v32  ;;  %v4295_v37 = vpop.f32.mrb[16].mxu1 }
 0x106   : > { %4842 = vrcp.f32 %v3168_v29  ;;  %v4029_v36 = vmul.f32 -1.442695, %v2666_v31  ;;  %3548 = vst.msk [vmem:[%s5656_s14] sm:$0xff] %vm3547_vm3, %v4823_v35  ;;  %v4427_v40 = vpop.f32.mrb[16].mxu0  ;;  %v1127_v41 = vpop.f32.mrb[17].mxu1 }
 0x107   : > { %v4825_v38 = vpop.eup %4824  ;;  %4844 = vpow2.f32 %v4028_v30  ;;  %v4027_v39 = vmul.f32 -1.442695, %v2664_v34  ;;  %v2206_v44 = vadd.f32 %v4427_v40, %v4295_v37  ;;  %v2197_v45 = vpop.f32.mrb[17].mxu0 }
 0x108   : > { %v4827_v43 = vpop.eup %4826  ;;  %3551 = vst.msk [vmem:[%s5656_s14 + $0x18] sm:$0xff] %vm3547_vm3, %v4825_v38  ;;  %4846 = vpow2.f32 %v4026_v33  ;;  %v4296_v46 = vpop.f32.mrb[18].mxu1  ;;  %v2198_v49 = vadd.f32 %v2197_v45, %v1127_v41 }
 0x109   : > { %v4829_v48 = vpop.eup %4828  ;;  %3549 = vst.msk [vmem:[%s5656_s14 + $0x8] sm:$0xff] %vm3547_vm3, %v4827_v43  ;;  %4848 = vpow2.f32 %v4029_v36  ;;  %v4428_v50 = vpop.f32.mrb[18].mxu0  ;;  %v2669_v55 = vadd.f32 %v5609_v52, %v2206_v44 }
 0x10a   : > { %v1130_v51 = vpop.f32.mrb[19].mxu1  ;;  %v4831_v53 = vpop.eup %4830  ;;  %v3173_v54 = vadd.f32 1.0, %v4829_v48  ;;  %4850 = vpow2.f32 %v4027_v39  ;;  %v2209_v56 = vadd.f32 %v4428_v50, %v4296_v46  ;;  %v2667_v60 = vadd.f32 %v5609_v52, %v2198_v49  ;;  %4402 = vmatmul.mubr.msk.bf16.gmra.mrb[124].mxu1 %vm832_vm1, %v4802_v42 }
 0x10b   : > { %v2200_v57 = vpop.f32.mrb[19].mxu0  ;;  %v4833_v58 = vpop.eup %4832  ;;  %v3171_v59 = vadd.f32 1.0, %v4831_v53  ;;  %v4032_v0 = vmul.f32 -1.442695, %v2669_v55  ;;  %4534 = vmatmul.mubr.msk.bf16.gmra.mrb[124].mxu0 %vm1906_vm2, %v4803_v47 }
 0x10c   : > { %v2201_v61 = vadd.f32 %v2200_v57, %v1130_v51  ;;  %v4835_v62 = vpop.eup %4834  ;;  %4852 = vrcp.f32 %v3173_v54  ;;  %v3174_v63 = vadd.f32 1.0, %v4833_v58  ;;  %v2670_v1 = vadd.f32 %v5609_v52, %v2209_v56 }
 0x10d   : > { %v4837_v2 = vpop.eup %4836  ;;  %4854 = vrcp.f32 %v3171_v59  ;;  %v3172_v3 = vadd.f32 1.0, %v4835_v62  ;;  %v4030_v4 = vmul.f32 -1.442695, %v2667_v60  ;;  %v4299_v8 = vpop.f32.mrb[20].mxu1 }
 0x10e   : > { %v2668_v5 = vadd.f32 %v5609_v52, %v2201_v61  ;;  %v4839_v6 = vpop.eup %4838  ;;  %3554 = vst.msk [vmem:[%s5656_s14 + $0x30] sm:$0xff] %vm3547_vm3, %v4837_v2  ;;  %4856 = vrcp.f32 %v3174_v63  ;;  %v4033_v7 = vmul.f32 -1.442695, %v2670_v1  ;;  %v4431_v11 = vpop.f32.mrb[20].mxu0 }
 0x10f   : > { %v4841_v9 = vpop.eup %4840  ;;  %3552 = vst.msk [vmem:[%s5656_s14 + $0x20] sm:$0xff] %vm3547_vm3, %v4839_v6  ;;  %4858 = vrcp.f32 %v3172_v3  ;;  %v1143_v12 = vpop.f32.mrb[21].mxu1  ;;  %v2222_v14 = vadd.f32 %v4431_v11, %v4299_v8 }
 0x110   : > { %v4031_v10 = vmul.f32 -1.442695, %v2668_v5  ;;  %v4843_v13 = vpop.eup %4842  ;;  %3555 = vst.msk [vmem:[%s5656_s14 + $0x38] sm:$0xff] %vm3547_vm3, %v4841_v9  ;;  %4860 = vpow2.f32 %v4032_v0  ;;  %v2213_v15 = vpop.f32.mrb[21].mxu0 }
 0x111   : > { %v4300_v16 = vpop.f32.mrb[22].mxu1  ;;  %v4845_v17 = vpop.eup %4844  ;;  %3553 = vst.msk [vmem:[%s5656_s14 + $0x28] sm:$0xff] %vm3547_vm3, %v4843_v13  ;;  %4862 = vpow2.f32 %v4030_v4  ;;  %v2214_v18 = vadd.f32 %v2213_v15, %v1143_v12  ;;  %v2673_v23 = vadd.f32 %v5609_v52, %v2222_v14 }
 0x112   : > { %v4432_v19 = vpop.f32.mrb[22].mxu0  ;;  %v1146_v20 = vpop.f32.mrb[23].mxu1  ;;  %v3177_v22 = vadd.f32 1.0, %v4845_v17  ;;  %4864 = vpow2.f32 %v4033_v7 }
 0x113   : > { %v4847_v21 = vpop.eup %4846  ;;  %v2225_v24 = vadd.f32 %v4432_v19, %v4300_v16  ;;  %v2216_v25 = vpop.f32.mrb[23].mxu0  ;;  %4866 = vpow2.f32 %v4031_v10  ;;  %v2671_v28 = vadd.f32 %v5609_v52, %v2214_v18  ;;  %v4036_v32 = vmul.f32 -1.442695, %v2673_v23 }
 0x114   : > { %v4849_v26 = vpop.eup %4848  ;;  %v3175_v27 = vadd.f32 1.0, %v4847_v21  ;;  %v2217_v29 = vadd.f32 %v2216_v25, %v1146_v20  ;;  %4868 = vrcp.f32 %v3177_v22 }
 0x115   : > { %v4851_v30 = vpop.eup %4850  ;;  %v3178_v31 = vadd.f32 1.0, %v4849_v26  ;;  %v2674_v33 = vadd.f32 %v5609_v52, %v2225_v24  ;;  %v4034_v35 = vmul.f32 -1.442695, %v2671_v28  ;;  %v4303_v39 = vpop.f32.mrb[24].mxu1 }
 0x116   : > { %4870 = vrcp.f32 %v3175_v27  ;;  %v3176_v34 = vadd.f32 1.0, %v4851_v30  ;;  %v2672_v36 = vadd.f32 %v5609_v52, %v2217_v29  ;;  %v4853_v37 = vpop.eup %4852  ;;  %v4435_v42 = vpop.f32.mrb[24].mxu0 }
 0x117   : > { %4872 = vrcp.f32 %v3178_v31  ;;  %v4037_v38 = vmul.f32 -1.442695, %v2674_v33  ;;  %v4855_v40 = vpop.eup %4854  ;;  %3558 = vst.msk [vmem:[%s5656_s14 + $0x50] sm:$0xff] %vm3547_vm3, %v4853_v37  ;;  %v1159_v43 = vpop.f32.mrb[25].mxu1  ;;  %v2238_v45 = vadd.f32 %v4435_v42, %v4303_v39 }
 0x118   : > { %4874 = vrcp.f32 %v3176_v34  ;;  %v4035_v41 = vmul.f32 -1.442695, %v2672_v36  ;;  %v4857_v44 = vpop.eup %4856  ;;  %3556 = vst.msk [vmem:[%s5656_s14 + $0x40] sm:$0xff] %vm3547_vm3, %v4855_v40  ;;  %v2229_v46 = vpop.f32.mrb[25].mxu0 }
 0x119   : > { %4876 = vpow2.f32 %v4036_v32  ;;  %v4304_v47 = vpop.f32.mrb[26].mxu1  ;;  %v4859_v48 = vpop.eup %4858  ;;  %3559 = vst.msk [vmem:[%s5656_s14 + $0x58] sm:$0xff] %vm3547_vm3, %v4857_v44  ;;  %v2230_v49 = vadd.f32 %v2229_v46, %v1159_v43  ;;  %v2677_v54 = vadd.f32 %v5609_v52, %v2238_v45 }
 0x11a   : > { %4878 = vpow2.f32 %v4034_v35  ;;  %v4436_v50 = vpop.f32.mrb[26].mxu0  ;;  %v1162_v51 = vpop.f32.mrb[27].mxu1  ;;  %3557 = vst.msk [vmem:[%s5656_s14 + $0x48] sm:$0xff] %vm3547_vm3, %v4859_v48 }
 0x11b   : > { %v4861_v53 = vpop.eup %4860  ;;  %4880 = vpow2.f32 %v4037_v38  ;;  %v2241_v55 = vadd.f32 %v4436_v50, %v4304_v47  ;;  %v2232_v56 = vpop.f32.mrb[27].mxu0  ;;  %v2675_v59 = vadd.f32 %v5609_v52, %v2230_v49  ;;  %v4040_v2 = vmul.f32 -1.442695, %v2677_v54 }
 0x11c   : > { %v4863_v57 = vpop.eup %4862  ;;  %v3181_v58 = vadd.f32 1.0, %v4861_v53  ;;  %4882 = vpow2.f32 %v4035_v41  ;;  %v2233_v60 = vadd.f32 %v2232_v56, %v1162_v51 }
 0x11d   : > { %v4865_v61 = vpop.eup %4864  ;;  %v3179_v62 = vadd.f32 1.0, %v4863_v57  ;;  %v2678_v63 = vadd.f32 %v5609_v52, %v2241_v55  ;;  %v4038_v6 = vmul.f32 -1.442695, %v2675_v59  ;;  %v4307_v7 = vpop.f32.mrb[28].mxu1 }
 0x11e   : > { %v4867_v0 = vpop.eup %4866  ;;  %4884 = vrcp.f32 %v3181_v58  ;;  %v3182_v1 = vadd.f32 1.0, %v4865_v61  ;;  %v2676_v3 = vadd.f32 %v5609_v52, %v2233_v60  ;;  %v4439_v10 = vpop.f32.mrb[28].mxu0 }
 0x11f   : > { %v4869_v4 = vpop.eup %4868  ;;  %4886 = vrcp.f32 %v3179_v62  ;;  %v3180_v5 = vadd.f32 1.0, %v4867_v0  ;;  %v4041_v9 = vmul.f32 -1.442695, %v2678_v63  ;;  %v1175_v11 = vpop.f32.mrb[29].mxu1  ;;  %v2254_v14 = vadd.f32 %v4439_v10, %v4307_v7 }
 0x120   : > { %v4871_v8 = vpop.eup %4870  ;;  %3562 = vst.msk [vmem:[%s5656_s14 + $0x70] sm:$0xff] %vm3547_vm3, %v4869_v4  ;;  %4888 = vrcp.f32 %v3182_v1  ;;  %v4039_v13 = vmul.f32 -1.442695, %v2676_v3  ;;  %v2245_v15 = vpop.f32.mrb[29].mxu0 }
 0x121   : > { %v4873_v12 = vpop.eup %4872  ;;  %3560 = vst.msk [vmem:[%s5656_s14 + $0x60] sm:$0xff] %vm3547_vm3, %v4871_v8  ;;  %4890 = vrcp.f32 %v3180_v5  ;;  %v4308_v16 = vpop.f32.mrb[30].mxu1  ;;  %v2246_v18 = vadd.f32 %v2245_v15, %v1175_v11  ;;  %v2681_v22 = vadd.f32 %v5609_v52, %v2254_v14 }
 0x122   : > { %v4875_v17 = vpop.eup %4874  ;;  %3563 = vst.msk [vmem:[%s5656_s14 + $0x78] sm:$0xff] %vm3547_vm3, %v4873_v12  ;;  %4892 = vpow2.f32 %v4040_v2  ;;  %v4440_v19 = vpop.f32.mrb[30].mxu0 }
 0x123   : > { %v1178_v20 = vpop.f32.mrb[31].mxu1  ;;  %v4877_v21 = vpop.eup %4876  ;;  %3561 = vst.msk [vmem:[%s5656_s14 + $0x68] sm:$0xff] %vm3547_vm3, %v4875_v17  ;;  %4894 = vpow2.f32 %v4038_v6  ;;  %v2257_v23 = vadd.f32 %v4440_v19, %v4308_v16  ;;  %v2679_v27 = vadd.f32 %v5609_v52, %v2246_v18  ;;  %v4044_v34 = vmul.f32 -1.442695, %v2681_v22 }
 0x124   : > { %v2248_v24 = vpop.f32.mrb[31].mxu0  ;;  %v4879_v25 = vpop.eup %4878  ;;  %v3185_v26 = vadd.f32 1.0, %v4877_v21  ;;  %4896 = vpow2.f32 %v4041_v9 }
 0x125   : > { %v2249_v28 = vadd.f32 %v2248_v24, %v1178_v20  ;;  %v4881_v29 = vpop.eup %4880  ;;  %v3183_v30 = vadd.f32 1.0, %v4879_v25  ;;  %4898 = vpow2.f32 %v4039_v13  ;;  %v2682_v31 = vadd.f32 %v5609_v52, %v2257_v23  ;;  %v4311_v38 = vpop.f32.mrb[32].mxu1 }
 0x126   : > { %v4883_v32 = vpop.eup %4882  ;;  %4900 = vrcp.f32 %v3185_v26  ;;  %v3186_v33 = vadd.f32 1.0, %v4881_v29  ;;  %v4042_v37 = vmul.f32 -1.442695, %v2679_v27  ;;  %v4443_v41 = vpop.f32.mrb[32].mxu0 }
 0x127   : > { %v2680_v35 = vadd.f32 %v5609_v52, %v2249_v28  ;;  %4902 = vrcp.f32 %v3183_v30  ;;  %v3184_v36 = vadd.f32 1.0, %v4883_v32  ;;  %v4045_v40 = vmul.f32 -1.442695, %v2682_v31  ;;  %v1191_v42 = vpop.f32.mrb[33].mxu1  ;;  %v2261_v46 = vpop.f32.mrb[33].mxu0 }
 0x128   : > { %v4885_v39 = vpop.eup %4884  ;;  %4904 = vrcp.f32 %v3186_v33  ;;  %v2270_v45 = vadd.f32 %v4443_v41, %v4311_v38  ;;  %v4312_v47 = vpop.f32.mrb[34].mxu1  ;;  %v2262_v49 = vadd.f32 %v2261_v46, %v1191_v42 }
 0x129   : > { %v4887_v43 = vpop.eup %4886  ;;  %3566 = vst.msk [vmem:[%s5656_s14 + $0x90] sm:$0xff] %vm3547_vm3, %v4885_v39  ;;  %4906 = vrcp.f32 %v3184_v36  ;;  %v4043_v44 = vmul.f32 -1.442695, %v2680_v35  ;;  %v4444_v50 = vpop.f32.mrb[34].mxu0 }
 0x12a   : > { %v4889_v48 = vpop.eup %4888  ;;  %3564 = vst.msk [vmem:[%s5656_s14 + $0x80] sm:$0xff] %vm3547_vm3, %v4887_v43  ;;  %4908 = vpow2.f32 %v4044_v34  ;;  %v1194_v51 = vpop.f32.mrb[35].mxu1  ;;  %v2685_v54 = vadd.f32 %v5609_v52, %v2270_v45  ;;  %v2273_v55 = vadd.f32 %v4444_v50, %v4312_v47  ;;  %v2683_v58 = vadd.f32 %v5609_v52, %v2262_v49 }
 0x12b   : > { %v4891_v53 = vpop.eup %4890  ;;  %3567 = vst.msk [vmem:[%s5656_s14 + $0x98] sm:$0xff] %vm3547_vm3, %v4889_v48  ;;  %4910 = vpow2.f32 %v4042_v37  ;;  %v2264_v56 = vpop.f32.mrb[35].mxu0 }
 0x12c   : > { %v4893_v57 = vpop.eup %4892  ;;  %3565 = vst.msk [vmem:[%s5656_s14 + $0x88] sm:$0xff] %vm3547_vm3, %v4891_v53  ;;  %4912 = vpow2.f32 %v4045_v40  ;;  %v2265_v59 = vadd.f32 %v2264_v56, %v1194_v51  ;;  %v2686_v62 = vadd.f32 %v5609_v52, %v2273_v55  ;;  %v4048_v4 = vmul.f32 -1.442695, %v2685_v54 }
 0x12d   : > { %v4895_v60 = vpop.eup %4894  ;;  %v3189_v61 = vadd.f32 1.0, %v4893_v57  ;;  %4914 = vpow2.f32 %v4043_v44  ;;  %v4315_v5 = vpop.f32.mrb[36].mxu1  ;;  %v4046_v8 = vmul.f32 -1.442695, %v2683_v58 }
 0x12e   : > { %v4897_v63 = vpop.eup %4896  ;;  %v3187_v0 = vadd.f32 1.0, %v4895_v60  ;;  %v2684_v1 = vadd.f32 %v5609_v52, %v2265_v59  ;;  %v4447_v9 = vpop.f32.mrb[36].mxu0  ;;  %v4049_v12 = vmul.f32 -1.442695, %v2686_v62 }
 0x12f   : > { %v4899_v2 = vpop.eup %4898  ;;  %4916 = vrcp.f32 %v3189_v61  ;;  %v3190_v3 = vadd.f32 1.0, %v4897_v63  ;;  %v1207_v10 = vpop.f32.mrb[37].mxu1  ;;  %v2286_v13 = vadd.f32 %v4447_v9, %v4315_v5 }
 0x130   : > { %v4901_v6 = vpop.eup %4900  ;;  %4918 = vrcp.f32 %v3187_v0  ;;  %v3188_v7 = vadd.f32 1.0, %v4899_v2  ;;  %v2277_v14 = vpop.f32.mrb[37].mxu0  ;;  %v4047_v17 = vmul.f32 -1.442695, %v2684_v1 }
 0x131   : > { %v4903_v11 = vpop.eup %4902  ;;  %3570 = vst.msk [vmem:[%s5656_s14 + $0xb0] sm:$0xff] %vm3547_vm3, %v4901_v6  ;;  %4920 = vrcp.f32 %v3190_v3  ;;  %v4316_v15 = vpop.f32.mrb[38].mxu1  ;;  %v2278_v18 = vadd.f32 %v2277_v14, %v1207_v10  ;;  %v2689_v22 = vadd.f32 %v5609_v52, %v2286_v13 }
 0x132   : > { %v4905_v16 = vpop.eup %4904  ;;  %3568 = vst.msk [vmem:[%s5656_s14 + $0xa0] sm:$0xff] %vm3547_vm3, %v4903_v11  ;;  %4922 = vrcp.f32 %v3188_v7  ;;  %v4448_v19 = vpop.f32.mrb[38].mxu0 }
 0x133   : > { %v1210_v20 = vpop.f32.mrb[39].mxu1  ;;  %v4907_v21 = vpop.eup %4906  ;;  %3571 = vst.msk [vmem:[%s5656_s14 + $0xb8] sm:$0xff] %vm3547_vm3, %v4905_v16  ;;  %4924 = vpow2.f32 %v4048_v4  ;;  %v2289_v23 = vadd.f32 %v4448_v19, %v4316_v15  ;;  %v2687_v26 = vadd.f32 %v5609_v52, %v2278_v18  ;;  %v4052_v36 = vmul.f32 -1.442695, %v2689_v22 }
 0x134   : > { %v2280_v24 = vpop.f32.mrb[39].mxu0  ;;  %v4909_v25 = vpop.eup %4908  ;;  %3569 = vst.msk [vmem:[%s5656_s14 + $0xa8] sm:$0xff] %vm3547_vm3, %v4907_v21  ;;  %4926 = vpow2.f32 %v4046_v8 }
 0x135   : > { %v2281_v27 = vadd.f32 %v2280_v24, %v1210_v20  ;;  %v4911_v28 = vpop.eup %4910  ;;  %v3193_v29 = vadd.f32 1.0, %v4909_v25  ;;  %4928 = vpow2.f32 %v4049_v12  ;;  %v2690_v30 = vadd.f32 %v5609_v52, %v2289_v23  ;;  %v4319_v37 = vpop.f32.mrb[40].mxu1 }
 0x136   : > { %v4913_v31 = vpop.eup %4912  ;;  %v3191_v32 = vadd.f32 1.0, %v4911_v28  ;;  %4930 = vpow2.f32 %v4047_v17  ;;  %v4050_v39 = vmul.f32 -1.442695, %v2687_v26  ;;  %v4451_v40 = vpop.f32.mrb[40].mxu0 }
 0x137   : > { %v2688_v33 = vadd.f32 %v5609_v52, %v2281_v27  ;;  %v4915_v34 = vpop.eup %4914  ;;  %4932 = vrcp.f32 %v3193_v29  ;;  %v3194_v35 = vadd.f32 1.0, %v4913_v31  ;;  %v1223_v41 = vpop.f32.mrb[41].mxu1  ;;  %v4053_v43 = vmul.f32 -1.442695, %v2690_v30 }
 0x138   : > { %4934 = vrcp.f32 %v3191_v32  ;;  %v3192_v38 = vadd.f32 1.0, %v4915_v34  ;;  %v2302_v44 = vadd.f32 %v4451_v40, %v4319_v37  ;;  %v2293_v45 = vpop.f32.mrb[41].mxu0  ;;  %v4320_v46 = vpop.f32.mrb[42].mxu1 }
 0x139   : > { %v4917_v42 = vpop.eup %4916  ;;  %4936 = vrcp.f32 %v3194_v35  ;;  %v4051_v48 = vmul.f32 -1.442695, %v2688_v33  ;;  %v2294_v49 = vadd.f32 %v2293_v45, %v1223_v41  ;;  %v4452_v50 = vpop.f32.mrb[42].mxu0 }
 0x13a   : > { %v4919_v47 = vpop.eup %4918  ;;  %3574 = vst.msk [vmem:[%s5656_s14 + $0xd0] sm:$0xff] %vm3547_vm3, %v4917_v42  ;;  %4938 = vrcp.f32 %v3192_v38  ;;  %v1226_v51 = vpop.f32.mrb[43].mxu1  ;;  %v2693_v54 = vadd.f32 %v5609_v52, %v2302_v44  ;;  %v2305_v55 = vadd.f32 %v4452_v50, %v4320_v46 }
 0x13b   : > { %v4921_v53 = vpop.eup %4920  ;;  %3572 = vst.msk [vmem:[%s5656_s14 + $0xc0] sm:$0xff] %vm3547_vm3, %v4919_v47  ;;  %4940 = vpow2.f32 %v4052_v36  ;;  %v2296_v56 = vpop.f32.mrb[43].mxu0  ;;  %v2691_v58 = vadd.f32 %v5609_v52, %v2294_v49 }
 0x13c   : > { %v4923_v57 = vpop.eup %4922  ;;  %3575 = vst.msk [vmem:[%s5656_s14 + $0xd8] sm:$0xff] %vm3547_vm3, %v4921_v53  ;;  %4942 = vpow2.f32 %v4050_v39  ;;  %v2297_v59 = vadd.f32 %v2296_v56, %v1226_v51  ;;  %v4056_v61 = vmul.f32 -1.442695, %v2693_v54  ;;  %v2694_v62 = vadd.f32 %v5609_v52, %v2305_v55  ;;  %v5770_v55 = vld [vmem:[%s6054_s4] ss:$0 sm:$0xff] }
 0x13d   : > { %v4925_v60 = vpop.eup %4924  ;;  %3573 = vst.msk [vmem:[%s5656_s14 + $0xc8] sm:$0xff] %vm3547_vm3, %v4923_v57  ;;  %4944 = vpow2.f32 %v4053_v43  ;;  %v4323_v4 = vpop.f32.mrb[44].mxu1  ;;  %v4054_v7 = vmul.f32 -1.442695, %v2691_v58 }
 0x13e   : > { %v4927_v63 = vpop.eup %4926  ;;  %v3197_v0 = vadd.f32 1.0, %v4925_v60  ;;  %4946 = vpow2.f32 %v4051_v48  ;;  %v2692_v1 = vadd.f32 %v5609_v52, %v2297_v59  ;;  %v4455_v8 = vpop.f32.mrb[44].mxu0  ;;  %v4057_v12 = vmul.f32 -1.442695, %v2694_v62 }
 0x13f   : > { %v4929_v2 = vpop.eup %4928  ;;  %v3195_v3 = vadd.f32 1.0, %v4927_v63  ;;  %4948 = vpow2.f32 %v4056_v61  ;;  %v1239_v9 = vpop.f32.mrb[45].mxu1  ;;  %v2318_v13 = vadd.f32 %v4455_v8, %v4323_v4 }
 0x140   : > { %v4931_v5 = vpop.eup %4930  ;;  %4950 = vrcp.f32 %v3197_v0  ;;  %v3198_v6 = vadd.f32 1.0, %v4929_v2  ;;  %v2309_v14 = vpop.f32.mrb[45].mxu0  ;;  %v4055_v17 = vmul.f32 -1.442695, %v2692_v1 }
 0x141   : > { %v4933_v10 = vpop.eup %4932  ;;  %4952 = vrcp.f32 %v3195_v3  ;;  %v3196_v11 = vadd.f32 1.0, %v4931_v5  ;;  %v4324_v15 = vpop.f32.mrb[46].mxu1  ;;  %v2310_v18 = vadd.f32 %v2309_v14, %v1239_v9  ;;  %v2697_v22 = vadd.f32 %v5609_v52, %v2318_v13 }
 0x142   : > { %v4935_v16 = vpop.eup %4934  ;;  %3578 = vst.msk [vmem:[%s5656_s14 + $0xf0] sm:$0xff] %vm3547_vm3, %v4933_v10  ;;  %4954 = vrcp.f32 %v3198_v6  ;;  %v4456_v19 = vpop.f32.mrb[46].mxu0 }
 0x143   : > { %v1242_v20 = vpop.f32.mrb[47].mxu1  ;;  %v4937_v21 = vpop.eup %4936  ;;  %3576 = vst.msk [vmem:[%s5656_s14 + $0xe0] sm:$0xff] %vm3547_vm3, %v4935_v16  ;;  %4956 = vrcp.f32 %v3196_v11  ;;  %v2321_v23 = vadd.f32 %v4456_v19, %v4324_v15  ;;  %v4060_v28 = vmul.f32 -1.442695, %v2697_v22  ;;  %v2695_v29 = vadd.f32 %v5609_v52, %v2310_v18 }
 0x144   : > { %v2312_v24 = vpop.f32.mrb[47].mxu0  ;;  %v4939_v25 = vpop.eup %4938  ;;  %3579 = vst.msk [vmem:[%s5656_s14 + $0xf8] sm:$0xff] %vm3547_vm3, %v4937_v21  ;;  %4958 = vpow2.f32 %v4054_v7 }
 0x145   : > { %v2313_v26 = vadd.f32 %v2312_v24, %v1242_v20  ;;  %v4941_v27 = vpop.eup %4940  ;;  %3577 = vst.msk [vmem:[%s5656_s14 + $0xe8] sm:$0xff] %vm3547_vm3, %v4939_v25  ;;  %4960 = vpow2.f32 %v4057_v12  ;;  %v2698_v32 = vadd.f32 %v5609_v52, %v2321_v23  ;;  %v4327_v36 = vpop.f32.mrb[48].mxu1  ;;  %v4058_v43 = vmul.f32 -1.442695, %v2695_v29 }
 0x146   : > { %v4943_v30 = vpop.eup %4942  ;;  %v3201_v31 = vadd.f32 1.0, %v4941_v27  ;;  %4962 = vpow2.f32 %v4055_v17  ;;  %v4459_v39 = vpop.f32.mrb[48].mxu0 }
 0x147   : > { %v4945_v33 = vpop.eup %4944  ;;  %v3199_v34 = vadd.f32 1.0, %v4943_v30  ;;  %4964 = vpow2.f32 %v4060_v28  ;;  %v2696_v35 = vadd.f32 %v5609_v52, %v2313_v26  ;;  %v1255_v40 = vpop.f32.mrb[49].mxu1  ;;  %v2334_v44 = vadd.f32 %v4459_v39, %v4327_v36 }
 0x148   : > { %v4947_v37 = vpop.eup %4946  ;;  %4966 = vrcp.f32 %v3201_v31  ;;  %v3202_v38 = vadd.f32 1.0, %v4945_v33  ;;  %v2325_v45 = vpop.f32.mrb[49].mxu0  ;;  %v4061_v49 = vmul.f32 -1.442695, %v2698_v32 }
 0x149   : > { %v4949_v41 = vpop.eup %4948  ;;  %4968 = vrcp.f32 %v3199_v34  ;;  %v3200_v42 = vadd.f32 1.0, %v4947_v37  ;;  %v4328_v46 = vpop.f32.mrb[50].mxu1  ;;  %v2326_v52 = vadd.f32 %v2325_v45, %v1255_v40  ;;  %v4059_v54 = vmul.f32 -1.442695, %v2696_v35 }
 0x14a   : > { %v4951_v47 = vpop.eup %4950  ;;  %4970 = vrcp.f32 %v3202_v38  ;;  %v3205_v48 = vadd.f32 1.0, %v4949_v41  ;;  %v4460_v50 = vpop.f32.mrb[50].mxu0  ;;  %v2701_v56 = vadd.f32 %v5770_v55, %v2334_v44 }
 0x14b   : > { %v1258_v51 = vpop.f32.mrb[51].mxu1  ;;  %v4953_v53 = vpop.eup %4952  ;;  %3582 = vst.msk [vmem:[%s5656_s14 + $0x110] sm:$0xff] %vm3547_vm3, %v4951_v47  ;;  %4972 = vrcp.f32 %v3200_v42  ;;  %v2337_v57 = vadd.f32 %v4460_v50, %v4328_v46  ;;  %v2699_v63 = vadd.f32 %v5770_v55, %v2326_v52 }
 0x14c   : > { %v2328_v58 = vpop.f32.mrb[51].mxu0  ;;  %v4955_v59 = vpop.eup %4954  ;;  %3580 = vst.msk [vmem:[%s5656_s14 + $0x100] sm:$0xff] %vm3547_vm3, %v4953_v53  ;;  %4974 = vrcp.f32 %v3205_v48  ;;  %v4064_v62 = vmul.f32 -1.442695, %v2701_v56 }
 0x14d   : > { %v2329_v60 = vadd.f32 %v2328_v58, %v1258_v51  ;;  %v4957_v61 = vpop.eup %4956  ;;  %3583 = vst.msk [vmem:[%s5656_s14 + $0x118] sm:$0xff] %vm3547_vm3, %v4955_v59  ;;  %4976 = vpow2.f32 %v4058_v43  ;;  %v2702_v1 = vadd.f32 %v5770_v55, %v2337_v57  ;;  %v4331_v5 = vpop.f32.mrb[52].mxu1  ;;  %v4062_v12 = vmul.f32 -1.442695, %v2699_v63 }
 0x14e   : > { %v4959_v0 = vpop.eup %4958  ;;  %3581 = vst.msk [vmem:[%s5656_s14 + $0x108] sm:$0xff] %vm3547_vm3, %v4957_v61  ;;  %4978 = vpow2.f32 %v4061_v49  ;;  %v4463_v8 = vpop.f32.mrb[52].mxu0 }
 0x14f   : > { %v4961_v2 = vpop.eup %4960  ;;  %v3203_v3 = vadd.f32 1.0, %v4959_v0  ;;  %4980 = vpow2.f32 %v4059_v54  ;;  %v2700_v4 = vadd.f32 %v5770_v55, %v2329_v60  ;;  %v1271_v9 = vpop.f32.mrb[53].mxu1  ;;  %v2350_v13 = vadd.f32 %v4463_v8, %v4331_v5 }
 0x150   : > { %v4963_v6 = vpop.eup %4962  ;;  %v3206_v7 = vadd.f32 1.0, %v4961_v2  ;;  %4982 = vpow2.f32 %v4064_v62  ;;  %v2341_v14 = vpop.f32.mrb[53].mxu0  ;;  %v4065_v18 = vmul.f32 -1.442695, %v2702_v1 }
 0x151   : > { %v4965_v10 = vpop.eup %4964  ;;  %4984 = vrcp.f32 %v3203_v3  ;;  %v3204_v11 = vadd.f32 1.0, %v4963_v6  ;;  %v4332_v15 = vpop.f32.mrb[54].mxu1  ;;  %v2342_v19 = vadd.f32 %v2341_v14, %v1271_v9  ;;  %v4063_v23 = vmul.f32 -1.442695, %v2700_v4 }
 0x152   : > { %v4967_v16 = vpop.eup %4966  ;;  %4986 = vrcp.f32 %v3206_v7  ;;  %v3209_v17 = vadd.f32 1.0, %v4965_v10  ;;  %v4464_v20 = vpop.f32.mrb[54].mxu0  ;;  %v2705_v24 = vadd.f32 %v5770_v55, %v2350_v13 }
 0x153   : > { %v1274_v21 = vpop.f32.mrb[55].mxu1  ;;  %v4969_v22 = vpop.eup %4968  ;;  %3586 = vst.msk [vmem:[%s5656_s14 + $0x130] sm:$0xff] %vm3547_vm3, %v4967_v16  ;;  %4988 = vrcp.f32 %v3204_v11  ;;  %v2353_v25 = vadd.f32 %v4464_v20, %v4332_v15  ;;  %v2703_v28 = vadd.f32 %v5770_v55, %v2342_v19 }
 0x154   : > { %v2344_v26 = vpop.f32.mrb[55].mxu0  ;;  %v4971_v27 = vpop.eup %4970  ;;  %3584 = vst.msk [vmem:[%s5656_s14 + $0x120] sm:$0xff] %vm3547_vm3, %v4969_v22  ;;  %4990 = vrcp.f32 %v3209_v17  ;;  %v4068_v31 = vmul.f32 -1.442695, %v2705_v24 }
 0x155   : > { %v2345_v29 = vadd.f32 %v2344_v26, %v1274_v21  ;;  %v4973_v30 = vpop.eup %4972  ;;  %3587 = vst.msk [vmem:[%s5656_s14 + $0x138] sm:$0xff] %vm3547_vm3, %v4971_v27  ;;  %4992 = vpow2.f32 %v4062_v12  ;;  %v2706_v32 = vadd.f32 %v5770_v55, %v2353_v25  ;;  %v4066_v34 = vmul.f32 -1.442695, %v2703_v28  ;;  %v4335_v37 = vpop.f32.mrb[56].mxu1 }
 0x156   : > { %v4975_v33 = vpop.eup %4974  ;;  %3585 = vst.msk [vmem:[%s5656_s14 + $0x128] sm:$0xff] %vm3547_vm3, %v4973_v30  ;;  %4994 = vpow2.f32 %v4065_v18  ;;  %v4467_v40 = vpop.f32.mrb[56].mxu0 }
 0x157   : > { %v2704_v35 = vadd.f32 %v5770_v55, %v2345_v29  ;;  %v4977_v36 = vpop.eup %4976  ;;  %3590 = vst.msk [vmem:[%s5656_s14 + $0x150] sm:$0xff] %vm3547_vm3, %v4975_v33  ;;  %4996 = vpow2.f32 %v4063_v23  ;;  %v1287_v41 = vpop.f32.mrb[57].mxu1  ;;  %v4069_v44 = vmul.f32 -1.442695, %v2706_v32  ;;  %v2366_v45 = vadd.f32 %v4467_v40, %v4335_v37 }
 0x158   : > { %v4979_v38 = vpop.eup %4978  ;;  %v3207_v39 = vadd.f32 1.0, %v4977_v36  ;;  %4998 = vpow2.f32 %v4068_v31  ;;  %v2357_v46 = vpop.f32.mrb[57].mxu0 }
 0x159   : > { %v4981_v42 = vpop.eup %4980  ;;  %v3210_v43 = vadd.f32 1.0, %v4979_v38  ;;  %5000 = vpow2.f32 %v4066_v34  ;;  %v4336_v47 = vpop.f32.mrb[58].mxu1  ;;  %v4067_v52 = vmul.f32 -1.442695, %v2704_v35  ;;  %v2358_v50 = vadd.f32 %v2357_v46, %v1287_v41 }
 0x15a   : > { %v4983_v48 = vpop.eup %4982  ;;  %5002 = vrcp.f32 %v3207_v39  ;;  %v3208_v49 = vadd.f32 1.0, %v4981_v42  ;;  %v4468_v51 = vpop.f32.mrb[58].mxu0  ;;  %v2709_v57 = vadd.f32 %v5770_v55, %v2366_v45 }
 0x15b   : > { %v1290_v53 = vpop.f32.mrb[59].mxu1  ;;  %v4985_v54 = vpop.eup %4984  ;;  %5004 = vrcp.f32 %v3210_v43  ;;  %v3213_v56 = vadd.f32 1.0, %v4983_v48  ;;  %v2369_v58 = vadd.f32 %v4468_v51, %v4336_v47  ;;  %v2707_v61 = vadd.f32 %v5770_v55, %v2358_v50 }
 0x15c   : > { %v2360_v59 = vpop.f32.mrb[59].mxu0  ;;  %v4987_v60 = vpop.eup %4986  ;;  %3588 = vst.msk [vmem:[%s5656_s14 + $0x140] sm:$0xff] %vm3547_vm3, %v4985_v54  ;;  %5006 = vrcp.f32 %v3208_v49  ;;  %v4072_v0 = vmul.f32 -1.442695, %v2709_v57 }
 0x15d   : > { %v2361_v62 = vadd.f32 %v2360_v59, %v1290_v53  ;;  %v4989_v63 = vpop.eup %4988  ;;  %3591 = vst.msk [vmem:[%s5656_s14 + $0x158] sm:$0xff] %vm3547_vm3, %v4987_v60  ;;  %5008 = vrcp.f32 %v3213_v56  ;;  %v2710_v1 = vadd.f32 %v5770_v55, %v2369_v58  ;;  %v4070_v3 = vmul.f32 -1.442695, %v2707_v61  ;;  %v4339_v6 = vpop.f32.mrb[60].mxu1 }
 0x15e   : > { %v4991_v2 = vpop.eup %4990  ;;  %3589 = vst.msk [vmem:[%s5656_s14 + $0x148] sm:$0xff] %vm3547_vm3, %v4989_v63  ;;  %5010 = vpow2.f32 %v4069_v44  ;;  %v4471_v9 = vpop.f32.mrb[60].mxu0 }
 0x15f   : > { %v2708_v4 = vadd.f32 %v5770_v55, %v2361_v62  ;;  %v4993_v5 = vpop.eup %4992  ;;  %3594 = vst.msk [vmem:[%s5656_s14 + $0x170] sm:$0xff] %vm3547_vm3, %v4991_v2  ;;  %5012 = vpow2.f32 %v4067_v52  ;;  %v1303_v10 = vpop.f32.mrb[61].mxu1  ;;  %v4073_v13 = vmul.f32 -1.442695, %v2710_v1  ;;  %v2382_v14 = vadd.f32 %v4471_v9, %v4339_v6 }
 0x160   : > { %v4995_v7 = vpop.eup %4994  ;;  %v3211_v8 = vadd.f32 1.0, %v4993_v5  ;;  %5014 = vpow2.f32 %v4072_v0  ;;  %v2373_v15 = vpop.f32.mrb[61].mxu0 }
 0x161   : > { %v4997_v11 = vpop.eup %4996  ;;  %v3214_v12 = vadd.f32 1.0, %v4995_v7  ;;  %5016 = vpow2.f32 %v4070_v3  ;;  %v4340_v16 = vpop.f32.mrb[62].mxu1  ;;  %v4071_v19 = vmul.f32 -1.442695, %v2708_v4  ;;  %v2374_v20 = vadd.f32 %v2373_v15, %v1303_v10 }
 0x162   : > { %v4999_v17 = vpop.eup %4998  ;;  %5018 = vrcp.f32 %v3211_v8  ;;  %v3212_v18 = vadd.f32 1.0, %v4997_v11  ;;  %v4472_v21 = vpop.f32.mrb[62].mxu0  ;;  %v2713_v25 = vadd.f32 %v5770_v55, %v2382_v14 }
 0x163   : > { %v1306_v22 = vpop.f32.mrb[63].mxu1  ;;  %v5001_v23 = vpop.eup %5000  ;;  %5020 = vrcp.f32 %v3214_v12  ;;  %v3217_v24 = vadd.f32 1.0, %v4999_v17  ;;  %v2385_v26 = vadd.f32 %v4472_v21, %v4340_v16  ;;  %v2711_v30 = vadd.f32 %v5770_v55, %v2374_v20 }
 0x164   : > { %v2376_v27 = vpop.f32.mrb[63].mxu0  ;;  %v5003_v28 = vpop.eup %5002  ;;  %5022 = vrcp.f32 %v3212_v18  ;;  %v3215_v29 = vadd.f32 1.0, %v5001_v23  ;;  %v4076_v33 = vmul.f32 -1.442695, %v2713_v25 }
 0x165   : > { %v2377_v31 = vadd.f32 %v2376_v27, %v1306_v22  ;;  %v5005_v32 = vpop.eup %5004  ;;  %3592 = vst.msk [vmem:[%s5656_s14 + $0x160] sm:$0xff] %vm3547_vm3, %v5003_v28  ;;  %5024 = vrcp.f32 %v3217_v24  ;;  %v2714_v34 = vadd.f32 %v5770_v55, %v2385_v26  ;;  %v4074_v36 = vmul.f32 -1.442695, %v2711_v30  ;;  %v4343_v39 = vpop.f32.mrb[64].mxu1 }
 0x166   : > { %v5007_v35 = vpop.eup %5006  ;;  %3595 = vst.msk [vmem:[%s5656_s14 + $0x178] sm:$0xff] %vm3547_vm3, %v5005_v32  ;;  %5026 = vrcp.f32 %v3215_v29  ;;  %v4475_v41 = vpop.f32.mrb[64].mxu0 }
 0x167   : > { %v2712_v37 = vadd.f32 %v5770_v55, %v2377_v31  ;;  %v5009_v38 = vpop.eup %5008  ;;  %3593 = vst.msk [vmem:[%s5656_s14 + $0x168] sm:$0xff] %vm3547_vm3, %v5007_v35  ;;  %5028 = vpow2.f32 %v4073_v13  ;;  %v1319_v42 = vpop.f32.mrb[65].mxu1  ;;  %v4077_v45 = vmul.f32 -1.442695, %v2714_v34  ;;  %v2398_v46 = vadd.f32 %v4475_v41, %v4343_v39 }
 0x168   : > { %v5011_v40 = vpop.eup %5010  ;;  %3598 = vst.msk [vmem:[%s5656_s14 + $0x190] sm:$0xff] %vm3547_vm3, %v5009_v38  ;;  %5030 = vpow2.f32 %v4071_v19  ;;  %v2389_v47 = vpop.f32.mrb[65].mxu0 }
 0x169   : > { %v5013_v43 = vpop.eup %5012  ;;  %v3218_v44 = vadd.f32 1.0, %v5011_v40  ;;  %5032 = vpow2.f32 %v4076_v33  ;;  %v4344_v48 = vpop.f32.mrb[66].mxu1  ;;  %v4075_v50 = vmul.f32 -1.442695, %v2712_v37  ;;  %v2390_v51 = vadd.f32 %v2389_v47, %v1319_v42 }
 0x16a   : > { %v5015_v49 = vpop.eup %5014  ;;  %v3216_v52 = vadd.f32 1.0, %v5013_v43  ;;  %5034 = vpow2.f32 %v4074_v36  ;;  %v4476_v53 = vpop.f32.mrb[66].mxu0  ;;  %v2717_v58 = vadd.f32 %v5770_v55, %v2398_v46 }
 0x16b   : > { %v1322_v54 = vpop.f32.mrb[67].mxu1  ;;  %v5017_v56 = vpop.eup %5016  ;;  %5036 = vrcp.f32 %v3218_v44  ;;  %v3221_v57 = vadd.f32 1.0, %v5015_v49  ;;  %v2401_v59 = vadd.f32 %v4476_v53, %v4344_v48  ;;  %v2715_v63 = vadd.f32 %v5770_v55, %v2390_v51 }
 0x16c   : > { %v2392_v60 = vpop.f32.mrb[67].mxu0  ;;  %v5019_v61 = vpop.eup %5018  ;;  %5038 = vrcp.f32 %v3216_v52  ;;  %v3219_v62 = vadd.f32 1.0, %v5017_v56  ;;  %v4080_v2 = vmul.f32 -1.442695, %v2717_v58 }
 0x16d   : > { %v2393_v0 = vadd.f32 %v2392_v60, %v1322_v54  ;;  %v5021_v1 = vpop.eup %5020  ;;  %3596 = vst.msk [vmem:[%s5656_s14 + $0x180] sm:$0xff] %vm3547_vm3, %v5019_v61  ;;  %5040 = vrcp.f32 %v3221_v57  ;;  %v2718_v3 = vadd.f32 %v5770_v55, %v2401_v59  ;;  %v4078_v5 = vmul.f32 -1.442695, %v2715_v63  ;;  %v4347_v9 = vpop.f32.mrb[68].mxu1 }
 0x16e   : > { %v5023_v4 = vpop.eup %5022  ;;  %3599 = vst.msk [vmem:[%s5656_s14 + $0x198] sm:$0xff] %vm3547_vm3, %v5021_v1  ;;  %5042 = vrcp.f32 %v3219_v62  ;;  %v4479_v11 = vpop.f32.mrb[68].mxu0 }
 0x16f   : > { %v2716_v6 = vadd.f32 %v5770_v55, %v2393_v0  ;;  %v5025_v7 = vpop.eup %5024  ;;  %3597 = vst.msk [vmem:[%s5656_s14 + $0x188] sm:$0xff] %vm3547_vm3, %v5023_v4  ;;  %5044 = vpow2.f32 %v4077_v45  ;;  %v4081_v8 = vmul.f32 -1.442695, %v2718_v3  ;;  %v1335_v12 = vpop.f32.mrb[69].mxu1  ;;  %v2414_v14 = vadd.f32 %v4479_v11, %v4347_v9 }
 0x170   : > { %v5027_v10 = vpop.eup %5026  ;;  %3602 = vst.msk [vmem:[%s5656_s14 + $0x1b0] sm:$0xff] %vm3547_vm3, %v5025_v7  ;;  %5046 = vpow2.f32 %v4075_v50  ;;  %v2405_v15 = vpop.f32.mrb[69].mxu0 }
 0x171   : > { %v5029_v13 = vpop.eup %5028  ;;  %3600 = vst.msk [vmem:[%s5656_s14 + $0x1a0] sm:$0xff] %vm3547_vm3, %v5027_v10  ;;  %5048 = vpow2.f32 %v4080_v2  ;;  %v4348_v16 = vpop.f32.mrb[70].mxu1  ;;  %v4079_v19 = vmul.f32 -1.442695, %v2716_v6  ;;  %v2406_v20 = vadd.f32 %v2405_v15, %v1335_v12  ;;  %v2721_v25 = vadd.f32 %v5770_v55, %v2414_v14 }
 0x172   : > { %v5031_v17 = vpop.eup %5030  ;;  %v3222_v18 = vadd.f32 1.0, %v5029_v13  ;;  %5050 = vpow2.f32 %v4078_v5  ;;  %v4480_v21 = vpop.f32.mrb[70].mxu0 }
 0x173   : > { %v1338_v22 = vpop.f32.mrb[71].mxu1  ;;  %v5033_v23 = vpop.eup %5032  ;;  %v3220_v24 = vadd.f32 1.0, %v5031_v17  ;;  %5052 = vpow2.f32 %v4081_v8  ;;  %v2417_v26 = vadd.f32 %v4480_v21, %v4348_v16  ;;  %v2719_v30 = vadd.f32 %v5770_v55, %v2406_v20 }
 0x174   : > { %v2408_v27 = vpop.f32.mrb[71].mxu0  ;;  %v5035_v28 = vpop.eup %5034  ;;  %5054 = vrcp.f32 %v3222_v18  ;;  %v3225_v29 = vadd.f32 1.0, %v5033_v23  ;;  %v4084_v34 = vmul.f32 -1.442695, %v2721_v25 }
 0x175   : > { %v2409_v31 = vadd.f32 %v2408_v27, %v1338_v22  ;;  %v5037_v32 = vpop.eup %5036  ;;  %5056 = vrcp.f32 %v3220_v24  ;;  %v3223_v33 = vadd.f32 1.0, %v5035_v28  ;;  %v2722_v35 = vadd.f32 %v5770_v55, %v2417_v26  ;;  %v4351_v40 = vpop.f32.mrb[72].mxu1 }
 0x176   : > { %v5039_v36 = vpop.eup %5038  ;;  %3603 = vst.msk [vmem:[%s5656_s14 + $0x1b8] sm:$0xff] %vm3547_vm3, %v5037_v32  ;;  %5058 = vrcp.f32 %v3225_v29  ;;  %v4082_v37 = vmul.f32 -1.442695, %v2719_v30  ;;  %v4483_v42 = vpop.f32.mrb[72].mxu0 }
 0x177   : > { %v5041_v38 = vpop.eup %5040  ;;  %3601 = vst.msk [vmem:[%s5656_s14 + $0x1a8] sm:$0xff] %vm3547_vm3, %v5039_v36  ;;  %5060 = vrcp.f32 %v3223_v33  ;;  %v4085_v39 = vmul.f32 -1.442695, %v2722_v35  ;;  %v1351_v43 = vpop.f32.mrb[73].mxu1  ;;  %v2720_v45 = vadd.f32 %v5770_v55, %v2409_v31  ;;  %v2430_v46 = vadd.f32 %v4483_v42, %v4351_v40 }
 0x178   : > { %v5043_v41 = vpop.eup %5042  ;;  %3606 = vst.msk [vmem:[%s5656_s14 + $0x1d0] sm:$0xff] %vm3547_vm3, %v5041_v38  ;;  %5062 = vpow2.f32 %v4079_v19  ;;  %v2421_v47 = vpop.f32.mrb[73].mxu0 }
 0x179   : > { %v5045_v44 = vpop.eup %5044  ;;  %3604 = vst.msk [vmem:[%s5656_s14 + $0x1c0] sm:$0xff] %vm3547_vm3, %v5043_v41  ;;  %5064 = vpow2.f32 %v4084_v34  ;;  %v4352_v48 = vpop.f32.mrb[74].mxu1  ;;  %v2422_v50 = vadd.f32 %v2421_v47, %v1351_v43  ;;  %v2725_v57 = vadd.f32 %v5770_v55, %v2430_v46  ;;  %v4083_v2 = vmul.f32 -1.442695, %v2720_v45 }
 0x17a   : > { %v5047_v49 = vpop.eup %5046  ;;  %v3226_v52 = vadd.f32 1.0, %v5045_v44  ;;  %5066 = vpow2.f32 %v4082_v37  ;;  %v4484_v51 = vpop.f32.mrb[74].mxu0 }
 0x17b   : > { %v1354_v53 = vpop.f32.mrb[75].mxu1  ;;  %v5049_v54 = vpop.eup %5048  ;;  %v3224_v56 = vadd.f32 1.0, %v5047_v49  ;;  %5068 = vpow2.f32 %v4085_v39  ;;  %v2433_v58 = vadd.f32 %v4484_v51, %v4352_v48  ;;  %v2723_v62 = vadd.f32 %v5770_v55, %v2422_v50 }
 0x17c   : > { %v2424_v59 = vpop.f32.mrb[75].mxu0  ;;  %v5051_v60 = vpop.eup %5050  ;;  %5070 = vrcp.f32 %v3226_v52  ;;  %v3229_v61 = vadd.f32 1.0, %v5049_v54  ;;  %v4088_v6 = vmul.f32 -1.442695, %v2725_v57 }
 0x17d   : > { %v2425_v63 = vadd.f32 %v2424_v59, %v1354_v53  ;;  %v5053_v0 = vpop.eup %5052  ;;  %5072 = vrcp.f32 %v3224_v56  ;;  %v3227_v1 = vadd.f32 1.0, %v5051_v60  ;;  %v2726_v3 = vadd.f32 %v5770_v55, %v2433_v58  ;;  %v4355_v9 = vpop.f32.mrb[76].mxu1 }
 0x17e   : > { %v5055_v4 = vpop.eup %5054  ;;  %5074 = vrcp.f32 %v3229_v61  ;;  %v3230_v5 = vadd.f32 1.0, %v5053_v0  ;;  %v4086_v8 = vmul.f32 -1.442695, %v2723_v62  ;;  %v4487_v12 = vpop.f32.mrb[76].mxu0 }
 0x17f   : > { %v5057_v7 = vpop.eup %5056  ;;  %3607 = vst.msk [vmem:[%s5656_s14 + $0x1d8] sm:$0xff] %vm3547_vm3, %v5055_v4  ;;  %5076 = vrcp.f32 %v3227_v1  ;;  %v4089_v11 = vmul.f32 -1.442695, %v2726_v3  ;;  %v1367_v13 = vpop.f32.mrb[77].mxu1  ;;  %v2724_v15 = vadd.f32 %v5770_v55, %v2425_v63  ;;  %v2446_v16 = vadd.f32 %v4487_v12, %v4355_v9 }
 0x180   : > { %v5059_v10 = vpop.eup %5058  ;;  %3605 = vst.msk [vmem:[%s5656_s14 + $0x1c8] sm:$0xff] %vm3547_vm3, %v5057_v7  ;;  %5078 = vrcp.f32 %v3230_v5  ;;  %v2437_v17 = vpop.f32.mrb[77].mxu0 }
 0x181   : > { %v5061_v14 = vpop.eup %5060  ;;  %3610 = vst.msk [vmem:[%s5656_s14 + $0x1f0] sm:$0xff] %vm3547_vm3, %v5059_v10  ;;  %5080 = vpow2.f32 %v4083_v2  ;;  %v4356_v18 = vpop.f32.mrb[78].mxu1  ;;  %v2438_v20 = vadd.f32 %v2437_v17, %v1367_v13  ;;  %v2729_v25 = vadd.f32 %v5770_v55, %v2446_v16  ;;  %v4087_v34 = vmul.f32 -1.442695, %v2724_v15 }
 0x182   : > { %v5063_v19 = vpop.eup %5062  ;;  %3608 = vst.msk [vmem:[%s5656_s14 + $0x1e0] sm:$0xff] %vm3547_vm3, %v5061_v14  ;;  %5082 = vpow2.f32 %v4088_v6  ;;  %v4488_v21 = vpop.f32.mrb[78].mxu0 }
 0x183   : > { %v1370_v22 = vpop.f32.mrb[79].mxu1  ;;  %v5065_v23 = vpop.eup %5064  ;;  %v3228_v24 = vadd.f32 1.0, %v5063_v19  ;;  %5084 = vpow2.f32 %v4086_v8  ;;  %v2449_v26 = vadd.f32 %v4488_v21, %v4356_v18  ;;  %v2727_v30 = vadd.f32 %v5770_v55, %v2438_v20 }
 0x184   : > { %v2440_v27 = vpop.f32.mrb[79].mxu0  ;;  %v5067_v28 = vpop.eup %5066  ;;  %v3233_v29 = vadd.f32 1.0, %v5065_v23  ;;  %5086 = vpow2.f32 %v4089_v11  ;;  %v4092_v38 = vmul.f32 -1.442695, %v2729_v25 }
 0x185   : > { %v2441_v31 = vadd.f32 %v2440_v27, %v1370_v22  ;;  %v5069_v32 = vpop.eup %5068  ;;  %5088 = vrcp.f32 %v3228_v24  ;;  %v3231_v33 = vadd.f32 1.0, %v5067_v28  ;;  %v2730_v35 = vadd.f32 %v5770_v55, %v2449_v26  ;;  %v4359_v42 = vpop.f32.mrb[80].mxu1 }
 0x186   : > { %v5071_v36 = vpop.eup %5070  ;;  %5090 = vrcp.f32 %v3233_v29  ;;  %v3234_v37 = vadd.f32 1.0, %v5069_v32  ;;  %v4090_v41 = vmul.f32 -1.442695, %v2727_v30  ;;  %v4491_v45 = vpop.f32.mrb[80].mxu0 }
 0x187   : > { %v2728_v39 = vadd.f32 %v5770_v55, %v2441_v31  ;;  %v5073_v40 = vpop.eup %5072  ;;  %3611 = vst.msk [vmem:[%s5656_s14 + $0x1f8] sm:$0xff] %vm3547_vm3, %v5071_v36  ;;  %5092 = vrcp.f32 %v3231_v33  ;;  %v4093_v44 = vmul.f32 -1.442695, %v2730_v35  ;;  %v1383_v46 = vpop.f32.mrb[81].mxu1  ;;  %v2462_v49 = vadd.f32 %v4491_v45, %v4359_v42 }
 0x188   : > { %v5075_v43 = vpop.eup %5074  ;;  %3609 = vst.msk [vmem:[%s5656_s14 + $0x1e8] sm:$0xff] %vm3547_vm3, %v5073_v40  ;;  %5094 = vrcp.f32 %v3234_v37  ;;  %v2453_v52 = vpop.f32.mrb[81].mxu0 }
 0x189   : > { %v5077_v47 = vpop.eup %5076  ;;  %3614 = vst.msk [vmem:[%s5656_s14 + $0x210] sm:$0xff] %vm3547_vm3, %v5075_v43  ;;  %5096 = vpow2.f32 %v4087_v34  ;;  %v4091_v48 = vmul.f32 -1.442695, %v2728_v39  ;;  %v4360_v50 = vpop.f32.mrb[82].mxu1  ;;  %v2454_v53 = vadd.f32 %v2453_v52, %v1383_v46  ;;  %v2733_v58 = vadd.f32 %v5770_v55, %v2462_v49 }
 0x18a   : > { %v5079_v51 = vpop.eup %5078  ;;  %3612 = vst.msk [vmem:[%s5656_s14 + $0x200] sm:$0xff] %vm3547_vm3, %v5077_v47  ;;  %5098 = vpow2.f32 %v4092_v38  ;;  %v4492_v54 = vpop.f32.mrb[82].mxu0 }
 0x18b   : > { %v1386_v56 = vpop.f32.mrb[83].mxu1  ;;  %v5081_v57 = vpop.eup %5080  ;;  %3615 = vst.msk [vmem:[%s5656_s14 + $0x218] sm:$0xff] %vm3547_vm3, %v5079_v51  ;;  %5100 = vpow2.f32 %v4090_v41  ;;  %v2465_v59 = vadd.f32 %v4492_v54, %v4360_v50  ;;  %v2731_v63 = vadd.f32 %v5770_v55, %v2454_v53  ;;  %v4096_v6 = vmul.f32 -1.442695, %v2733_v58 }
 0x18c   : > { %v2456_v60 = vpop.f32.mrb[83].mxu0  ;;  %v5083_v61 = vpop.eup %5082  ;;  %v3232_v62 = vadd.f32 1.0, %v5081_v57  ;;  %5102 = vpow2.f32 %v4093_v44 }
 0x18d   : > { %v2457_v0 = vadd.f32 %v2456_v60, %v1386_v56  ;;  %v5085_v1 = vpop.eup %5084  ;;  %v3237_v2 = vadd.f32 1.0, %v5083_v61  ;;  %5104 = vpow2.f32 %v4091_v48  ;;  %v2734_v3 = vadd.f32 %v5770_v55, %v2465_v59  ;;  %v4363_v11 = vpop.f32.mrb[84].mxu1 }
 0x18e   : > { %v5087_v4 = vpop.eup %5086  ;;  %5106 = vrcp.f32 %v3232_v62  ;;  %v3235_v5 = vadd.f32 1.0, %v5085_v1  ;;  %v4094_v10 = vmul.f32 -1.442695, %v2731_v63  ;;  %v4495_v14 = vpop.f32.mrb[84].mxu0 }
 0x18f   : > { %v2732_v7 = vadd.f32 %v5770_v55, %v2457_v0  ;;  %v5089_v8 = vpop.eup %5088  ;;  %5108 = vrcp.f32 %v3237_v2  ;;  %v3238_v9 = vadd.f32 1.0, %v5087_v4  ;;  %v4097_v13 = vmul.f32 -1.442695, %v2734_v3  ;;  %v1399_v15 = vpop.f32.mrb[85].mxu1 }
 0x190   : > { %v5091_v12 = vpop.eup %5090  ;;  %3613 = vst.msk [vmem:[%s5656_s14 + $0x208] sm:$0xff] %vm3547_vm3, %v5089_v8  ;;  %5110 = vrcp.f32 %v3235_v5  ;;  %v2478_v18 = vadd.f32 %v4495_v14, %v4363_v11  ;;  %v2469_v19 = vpop.f32.mrb[85].mxu0 }
 0x191   : > { %v5093_v16 = vpop.eup %5092  ;;  %3618 = vst.msk [vmem:[%s5656_s14 + $0x230] sm:$0xff] %vm3547_vm3, %v5091_v12  ;;  %5112 = vrcp.f32 %v3238_v9  ;;  %v4095_v17 = vmul.f32 -1.442695, %v2732_v7  ;;  %v4364_v20 = vpop.f32.mrb[86].mxu1  ;;  %v2470_v22 = vadd.f32 %v2469_v19, %v1399_v15 }
 0x192   : > { %v5095_v21 = vpop.eup %5094  ;;  %3616 = vst.msk [vmem:[%s5656_s14 + $0x220] sm:$0xff] %vm3547_vm3, %v5093_v16  ;;  %5114 = vpow2.f32 %v4096_v6  ;;  %v4496_v23 = vpop.f32.mrb[86].mxu0  ;;  %v2737_v26 = vadd.f32 %v5770_v55, %v2478_v18 }
 0x193   : > { %v1402_v24 = vpop.f32.mrb[87].mxu1  ;;  %v5097_v25 = vpop.eup %5096  ;;  %3619 = vst.msk [vmem:[%s5656_s14 + $0x238] sm:$0xff] %vm3547_vm3, %v5095_v21  ;;  %5116 = vpow2.f32 %v4094_v10  ;;  %v2481_v27 = vadd.f32 %v4496_v23, %v4364_v20  ;;  %v2735_v31 = vadd.f32 %v5770_v55, %v2470_v22 }
 0x194   : > { %v2472_v28 = vpop.f32.mrb[87].mxu0  ;;  %v5099_v29 = vpop.eup %5098  ;;  %v3236_v30 = vadd.f32 1.0, %v5097_v25  ;;  %5118 = vpow2.f32 %v4097_v13  ;;  %v4100_v41 = vmul.f32 -1.442695, %v2737_v26 }
 0x195   : > { %v2473_v32 = vadd.f32 %v2472_v28, %v1402_v24  ;;  %v5101_v33 = vpop.eup %5100  ;;  %v3241_v34 = vadd.f32 1.0, %v5099_v29  ;;  %5120 = vpow2.f32 %v4095_v17  ;;  %v2738_v35 = vadd.f32 %v5770_v55, %v2481_v27  ;;  %v4367_v42 = vpop.f32.mrb[88].mxu1 }
 0x196   : > { %v5103_v36 = vpop.eup %5102  ;;  %5122 = vrcp.f32 %v3236_v30  ;;  %v3239_v37 = vadd.f32 1.0, %v5101_v33  ;;  %v4098_v45 = vmul.f32 -1.442695, %v2735_v31  ;;  %v4499_v46 = vpop.f32.mrb[88].mxu0 }
 0x197   : > { %v2736_v38 = vadd.f32 %v5770_v55, %v2473_v32  ;;  %v5105_v39 = vpop.eup %5104  ;;  %5124 = vrcp.f32 %v3241_v34  ;;  %v3242_v40 = vadd.f32 1.0, %v5103_v36  ;;  %v1415_v47 = vpop.f32.mrb[89].mxu1  ;;  %v4101_v49 = vmul.f32 -1.442695, %v2738_v35 }
 0x198   : > { %v5107_v43 = vpop.eup %5106  ;;  %5126 = vrcp.f32 %v3239_v37  ;;  %v3240_v44 = vadd.f32 1.0, %v5105_v39  ;;  %v2494_v52 = vadd.f32 %v4499_v46, %v4367_v42  ;;  %v2485_v50 = vpop.f32.mrb[89].mxu0 }
 0x199   : > { %v5109_v48 = vpop.eup %5108  ;;  %3617 = vst.msk [vmem:[%s5656_s14 + $0x228] sm:$0xff] %vm3547_vm3, %v5107_v43  ;;  %5128 = vrcp.f32 %v3242_v40  ;;  %v4368_v51 = vpop.f32.mrb[90].mxu1  ;;  %v4099_v54 = vmul.f32 -1.442695, %v2736_v38  ;;  %v2486_v56 = vadd.f32 %v2485_v50, %v1415_v47 }
 0x19a   : > { %v5111_v53 = vpop.eup %5110  ;;  %3622 = vst.msk [vmem:[%s5656_s14 + $0x250] sm:$0xff] %vm3547_vm3, %v5109_v48  ;;  %5130 = vrcp.f32 %v3240_v44  ;;  %v4500_v57 = vpop.f32.mrb[90].mxu0  ;;  %v2741_v60 = vadd.f32 %v5770_v55, %v2494_v52 }
 0x19b   : > { %v1418_v58 = vpop.f32.mrb[91].mxu1  ;;  %v5113_v59 = vpop.eup %5112  ;;  %3620 = vst.msk [vmem:[%s5656_s14 + $0x240] sm:$0xff] %vm3547_vm3, %v5111_v53  ;;  %5132 = vpow2.f32 %v4100_v41  ;;  %v2497_v61 = vadd.f32 %v4500_v57, %v4368_v51  ;;  %v2739_v0 = vadd.f32 %v5770_v55, %v2486_v56 }
 0x19c   : > { %v2488_v62 = vpop.f32.mrb[91].mxu0  ;;  %v5115_v63 = vpop.eup %5114  ;;  %3623 = vst.msk [vmem:[%s5656_s14 + $0x258] sm:$0xff] %vm3547_vm3, %v5113_v59  ;;  %5134 = vpow2.f32 %v4098_v45  ;;  %v4104_v10 = vmul.f32 -1.442695, %v2741_v60  ;;  %v5921_v60 = vld [vmem:[%s6054_s4] ss:$0 sm:$0xff] }
 0x19d   : > { %v2489_v1 = vadd.f32 %v2488_v62, %v1418_v58  ;;  %v5117_v2 = vpop.eup %5116  ;;  %v3245_v3 = vadd.f32 1.0, %v5115_v63  ;;  %5136 = vpow2.f32 %v4101_v49  ;;  %v2742_v4 = vadd.f32 %v5770_v55, %v2497_v61  ;;  %v4371_v11 = vpop.f32.mrb[92].mxu1 }
 0x19e   : > { %v5119_v5 = vpop.eup %5118  ;;  %v3243_v6 = vadd.f32 1.0, %v5117_v2  ;;  %5138 = vpow2.f32 %v4099_v54  ;;  %v4102_v14 = vmul.f32 -1.442695, %v2739_v0  ;;  %v4503_v15 = vpop.f32.mrb[92].mxu0 }
 0x19f   : > { %v2740_v7 = vadd.f32 %v5770_v55, %v2489_v1  ;;  %v5121_v8 = vpop.eup %5120  ;;  %5140 = vrcp.f32 %v3245_v3  ;;  %v3246_v9 = vadd.f32 1.0, %v5119_v5  ;;  %v1431_v16 = vpop.f32.mrb[93].mxu1  ;;  %v4105_v18 = vmul.f32 -1.442695, %v2742_v4 }
 0x1a0   : > { %v5123_v12 = vpop.eup %5122  ;;  %5142 = vrcp.f32 %v3243_v6  ;;  %v3244_v13 = vadd.f32 1.0, %v5121_v8  ;;  %v2510_v19 = vadd.f32 %v4503_v15, %v4371_v11  ;;  %v2501_v20 = vpop.f32.mrb[93].mxu0 }
 0x1a1   : > { %v5125_v17 = vpop.eup %5124  ;;  %3621 = vst.msk [vmem:[%s5656_s14 + $0x248] sm:$0xff] %vm3547_vm3, %v5123_v12  ;;  %5144 = vrcp.f32 %v3246_v9  ;;  %v4372_v21 = vpop.f32.mrb[94].mxu1  ;;  %v4103_v23 = vmul.f32 -1.442695, %v2740_v7  ;;  %v2502_v24 = vadd.f32 %v2501_v20, %v1431_v16 }
 0x1a2   : > { %v5127_v22 = vpop.eup %5126  ;;  %3626 = vst.msk [vmem:[%s5656_s14 + $0x270] sm:$0xff] %vm3547_vm3, %v5125_v17  ;;  %5146 = vrcp.f32 %v3244_v13  ;;  %v4504_v25 = vpop.f32.mrb[94].mxu0  ;;  %v2745_v28 = vadd.f32 %v5770_v55, %v2510_v19 }
 0x1a3   : > { %v1434_v26 = vpop.f32.mrb[95].mxu1  ;;  %v5129_v27 = vpop.eup %5128  ;;  %3624 = vst.msk [vmem:[%s5656_s14 + $0x260] sm:$0xff] %vm3547_vm3, %v5127_v22  ;;  %5148 = vpow2.f32 %v4104_v10  ;;  %v2513_v29 = vadd.f32 %v4504_v25, %v4372_v21  ;;  %v2743_v32 = vadd.f32 %v5770_v55, %v2502_v24 }
 0x1a4   : > { %v2504_v30 = vpop.f32.mrb[95].mxu0  ;;  %v5131_v31 = vpop.eup %5130  ;;  %3627 = vst.msk [vmem:[%s5656_s14 + $0x278] sm:$0xff] %vm3547_vm3, %v5129_v27  ;;  %5150 = vpow2.f32 %v4102_v14  ;;  %v4108_v35 = vmul.f32 -1.442695, %v2745_v28 }
 0x1a5   : > { %v2505_v33 = vadd.f32 %v2504_v30, %v1434_v26  ;;  %v5133_v34 = vpop.eup %5132  ;;  %3625 = vst.msk [vmem:[%s5656_s14 + $0x268] sm:$0xff] %vm3547_vm3, %v5131_v31  ;;  %5152 = vpow2.f32 %v4105_v18  ;;  %v2746_v36 = vadd.f32 %v5770_v55, %v2513_v29  ;;  %v4375_v42 = vpop.f32.mrb[96].mxu1  ;;  %v4106_v45 = vmul.f32 -1.442695, %v2743_v32 }
 0x1a6   : > { %v5135_v37 = vpop.eup %5134  ;;  %v3249_v38 = vadd.f32 1.0, %v5133_v34  ;;  %5154 = vpow2.f32 %v4103_v23  ;;  %v4507_v46 = vpop.f32.mrb[96].mxu0 }
 0x1a7   : > { %v2744_v39 = vadd.f32 %v5770_v55, %v2505_v33  ;;  %v5137_v40 = vpop.eup %5136  ;;  %v3247_v41 = vadd.f32 1.0, %v5135_v37  ;;  %5156 = vpow2.f32 %v4108_v35  ;;  %v1447_v47 = vpop.f32.mrb[97].mxu1  ;;  %v4109_v52 = vmul.f32 -1.442695, %v2746_v36 }
 0x1a8   : > { %v5139_v43 = vpop.eup %5138  ;;  %5158 = vrcp.f32 %v3249_v38  ;;  %v3250_v44 = vadd.f32 1.0, %v5137_v40  ;;  %v2526_v50 = vadd.f32 %v4507_v46, %v4375_v42  ;;  %v2517_v51 = vpop.f32.mrb[97].mxu0 }
 0x1a9   : > { %v5141_v48 = vpop.eup %5140  ;;  %5160 = vrcp.f32 %v3247_v41  ;;  %v3248_v49 = vadd.f32 1.0, %v5139_v43  ;;  %v4376_v53 = vpop.f32.mrb[98].mxu1  ;;  %v4107_v54 = vmul.f32 -1.442695, %v2744_v39  ;;  %v2518_v56 = vadd.f32 %v2517_v51, %v1447_v47 }
 0x1aa   : > { %v5143_v55 = vpop.eup %5142  ;;  %3630 = vst.msk [vmem:[%s5656_s14 + $0x290] sm:$0xff] %vm3547_vm3, %v5141_v48  ;;  %5162 = vrcp.f32 %v3250_v44  ;;  %v4508_v57 = vpop.f32.mrb[98].mxu0  ;;  %v2749_v61 = vadd.f32 %v5921_v60, %v2526_v50 }
 0x1ab   : > { %v1450_v58 = vpop.f32.mrb[99].mxu1  ;;  %v5145_v59 = vpop.eup %5144  ;;  %3628 = vst.msk [vmem:[%s5656_s14 + $0x280] sm:$0xff] %vm3547_vm3, %v5143_v55  ;;  %5164 = vrcp.f32 %v3248_v49  ;;  %v2529_v62 = vadd.f32 %v4508_v57, %v4376_v53  ;;  %v2747_v4 = vadd.f32 %v5921_v60, %v2518_v56 }
 0x1ac   : > { %v2520_v63 = vpop.f32.mrb[99].mxu0  ;;  %v5147_v0 = vpop.eup %5146  ;;  %3631 = vst.msk [vmem:[%s5656_s14 + $0x298] sm:$0xff] %vm3547_vm3, %v5145_v59  ;;  %5166 = vpow2.f32 %v4106_v45  ;;  %v4112_v3 = vmul.f32 -1.442695, %v2749_v61 }
 0x1ad   : > { %v2521_v1 = vadd.f32 %v2520_v63, %v1450_v58  ;;  %v5149_v2 = vpop.eup %5148  ;;  %3629 = vst.msk [vmem:[%s5656_s14 + $0x288] sm:$0xff] %vm3547_vm3, %v5147_v0  ;;  %5168 = vpow2.f32 %v4109_v52  ;;  %v2750_v7 = vadd.f32 %v5921_v60, %v2529_v62  ;;  %v4379_v11 = vpop.f32.mrb[100].mxu1  ;;  %v4110_v18 = vmul.f32 -1.442695, %v2747_v4 }
 0x1ae   : > { %v5151_v5 = vpop.eup %5150  ;;  %v3253_v6 = vadd.f32 1.0, %v5149_v2  ;;  %5170 = vpow2.f32 %v4107_v54  ;;  %v4511_v14 = vpop.f32.mrb[100].mxu0 }
 0x1af   : > { %v5153_v8 = vpop.eup %5152  ;;  %v3251_v9 = vadd.f32 1.0, %v5151_v5  ;;  %5172 = vpow2.f32 %v4112_v3  ;;  %v2748_v10 = vadd.f32 %v5921_v60, %v2521_v1  ;;  %v1463_v15 = vpop.f32.mrb[101].mxu1  ;;  %v2542_v19 = vadd.f32 %v4511_v14, %v4379_v11 }
 0x1b0   : > { %v5155_v12 = vpop.eup %5154  ;;  %5174 = vrcp.f32 %v3253_v6  ;;  %v3254_v13 = vadd.f32 1.0, %v5153_v8  ;;  %v2533_v20 = vpop.f32.mrb[101].mxu0  ;;  %v4113_v24 = vmul.f32 -1.442695, %v2750_v7 }
 0x1b1   : > { %v5157_v16 = vpop.eup %5156  ;;  %5176 = vrcp.f32 %v3251_v9  ;;  %v3252_v17 = vadd.f32 1.0, %v5155_v12  ;;  %v4380_v21 = vpop.f32.mrb[102].mxu1  ;;  %v2534_v25 = vadd.f32 %v2533_v20, %v1463_v15  ;;  %v4111_v29 = vmul.f32 -1.442695, %v2748_v10 }
 0x1b2   : > { %v5159_v22 = vpop.eup %5158  ;;  %5178 = vrcp.f32 %v3254_v13  ;;  %v3257_v23 = vadd.f32 1.0, %v5157_v16  ;;  %v4512_v26 = vpop.f32.mrb[102].mxu0  ;;  %v2753_v30 = vadd.f32 %v5921_v60, %v2542_v19 }
 0x1b3   : > { %v1466_v27 = vpop.f32.mrb[103].mxu1  ;;  %v5161_v28 = vpop.eup %5160  ;;  %3634 = vst.msk [vmem:[%s5656_s14 + $0x2b0] sm:$0xff] %vm3547_vm3, %v5159_v22  ;;  %5180 = vrcp.f32 %v3252_v17  ;;  %v2545_v31 = vadd.f32 %v4512_v26, %v4380_v21  ;;  %v2751_v37 = vadd.f32 %v5921_v60, %v2534_v25 }
 0x1b4   : > { %v2536_v32 = vpop.f32.mrb[103].mxu0  ;;  %v5163_v33 = vpop.eup %5162  ;;  %3632 = vst.msk [vmem:[%s5656_s14 + $0x2a0] sm:$0xff] %vm3547_vm3, %v5161_v28  ;;  %5182 = vrcp.f32 %v3257_v23  ;;  %v4116_v36 = vmul.f32 -1.442695, %v2753_v30 }
 0x1b5   : > { %v2537_v34 = vadd.f32 %v2536_v32, %v1466_v27  ;;  %v5165_v35 = vpop.eup %5164  ;;  %3635 = vst.msk [vmem:[%s5656_s14 + $0x2b8] sm:$0xff] %vm3547_vm3, %v5163_v33  ;;  %5184 = vpow2.f32 %v4110_v18  ;;  %v2754_v39 = vadd.f32 %v5921_v60, %v2545_v31  ;;  %v4383_v43 = vpop.f32.mrb[104].mxu1  ;;  %v4114_v52 = vmul.f32 -1.442695, %v2751_v37 }
 0x1b6   : > { %v5167_v38 = vpop.eup %5166  ;;  %3633 = vst.msk [vmem:[%s5656_s14 + $0x2a8] sm:$0xff] %vm3547_vm3, %v5165_v35  ;;  %5186 = vpow2.f32 %v4113_v24  ;;  %v4515_v46 = vpop.f32.mrb[104].mxu0 }
 0x1b7   : > { %v5169_v40 = vpop.eup %5168  ;;  %v3255_v41 = vadd.f32 1.0, %v5167_v38  ;;  %5188 = vpow2.f32 %v4111_v29  ;;  %v2752_v42 = vadd.f32 %v5921_v60, %v2537_v34  ;;  %v1479_v47 = vpop.f32.mrb[105].mxu1  ;;  %v2558_v50 = vadd.f32 %v4515_v46, %v4383_v43 }
 0x1b8   : > { %v5171_v44 = vpop.eup %5170  ;;  %v3258_v45 = vadd.f32 1.0, %v5169_v40  ;;  %5190 = vpow2.f32 %v4116_v36  ;;  %v2549_v51 = vpop.f32.mrb[105].mxu0  ;;  %v4117_v56 = vmul.f32 -1.442695, %v2754_v39 }
 0x1b9   : > { %v5173_v48 = vpop.eup %5172  ;;  %5192 = vrcp.f32 %v3255_v41  ;;  %v3256_v49 = vadd.f32 1.0, %v5171_v44  ;;  %v4384_v53 = vpop.f32.mrb[106].mxu1  ;;  %v2550_v57 = vadd.f32 %v2549_v51, %v1479_v47  ;;  %v4115_v62 = vmul.f32 -1.442695, %v2752_v42 }
 0x1ba   : > { %v5175_v55 = vpop.eup %5174  ;;  %5194 = vrcp.f32 %v3258_v45  ;;  %v3261_v54 = vadd.f32 1.0, %v5173_v48  ;;  %v4516_v58 = vpop.f32.mrb[106].mxu0  ;;  %v2757_v63 = vadd.f32 %v5921_v60, %v2558_v50 }
 0x1bb   : > { %v1482_v59 = vpop.f32.mrb[107].mxu1  ;;  %v5177_v61 = vpop.eup %5176  ;;  %3638 = vst.msk [vmem:[%s5656_s14 + $0x2d0] sm:$0xff] %vm3547_vm3, %v5175_v55  ;;  %5196 = vrcp.f32 %v3256_v49  ;;  %v2561_v0 = vadd.f32 %v4516_v58, %v4384_v53  ;;  %v2755_v3 = vadd.f32 %v5921_v60, %v2550_v57 }
 0x1bc   : > { %v2552_v1 = vpop.f32.mrb[107].mxu0  ;;  %v5179_v2 = vpop.eup %5178  ;;  %3636 = vst.msk [vmem:[%s5656_s14 + $0x2c0] sm:$0xff] %vm3547_vm3, %v5177_v61  ;;  %5198 = vrcp.f32 %v3261_v54  ;;  %v4120_v6 = vmul.f32 -1.442695, %v2757_v63 }
 0x1bd   : > { %v2553_v4 = vadd.f32 %v2552_v1, %v1482_v59  ;;  %v5181_v5 = vpop.eup %5180  ;;  %3639 = vst.msk [vmem:[%s5656_s14 + $0x2d8] sm:$0xff] %vm3547_vm3, %v5179_v2  ;;  %5200 = vpow2.f32 %v4114_v52  ;;  %v2758_v7 = vadd.f32 %v5921_v60, %v2561_v0  ;;  %v4118_v9 = vmul.f32 -1.442695, %v2755_v3  ;;  %v4387_v12 = vpop.f32.mrb[108].mxu1 }
 0x1be   : > { %v5183_v8 = vpop.eup %5182  ;;  %3637 = vst.msk [vmem:[%s5656_s14 + $0x2c8] sm:$0xff] %vm3547_vm3, %v5181_v5  ;;  %5202 = vpow2.f32 %v4117_v56  ;;  %v4519_v15 = vpop.f32.mrb[108].mxu0 }
 0x1bf   : > { %v2756_v10 = vadd.f32 %v5921_v60, %v2553_v4  ;;  %v5185_v11 = vpop.eup %5184  ;;  %3642 = vst.msk [vmem:[%s5656_s14 + $0x2f0] sm:$0xff] %vm3547_vm3, %v5183_v8  ;;  %5204 = vpow2.f32 %v4115_v62  ;;  %v1495_v16 = vpop.f32.mrb[109].mxu1  ;;  %v4121_v19 = vmul.f32 -1.442695, %v2758_v7  ;;  %v2574_v20 = vadd.f32 %v4519_v15, %v4387_v12 }
 0x1c0   : > { %v5187_v13 = vpop.eup %5186  ;;  %v3259_v14 = vadd.f32 1.0, %v5185_v11  ;;  %5206 = vpow2.f32 %v4120_v6  ;;  %v2565_v21 = vpop.f32.mrb[109].mxu0 }
 0x1c1   : > { %v5189_v17 = vpop.eup %5188  ;;  %v3262_v18 = vadd.f32 1.0, %v5187_v13  ;;  %5208 = vpow2.f32 %v4118_v9  ;;  %v4388_v22 = vpop.f32.mrb[110].mxu1  ;;  %v4119_v25 = vmul.f32 -1.442695, %v2756_v10  ;;  %v2566_v26 = vadd.f32 %v2565_v21, %v1495_v16 }
 0x1c2   : > { %v5191_v23 = vpop.eup %5190  ;;  %5210 = vrcp.f32 %v3259_v14  ;;  %v3260_v24 = vadd.f32 1.0, %v5189_v17  ;;  %v4520_v27 = vpop.f32.mrb[110].mxu0  ;;  %v2761_v31 = vadd.f32 %v5921_v60, %v2574_v20 }
 0x1c3   : > { %v1498_v28 = vpop.f32.mrb[111].mxu1  ;;  %v5193_v29 = vpop.eup %5192  ;;  %5212 = vrcp.f32 %v3262_v18  ;;  %v3265_v30 = vadd.f32 1.0, %v5191_v23  ;;  %v2577_v32 = vadd.f32 %v4520_v27, %v4388_v22  ;;  %v2759_v35 = vadd.f32 %v5921_v60, %v2566_v26 }
 0x1c4   : > { %v2568_v33 = vpop.f32.mrb[111].mxu0  ;;  %v5195_v34 = vpop.eup %5194  ;;  %3640 = vst.msk [vmem:[%s5656_s14 + $0x2e0] sm:$0xff] %vm3547_vm3, %v5193_v29  ;;  %5214 = vrcp.f32 %v3260_v24  ;;  %v4124_v38 = vmul.f32 -1.442695, %v2761_v31 }
 0x1c5   : > { %v2569_v36 = vadd.f32 %v2568_v33, %v1498_v28  ;;  %v5197_v37 = vpop.eup %5196  ;;  %3643 = vst.msk [vmem:[%s5656_s14 + $0x2f8] sm:$0xff] %vm3547_vm3, %v5195_v34  ;;  %5216 = vrcp.f32 %v3265_v30  ;;  %v2762_v39 = vadd.f32 %v5921_v60, %v2577_v32  ;;  %v4122_v41 = vmul.f32 -1.442695, %v2759_v35  ;;  %v4391_v44 = vpop.f32.mrb[112].mxu1 }
 0x1c6   : > { %v5199_v40 = vpop.eup %5198  ;;  %3641 = vst.msk [vmem:[%s5656_s14 + $0x2e8] sm:$0xff] %vm3547_vm3, %v5197_v37  ;;  %5218 = vpow2.f32 %v4121_v19  ;;  %v4523_v47 = vpop.f32.mrb[112].mxu0 }
 0x1c7   : > { %v2760_v42 = vadd.f32 %v5921_v60, %v2569_v36  ;;  %v5201_v43 = vpop.eup %5200  ;;  %3646 = vst.msk [vmem:[%s5656_s14 + $0x310] sm:$0xff] %vm3547_vm3, %v5199_v40  ;;  %5220 = vpow2.f32 %v4119_v25  ;;  %v1511_v48 = vpop.f32.mrb[113].mxu1  ;;  %v4125_v50 = vmul.f32 -1.442695, %v2762_v39  ;;  %v2590_v51 = vadd.f32 %v4523_v47, %v4391_v44 }
 0x1c8   : > { %v5203_v45 = vpop.eup %5202  ;;  %v3263_v46 = vadd.f32 1.0, %v5201_v43  ;;  %5222 = vpow2.f32 %v4124_v38  ;;  %v2581_v53 = vpop.f32.mrb[113].mxu0 }
 0x1c9   : > { %v5205_v49 = vpop.eup %5204  ;;  %v3266_v52 = vadd.f32 1.0, %v5203_v45  ;;  %5224 = vpow2.f32 %v4122_v41  ;;  %v4392_v55 = vpop.f32.mrb[114].mxu1  ;;  %v4123_v57 = vmul.f32 -1.442695, %v2760_v42  ;;  %v2582_v58 = vadd.f32 %v2581_v53, %v1511_v48 }
 0x1ca   : > { %v5207_v54 = vpop.eup %5206  ;;  %5226 = vrcp.f32 %v3263_v46  ;;  %v3264_v56 = vadd.f32 1.0, %v5205_v49  ;;  %v4524_v59 = vpop.f32.mrb[114].mxu0  ;;  %v2765_v0 = vadd.f32 %v5921_v60, %v2590_v51 }
 0x1cb   : > { %v1514_v61 = vpop.f32.mrb[115].mxu1  ;;  %v5209_v62 = vpop.eup %5208  ;;  %5228 = vrcp.f32 %v3266_v52  ;;  %v3269_v63 = vadd.f32 1.0, %v5207_v54  ;;  %v2593_v1 = vadd.f32 %v4524_v59, %v4392_v55  ;;  %v2763_v5 = vadd.f32 %v5921_v60, %v2582_v58 }
 0x1cc   : > { %v2584_v2 = vpop.f32.mrb[115].mxu0  ;;  %v5211_v3 = vpop.eup %5210  ;;  %5230 = vrcp.f32 %v3264_v56  ;;  %v3267_v4 = vadd.f32 1.0, %v5209_v62  ;;  %v4128_v8 = vmul.f32 -1.442695, %v2765_v0 }
 0x1cd   : > { %v2585_v6 = vadd.f32 %v2584_v2, %v1514_v61  ;;  %v5213_v7 = vpop.eup %5212  ;;  %3644 = vst.msk [vmem:[%s5656_s14 + $0x300] sm:$0xff] %vm3547_vm3, %v5211_v3  ;;  %5232 = vrcp.f32 %v3269_v63  ;;  %v2766_v9 = vadd.f32 %v5921_v60, %v2593_v1  ;;  %v4126_v11 = vmul.f32 -1.442695, %v2763_v5  ;;  %v4395_v14 = vpop.f32.mrb[116].mxu1 }
 0x1ce   : > { %v5215_v10 = vpop.eup %5214  ;;  %3647 = vst.msk [vmem:[%s5656_s14 + $0x318] sm:$0xff] %vm3547_vm3, %v5213_v7  ;;  %5234 = vrcp.f32 %v3267_v4  ;;  %v4527_v16 = vpop.f32.mrb[116].mxu0 }
 0x1cf   : > { %v2764_v12 = vadd.f32 %v5921_v60, %v2585_v6  ;;  %v5217_v13 = vpop.eup %5216  ;;  %3645 = vst.msk [vmem:[%s5656_s14 + $0x308] sm:$0xff] %vm3547_vm3, %v5215_v10  ;;  %5236 = vpow2.f32 %v4125_v50  ;;  %v1527_v17 = vpop.f32.mrb[117].mxu1  ;;  %v4129_v20 = vmul.f32 -1.442695, %v2766_v9  ;;  %v2606_v21 = vadd.f32 %v4527_v16, %v4395_v14 }
 0x1d0   : > { %v5219_v15 = vpop.eup %5218  ;;  %3650 = vst.msk [vmem:[%s5656_s14 + $0x330] sm:$0xff] %vm3547_vm3, %v5217_v13  ;;  %5238 = vpow2.f32 %v4123_v57  ;;  %v2597_v22 = vpop.f32.mrb[117].mxu0 }
 0x1d1   : > { %v5221_v18 = vpop.eup %5220  ;;  %v3270_v19 = vadd.f32 1.0, %v5219_v15  ;;  %5240 = vpow2.f32 %v4128_v8  ;;  %v4396_v23 = vpop.f32.mrb[118].mxu1  ;;  %v4127_v26 = vmul.f32 -1.442695, %v2764_v12  ;;  %v2598_v27 = vadd.f32 %v2597_v22, %v1527_v17 }
 0x1d2   : > { %v5223_v24 = vpop.eup %5222  ;;  %v3268_v25 = vadd.f32 1.0, %v5221_v18  ;;  %5242 = vpow2.f32 %v4126_v11  ;;  %v4528_v28 = vpop.f32.mrb[118].mxu0  ;;  %v2769_v32 = vadd.f32 %v5921_v60, %v2606_v21 }
 0x1d3   : > { %v1530_v29 = vpop.f32.mrb[119].mxu1  ;;  %v5225_v30 = vpop.eup %5224  ;;  %5244 = vrcp.f32 %v3270_v19  ;;  %v3273_v31 = vadd.f32 1.0, %v5223_v24  ;;  %v2609_v33 = vadd.f32 %v4528_v28, %v4396_v23  ;;  %v2767_v37 = vadd.f32 %v5921_v60, %v2598_v27 }
 0x1d4   : > { %v2600_v34 = vpop.f32.mrb[119].mxu0  ;;  %v5227_v35 = vpop.eup %5226  ;;  %5246 = vrcp.f32 %v3268_v25  ;;  %v3271_v36 = vadd.f32 1.0, %v5225_v30  ;;  %v4132_v40 = vmul.f32 -1.442695, %v2769_v32 }
 0x1d5   : > { %v2601_v38 = vadd.f32 %v2600_v34, %v1530_v29  ;;  %v5229_v39 = vpop.eup %5228  ;;  %3648 = vst.msk [vmem:[%s5656_s14 + $0x320] sm:$0xff] %vm3547_vm3, %v5227_v35  ;;  %5248 = vrcp.f32 %v3273_v31  ;;  %v2770_v41 = vadd.f32 %v5921_v60, %v2609_v33  ;;  %v4130_v43 = vmul.f32 -1.442695, %v2767_v37  ;;  %v4399_v47 = vpop.f32.mrb[120].mxu1 }
 0x1d6   : > { %v5231_v42 = vpop.eup %5230  ;;  %3651 = vst.msk [vmem:[%s5656_s14 + $0x338] sm:$0xff] %vm3547_vm3, %v5229_v39  ;;  %5250 = vrcp.f32 %v3271_v36  ;;  %v4531_v49 = vpop.f32.mrb[120].mxu0 }
 0x1d7   : > { %v2768_v44 = vadd.f32 %v5921_v60, %v2601_v38  ;;  %v5233_v45 = vpop.eup %5232  ;;  %3649 = vst.msk [vmem:[%s5656_s14 + $0x328] sm:$0xff] %vm3547_vm3, %v5231_v42  ;;  %5252 = vpow2.f32 %v4129_v20  ;;  %v4133_v46 = vmul.f32 -1.442695, %v2770_v41  ;;  %v1543_v52 = vpop.f32.mrb[121].mxu1  ;;  %v2622_v51 = vadd.f32 %v4531_v49, %v4399_v47 }
 0x1d8   : > { %v5235_v48 = vpop.eup %5234  ;;  %3654 = vst.msk [vmem:[%s5656_s14 + $0x350] sm:$0xff] %vm3547_vm3, %v5233_v45  ;;  %5254 = vpow2.f32 %v4127_v26  ;;  %v2613_v53 = vpop.f32.mrb[121].mxu0 }
 0x1d9   : > { %v5237_v50 = vpop.eup %5236  ;;  %3652 = vst.msk [vmem:[%s5656_s14 + $0x340] sm:$0xff] %vm3547_vm3, %v5235_v48  ;;  %5256 = vpow2.f32 %v4132_v40  ;;  %v4400_v55 = vpop.f32.mrb[122].mxu1  ;;  %v4131_v57 = vmul.f32 -1.442695, %v2768_v44  ;;  %v2614_v58 = vadd.f32 %v2613_v53, %v1543_v52  ;;  %v2773_v0 = vadd.f32 %v5921_v60, %v2622_v51 }
 0x1da   : > { %v5239_v54 = vpop.eup %5238  ;;  %v3274_v56 = vadd.f32 1.0, %v5237_v50  ;;  %5258 = vpow2.f32 %v4130_v43  ;;  %v4532_v59 = vpop.f32.mrb[122].mxu0 }
 0x1db   : > { %v1546_v61 = vpop.f32.mrb[123].mxu1  ;;  %v5241_v62 = vpop.eup %5240  ;;  %v3272_v63 = vadd.f32 1.0, %v5239_v54  ;;  %5260 = vpow2.f32 %v4133_v46  ;;  %v2625_v1 = vadd.f32 %v4532_v59, %v4400_v55  ;;  %v2771_v5 = vadd.f32 %v5921_v60, %v2614_v58 }
 0x1dc   : > { %v2616_v2 = vpop.f32.mrb[123].mxu0  ;;  %v5243_v3 = vpop.eup %5242  ;;  %5262 = vrcp.f32 %v3274_v56  ;;  %v3277_v4 = vadd.f32 1.0, %v5241_v62  ;;  %v4136_v9 = vmul.f32 -1.442695, %v2773_v0 }
 0x1dd   : > { %v2617_v6 = vadd.f32 %v2616_v2, %v1546_v61  ;;  %v5245_v7 = vpop.eup %5244  ;;  %5264 = vrcp.f32 %v3272_v63  ;;  %v3275_v8 = vadd.f32 1.0, %v5243_v3  ;;  %v2774_v10 = vadd.f32 %v5921_v60, %v2625_v1  ;;  %v4403_v15 = vpop.f32.mrb[124].mxu1 }
 0x1de   : > { %v5247_v11 = vpop.eup %5246  ;;  %3655 = vst.msk [vmem:[%s5656_s14 + $0x358] sm:$0xff] %vm3547_vm3, %v5245_v7  ;;  %5266 = vrcp.f32 %v3277_v4  ;;  %v4134_v12 = vmul.f32 -1.442695, %v2771_v5  ;;  %v4535_v17 = vpop.f32.mrb[124].mxu0 }
 0x1df   : > { %v5249_v13 = vpop.eup %5248  ;;  %3653 = vst.msk [vmem:[%s5656_s14 + $0x348] sm:$0xff] %vm3547_vm3, %v5247_v11  ;;  %5268 = vrcp.f32 %v3275_v8  ;;  %v4137_v14 = vmul.f32 -1.442695, %v2774_v10  ;;  %v1559_v18 = vpop.f32.mrb[125].mxu1  ;;  %v2772_v20 = vadd.f32 %v5921_v60, %v2617_v6  ;;  %v2638_v21 = vadd.f32 %v4535_v17, %v4403_v15 }
 0x1e0   : > { %v5251_v16 = vpop.eup %5250  ;;  %3658 = vst.msk [vmem:[%s5656_s14 + $0x370] sm:$0xff] %vm3547_vm3, %v5249_v13  ;;  %5270 = vpow2.f32 %v4131_v57  ;;  %v2629_v22 = vpop.f32.mrb[125].mxu0 }
 0x1e1   : > { %v5253_v19 = vpop.eup %5252  ;;  %3656 = vst.msk [vmem:[%s5656_s14 + $0x360] sm:$0xff] %vm3547_vm3, %v5251_v16  ;;  %5272 = vpow2.f32 %v4136_v9  ;;  %v4404_v23 = vpop.f32.mrb[126].mxu1  ;;  %v2630_v26 = vadd.f32 %v2629_v22, %v1559_v18  ;;  %v2777_v31 = vadd.f32 %v5921_v60, %v2638_v21  ;;  %v4135_v40 = vmul.f32 -1.442695, %v2772_v20 }
 0x1e2   : > { %v5255_v24 = vpop.eup %5254  ;;  %v3278_v25 = vadd.f32 1.0, %v5253_v19  ;;  %5274 = vpow2.f32 %v4134_v12  ;;  %v4536_v27 = vpop.f32.mrb[126].mxu0 }
 0x1e3   : > { %v1562_v28 = vpop.f32.mrb[127].mxu1  ;;  %v5257_v29 = vpop.eup %5256  ;;  %v3276_v30 = vadd.f32 1.0, %v5255_v24  ;;  %5276 = vpow2.f32 %v4137_v14  ;;  %v2641_v32 = vadd.f32 %v4536_v27, %v4404_v23  ;;  %v2775_v36 = vadd.f32 %v5921_v60, %v2630_v26 }
 0x1e4   : > { %v2632_v33 = vpop.f32.mrb[127].mxu0  ;;  %v5259_v34 = vpop.eup %5258  ;;  %5278 = vrcp.f32 %v3278_v25  ;;  %v3281_v35 = vadd.f32 1.0, %v5257_v29  ;;  %v4140_v44 = vmul.f32 -1.442695, %v2777_v31 }
 0x1e5   : > { %v2633_v37 = vadd.f32 %v2632_v33, %v1562_v28  ;;  %v5261_v38 = vpop.eup %5260  ;;  %5280 = vrcp.f32 %v3276_v30  ;;  %v3279_v39 = vadd.f32 1.0, %v5259_v34  ;;  %v2778_v41 = vadd.f32 %v5921_v60, %v2641_v32 }
 0x1e6   : > { %v5263_v42 = vpop.eup %5262  ;;  %5282 = vrcp.f32 %v3281_v35  ;;  %v3282_v43 = vadd.f32 1.0, %v5261_v38  ;;  %v4138_v46 = vmul.f32 -1.442695, %v2775_v36 }
 0x1e7   : > { %v5265_v45 = vpop.eup %5264  ;;  %3659 = vst.msk [vmem:[%s5656_s14 + $0x378] sm:$0xff] %vm3547_vm3, %v5263_v42  ;;  %5284 = vrcp.f32 %v3279_v39  ;;  %v4141_v48 = vmul.f32 -1.442695, %v2778_v41  ;;  %v2776_v52 = vadd.f32 %v5921_v60, %v2633_v37 }
 0x1e8   : > { %v5267_v47 = vpop.eup %5266  ;;  %3657 = vst.msk [vmem:[%s5656_s14 + $0x368] sm:$0xff] %vm3547_vm3, %v5265_v45  ;;  %5286 = vrcp.f32 %v3282_v43 }
 0x1e9   : > { %v5269_v49 = vpop.eup %5268  ;;  %3662 = vst.msk [vmem:[%s5656_s14 + $0x390] sm:$0xff] %vm3547_vm3, %v5267_v47  ;;  %5288 = vpow2.f32 %v4135_v40  ;;  %v4139_v58 = vmul.f32 -1.442695, %v2776_v52 }
 0x1ea   : > { %v5271_v50 = vpop.eup %5270  ;;  %3660 = vst.msk [vmem:[%s5656_s14 + $0x380] sm:$0xff] %vm3547_vm3, %v5269_v49  ;;  %5290 = vpow2.f32 %v4140_v44 }
 0x1eb   : > { %v5273_v51 = vpop.eup %5272  ;;  %v3280_v53 = vadd.f32 1.0, %v5271_v50  ;;  %5292 = vpow2.f32 %v4138_v46 }
 0x1ec   : > { %v5275_v55 = vpop.eup %5274  ;;  %v3285_v54 = vadd.f32 1.0, %v5273_v51  ;;  %5294 = vpow2.f32 %v4141_v48 }
 0x1ed   : > { %v5277_v56 = vpop.eup %5276  ;;  %5296 = vrcp.f32 %v3280_v53  ;;  %v3283_v57 = vadd.f32 1.0, %v5275_v55 }
 0x1ee   : > { %v5279_v60 = vpop.eup %5278  ;;  %5298 = vrcp.f32 %v3285_v54  ;;  %v3286_v59 = vadd.f32 1.0, %v5277_v56 }
 0x1ef   : > { %v5281_v61 = vpop.eup %5280  ;;  %3663 = vst.msk [vmem:[%s5656_s14 + $0x398] sm:$0xff] %vm3547_vm3, %v5279_v60  ;;  %5300 = vrcp.f32 %v3283_v57 }
 0x1f0   : > { %v5283_v62 = vpop.eup %5282  ;;  %3661 = vst.msk [vmem:[%s5656_s14 + $0x388] sm:$0xff] %vm3547_vm3, %v5281_v61  ;;  %5302 = vrcp.f32 %v3286_v59 }
 0x1f1   : > { %v5285_v63 = vpop.eup %5284  ;;  %3666 = vst.msk [vmem:[%s5656_s14 + $0x3b0] sm:$0xff] %vm3547_vm3, %v5283_v62  ;;  %5304 = vpow2.f32 %v4139_v58 }
 0x1f2   : > { %v5287_v0 = vpop.eup %5286  ;;  %3664 = vst.msk [vmem:[%s5656_s14 + $0x3a0] sm:$0xff] %vm3547_vm3, %v5285_v63 }
 0x1f3   : > { %v5289_v1 = vpop.eup %5288  ;;  %3667 = vst.msk [vmem:[%s5656_s14 + $0x3b8] sm:$0xff] %vm3547_vm3, %v5287_v0 }
 0x1f4   : > { %v5291_v2 = vpop.eup %5290  ;;  %v3284_v3 = vadd.f32 1.0, %v5289_v1 }
 0x1f5   : > { %v5293_v4 = vpop.eup %5292  ;;  %v3289_v5 = vadd.f32 1.0, %v5291_v2 }
 0x1f6   : > { %v5295_v6 = vpop.eup %5294  ;;  %5306 = vrcp.f32 %v3284_v3  ;;  %v3287_v7 = vadd.f32 1.0, %v5293_v4 }
 0x1f7   : > { %v5297_v8 = vpop.eup %5296  ;;  %5308 = vrcp.f32 %v3289_v5  ;;  %v3290_v9 = vadd.f32 1.0, %v5295_v6 }
 0x1f8   : > { %v5299_v10 = vpop.eup %5298  ;;  %3665 = vst.msk [vmem:[%s5656_s14 + $0x3a8] sm:$0xff] %vm3547_vm3, %v5297_v8  ;;  %5310 = vrcp.f32 %v3287_v7 }
 0x1f9   : > { %v5301_v11 = vpop.eup %5300  ;;  %3670 = vst.msk [vmem:[%s5656_s14 + $0x3d0] sm:$0xff] %vm3547_vm3, %v5299_v10  ;;  %5312 = vrcp.f32 %v3290_v9 }
 0x1fa   : > { %v5303_v12 = vpop.eup %5302  ;;  %3668 = vst.msk [vmem:[%s5656_s14 + $0x3c0] sm:$0xff] %vm3547_vm3, %v5301_v11 }
 0x1fb   : > { %v5305_v13 = vpop.eup %5304  ;;  %3671 = vst.msk [vmem:[%s5656_s14 + $0x3d8] sm:$0xff] %vm3547_vm3, %v5303_v12 }
 0x1fc   : > { %v3288_v14 = vadd.f32 1.0, %v5305_v13 }
 0x1fe   : > { %5314 = vrcp.f32 %v3288_v14 }
 0x200   : > { %v5307_v15 = vpop.eup %5306 }
 0x201   : > { %v5309_v16 = vpop.eup %5308  ;;  %3669 = vst.msk [vmem:[%s5656_s14 + $0x3c8] sm:$0xff] %vm3547_vm3, %v5307_v15 }
 0x202   : > { %v5311_v17 = vpop.eup %5310  ;;  %3674 = vst.msk [vmem:[%s5656_s14 + $0x3f0] sm:$0xff] %vm3547_vm3, %v5309_v16 }
 0x203   : > { %v5313_v18 = vpop.eup %5312  ;;  %3672 = vst.msk [vmem:[%s5656_s14 + $0x3e0] sm:$0xff] %vm3547_vm3, %v5311_v17 }
 0x204   : > { %3675 = vst.msk [vmem:[%s5656_s14 + $0x3f8] sm:$0xff] %vm3547_vm3, %v5313_v18 }
 0x208   : > { %v5315_v19 = vpop.eup %5314 }
 0x209   : > { %3673 = vst.msk [vmem:[%s5656_s14 + $0x3e8] sm:$0xff] %vm3547_vm3, %v5315_v19 }
 0x20a PF: > { %s15_s18 = sadd.s32 1, %s5324_s18  }
 0x20b   : > { %p12_p4 = scmp.ge.s32.totalorder %s15_s18, 4  }
 0x20d   :  { %14 = sbr.rel (!%p12_p4) target bundleno = 1 (0x1), region = 73 }

</bundles_post_ra>
